<compile_context>
chip_gen: v7x
topology: tpu7x:2x2x1
jax: 0.10.0
libtpu: 0.0.40
codegen_flags: <defaults>
</compile_context>

<pallas_src>
import jax
import jax.numpy as jnp
from jax.experimental import pallas as pl
from jax.experimental.pallas import tpu as pltpu


def _round_up(v, m):
    return (v + m - 1) // m * m


# ----------------------------------------------------------------------------
# Fused FCOS-head kernel (one grid step = one batch element)
# ----------------------------------------------------------------------------
def _make_fcos_kernel(H, W, D, n_rest, mxu_dtype):
    HW = H * W
    # Flat-index offset of conv tap t = (ky, kx) relative to the output pixel.
    offs = [((t // 3) - 1) * W + ((t % 3) - 1) for t in range(9)]

    def kernel(x_ref, m_ref, w1_ref, b1_ref, wc_ref, bc_ref, wr_ref, br_ref,
               wh_ref, bh_ref, o_ref):
        # x_ref:  (Cin_p, HW)      one batch element, channels on sublanes
        # m_ref:  (9, 1, HW)       {0,1} border masks per tap (implicit SAME pad)
        # w1_ref: (2D, 9*Cin_p)    layer-1 weights of both towers, BN folded
        # b1_ref: (2D, 1)          layer-1 folded-BN shift
        # wc_ref: (n_rest, D, 9D)  cls tower layers 2..num_head
        # bc_ref: (n_rest, D, 1)
        # wr_ref / br_ref:         same for the reg tower
        # wh_ref: (n_out, 2D)      fused 1x1 heads, K = [cls_feats | reg_feats]
        # bh_ref: (n_out, 1)
        # o_ref:  (n_out, HW)      lane-dense output slab
        masks = [m_ref[t] for t in range(9)]            # hoisted, each (1, HW)

        def conv_silu(act, wk, b):
            # act: (cin, HW) f32;  wk: (cout, 9*cin);  b: (cout, 1)
            # Build the im2col block (9*cin, HW): tap t is the activation
            # rotated by offs[t] along the flat HW axis, with out-of-image
            # source positions zeroed by the precomputed masks.
            pieces = []
            for t in range(9):
                s = offs[t] % HW
                if s == 0:
                    shifted = act
                else:
                    shifted = jnp.concatenate([act[:, s:], act[:, :s]], axis=1)
                if offs[t] != 0:
                    shifted = shifted * masks[t]
                pieces.append(shifted)
            cols = jnp.concatenate(pieces, axis=0)       # (9*cin, HW)
            # Single MXU matmul with K = 9*cin (accumulation inside the MXU).
            y = jnp.dot(wk.astype(mxu_dtype), cols.astype(mxu_dtype),
                        preferred_element_type=jnp.float32) + b
            return y * jax.nn.sigmoid(y)                 # SiLU (bias/act in f32)

        x = x_ref[...].astype(jnp.float32)               # (Cin_p, HW)

        # Layer 1 of both towers fused along Cout: input im2col'd exactly once.
        y1 = conv_silu(x, w1_ref[...], b1_ref[...])      # (2D, HW)
        cls_f = y1[:D, :]
        reg_f = y1[D:, :]

        # Remaining CBS layers of each tower; activations stay on-chip.
        for l in range(n_rest):
            cls_f = conv_silu(cls_f, wc_ref[l], bc_ref[l])
            reg_f = conv_silu(reg_f, wr_ref[l], br_ref[l])

        # Fused 1x1 heads: one matmul, no transposes, lane-dense output.
        feats = jnp.concatenate([cls_f, reg_f], axis=0)  # (2D, HW)
        pred = jnp.dot(wh_ref[...].astype(mxu_dtype), feats.astype(mxu_dtype),
                       preferred_element_type=jnp.float32) + bh_ref[...]
        o_ref[...] = pred.astype(o_ref.dtype)

    return kernel


# ----------------------------------------------------------------------------
# Wrapper
# ----------------------------------------------------------------------------
def fcos_head_forward(params, x_nchw, *, mxu_dtype=jnp.float32):
    """Run the fused FCOS head. params from pack_params(); x is NCHW."""
    N, Cin, H, W = x_nchw.shape
    HW = H * W
    n_rest, D = params["wc"].shape[0], params["wc"].shape[1]
    n_out = params["wh"].shape[0]
    nc = n_out - 5
    cin_p = params["w1"].shape[1] // 9

    # NCHW -> (N, C, H*W): this is already the channels-on-sublanes /
    # HW-on-lanes layout the kernel wants (no transpose). Pad channels to a
    # multiple of 8 so every sublane concat in the kernel is aligned.
    x = x_nchw.reshape(N, Cin, HW)
    if cin_p != Cin:
        x = jnp.pad(x, ((0, 0), (0, cin_p - Cin), (0, 0)))

    # Per-tap border masks for the implicit SAME padding; constant under jit.
    ys, xs = jnp.meshgrid(jnp.arange(H), jnp.arange(W), indexing="ij")
    ys, xs = ys.reshape(-1), xs.reshape(-1)
    masks = jnp.stack([
        ((ys + dy >= 0) & (ys + dy < H) & (xs + dx >= 0) & (xs + dx < W))
        .astype(jnp.float32)
        for dy in (-1, 0, 1) for dx in (-1, 0, 1)])[:, None, :]    # (9, 1, HW)

    kernel = _make_fcos_kernel(H, W, D, n_rest, mxu_dtype)

    def whole(arr):
        return pl.BlockSpec(arr.shape, lambda b, n=arr.ndim: (0,) * n)

    operands = (x, masks, params["w1"], params["b1"], params["wc"],
                params["bc"], params["wr"], params["br"], params["wh"],
                params["bh"])

    out = pl.pallas_call(
        kernel,
        out_shape=jax.ShapeDtypeStruct((N, n_out, HW), x_nchw.dtype),
        grid=(N,),
        in_specs=[pl.BlockSpec((None, cin_p, HW), lambda b: (b, 0, 0))]
                 + [whole(a) for a in operands[1:]],
        out_specs=pl.BlockSpec((None, n_out, HW), lambda b: (b, 0, 0)),
        compiler_params=pltpu.CompilerParams(
            dimension_semantics=("parallel",)),
    )(*operands)

    cls_pred = out[:, :nc, :].reshape(N, nc, H, W)
    reg_pred = out[:, nc:nc + 4, :].reshape(N, 4, H, W)
    ctn_pred = out[:, nc + 4:, :].reshape(N, 1, H, W)
    return cls_pred, reg_pred, ctn_pred


# ----------------------------------------------------------------------------
# Parameter construction (raw), BN folding / kernel packing, XLA reference
# ----------------------------------------------------------------------------
def init_fcos_params(key, in_dims, head_dim=64, num_classes=1, num_head=3):
    """Raw (unfolded) FCOSHead parameters: per-layer conv weights (HWIO) with
    eval-mode BatchNorm statistics, plus the three 1x1 prediction heads."""
    if not isinstance(in_dims, list):
        in_dims = [head_dim for _ in range(num_head)]
    assert len(in_dims) == num_head and num_head >= 2
    assert head_dim % 8 == 0
    assert all(d == head_dim for d in in_dims[1:]), \
        "tower layers 2..num_head must take head_dim-channel inputs"

    keys = jax.random.split(key, 2 * num_head + 3)
    ki = iter(keys)

    def conv_bn(k, cin, cout):
        return dict(
            w=0.05 * jax.random.normal(k, (3, 3, cin, cout), jnp.float32),  # HWIO
            gamma=jnp.ones((cout,), jnp.float32),
            beta=jnp.zeros((cout,), jnp.float32),
            mean=jnp.zeros((cout,), jnp.float32),
            var=jnp.ones((cout,), jnp.float32))

    cls_layers = [conv_bn(next(ki), in_dims[i], head_dim) for i in range(num_head)]
    reg_layers = [conv_bn(next(ki), in_dims[i], head_dim) for i in range(num_head)]

    bias_value = -jnp.log((1.0 - 0.01) / 0.01)     # cls prior bias, p = 0.01
    heads = dict(
        cls_w=0.01 * jax.random.normal(next(ki), (num_classes, head_dim), jnp.float32),
        cls_b=jnp.full((num_classes,), bias_value, jnp.float32),
        reg_w=0.01 * jax.random.normal(next(ki), (4, head_dim), jnp.float32),
        reg_b=jnp.zeros((4,), jnp.float32),
        ctn_w=0.01 * jax.random.normal(next(ki), (1, head_dim), jnp.float32),
        # The original _init_weight never initializes ctn_pred.bias (it sets
        # reg_pred.bias twice); we pin it to 0 deterministically.
        ctn_b=jnp.zeros((1,), jnp.float32))
    return dict(cls_layers=cls_layers, reg_layers=reg_layers, heads=heads)


def pack_params(raw, eps=1e-5):
    """Fold eval-mode BN into the conv weights and lay everything out for the
    kernel: each conv becomes (Cout, 9*Cin_p) with tap-major K (column
    t*Cin_p + i multiplies the tap-t-shifted activation of channel i)."""
    def fold(layer):
        scale = layer["gamma"] / jnp.sqrt(layer["var"] + eps)      # (cout,)
        shift = layer["beta"] - layer["mean"] * scale              # (cout,)
        wf = layer["w"] * scale                                    # (3,3,cin,cout)
        _, _, cin, cout = wf.shape
        cin_p = _round_up(cin, 8)          # keep in-kernel sublane tiles aligned
        if cin_p != cin:
            wf = jnp.pad(wf, ((0, 0), (0, 0), (0, cin_p - cin), (0, 0)))
        wk = wf.reshape(9, cin_p, cout).transpose(2, 0, 1).reshape(cout, 9 * cin_p)
        return wk, shift[:, None]

    cls = [fold(l) for l in raw["cls_layers"]]
    reg = [fold(l) for l in raw["reg_layers"]]

    # Layer 1 of both towers fused along Cout: rows [cls | reg].
    w1 = jnp.concatenate([cls[0][0], reg[0][0]], axis=0)           # (2D, 9*Cin_p)
    b1 = jnp.concatenate([cls[0][1], reg[0][1]], axis=0)           # (2D, 1)

    wc = jnp.stack([w for w, _ in cls[1:]], axis=0)                # (nh-1, D, 9D)
    bc = jnp.stack([b for _, b in cls[1:]], axis=0)                # (nh-1, D, 1)
    wr = jnp.stack([w for w, _ in reg[1:]], axis=0)
    br = jnp.stack([b for _, b in reg[1:]], axis=0)

    # Fused 1x1 heads: rows [cls(nc) | reg(4) | ctn(1)]; K = [cls_f | reg_f].
    h = raw["heads"]
    nc, D = h["cls_w"].shape
    n_out = nc + 5
    wh = jnp.zeros((n_out, 2 * D), jnp.float32)
    wh = wh.at[:nc, :D].set(h["cls_w"])
    wh = wh.at[nc:nc + 4, D:].set(h["reg_w"])
    wh = wh.at[nc + 4:, D:].set(h["ctn_w"])
    bh = jnp.concatenate([h["cls_b"], h["reg_b"], h["ctn_b"]])[:, None]

    return dict(w1=w1, b1=b1, wc=wc, bc=bc, wr=wr, br=br, wh=wh, bh=bh)


def reference_forward(raw, x_nchw, eps=1e-5):
    """Pure-XLA reference using the RAW (unfolded) parameters: explicit conv ->
    eval-mode BatchNorm -> SiLU, so the BN folding is validated independently."""
    hi = jax.lax.Precision.HIGHEST
    x = jnp.transpose(x_nchw, (0, 2, 3, 1))                        # NHWC

    def cbs(t, layer):
        y = jax.lax.conv_general_dilated(
            t, layer["w"], window_strides=(1, 1), padding="SAME",
            dimension_numbers=("NHWC", "HWIO", "NHWC"), precision=hi)
        y = (y - layer["mean"]) * (layer["gamma"] /
                                   jnp.sqrt(layer["var"] + eps)) + layer["beta"]
        return y * jax.nn.sigmoid(y)

    c, r = x, x
    for lc, lr in zip(raw["cls_layers"], raw["reg_layers"]):
        c = cbs(c, lc)
        r = cbs(r, lr)

    h = raw["heads"]

    def head(feats, w, b):
        y = jnp.einsum("nhwd,cd->nchw", feats, w, precision=hi)
        return y + b[None, :, None, None]

    return (head(c, h["cls_w"], h["cls_b"]),
            head(r, h["reg_w"], h["reg_b"]),
            head(r, h["ctn_w"], h["ctn_b"]))


if __name__ == "__main__":
    key = jax.random.PRNGKey(0)
    k_param, k_x = jax.random.split(key)

    # Small shapes consistent with the module: N=2, Cin=4, H=W=16, head_dim=32.
    N, Cin, H, W = 2, 4, 16, 16
    head_dim, num_classes, num_head = 32, 1, 3
    in_dims = [Cin, head_dim, head_dim]

    raw = init_fcos_params(k_param, in_dims, head_dim=head_dim,
                           num_classes=num_classes, num_head=num_head)
    params = pack_params(raw)
    x = jax.random.normal(k_x, (N, Cin, H, W), jnp.float32)        # NCHW input

    # TODO(synk): on v6e/v7x pass mxu_dtype=jnp.bfloat16 to halve MXU operand
    # traffic (accumulation stays f32); keep the default f32 on v5e.
    fwd = jax.jit(fcos_head_forward)
    cls_pred, reg_pred, ctn_pred = fwd(params, x)
    jax.block_until_ready((cls_pred, reg_pred, ctn_pred))

    assert cls_pred.shape == (N, num_classes, H, W)
    assert reg_pred.shape == (N, 4, H, W)
    assert ctn_pred.shape == (N, 1, H, W)

    # Correctness vs. a pure-XLA reference built from the RAW parameters.
    ref_cls, ref_reg, ref_ctn = reference_forward(raw, x)
    for name, got, ref in (("cls", cls_pred, ref_cls),
                           ("reg", reg_pred, ref_reg),
                           ("ctn", ctn_pred, ref_ctn)):
        err = float(jnp.max(jnp.abs(got - ref)))
        assert jnp.allclose(got, ref, rtol=5e-3, atol=5e-3), (name, err)

    print("KERNEL_OK")
</pallas_src>

<mosaic_0001>
module attributes {stable_mosaic.version = 11 : i64} {
  func.func @kernel(%arg0: i32, %arg1: memref<1x8x256xf32, #tpu.memory_space<vmem>>, %arg2: memref<9x1x256xf32, #tpu.memory_space<vmem>>, %arg3: memref<64x72xf32, #tpu.memory_space<vmem>>, %arg4: memref<64x1xf32, #tpu.memory_space<vmem>>, %arg5: memref<2x32x288xf32, #tpu.memory_space<vmem>>, %arg6: memref<2x32x1xf32, #tpu.memory_space<vmem>>, %arg7: memref<2x32x288xf32, #tpu.memory_space<vmem>>, %arg8: memref<2x32x1xf32, #tpu.memory_space<vmem>>, %arg9: memref<6x64xf32, #tpu.memory_space<vmem>>, %arg10: memref<6x1xf32, #tpu.memory_space<vmem>>, %arg11: memref<1x6x256xf32, #tpu.memory_space<vmem>>) attributes {dimension_semantics = [#tpu.dimension_semantics<parallel>], iteration_bounds = array<i64: 2>, scalar_prefetch = 0 : i64, scratch_operands = 0 : i64, tpu.core_type = #tpu.core_type<tc>, window_params = [{transform_indices = @transform_0, window_bounds = array<i64: 1, 8, 256>}, {pipeline_mode = #tpu.pipeline_mode<synchronous>, transform_indices = @transform_1, window_bounds = array<i64: 9, 1, 256>}, {pipeline_mode = #tpu.pipeline_mode<synchronous>, transform_indices = @transform_2, window_bounds = array<i64: 64, 72>}, {pipeline_mode = #tpu.pipeline_mode<synchronous>, transform_indices = @transform_3, window_bounds = array<i64: 64, 1>}, {pipeline_mode = #tpu.pipeline_mode<synchronous>, transform_indices = @transform_4, window_bounds = array<i64: 2, 32, 288>}, {pipeline_mode = #tpu.pipeline_mode<synchronous>, transform_indices = @transform_5, window_bounds = array<i64: 2, 32, 1>}, {pipeline_mode = #tpu.pipeline_mode<synchronous>, transform_indices = @transform_6, window_bounds = array<i64: 2, 32, 288>}, {pipeline_mode = #tpu.pipeline_mode<synchronous>, transform_indices = @transform_7, window_bounds = array<i64: 2, 32, 1>}, {pipeline_mode = #tpu.pipeline_mode<synchronous>, transform_indices = @transform_8, window_bounds = array<i64: 6, 64>}, {pipeline_mode = #tpu.pipeline_mode<synchronous>, transform_indices = @transform_9, window_bounds = array<i64: 6, 1>}, {transform_indices = @transform_10, window_bounds = array<i64: 1, 6, 256>}]} {
    %c0 = arith.constant 0 : index
    %c0_0 = arith.constant 0 : index
    %c0_1 = arith.constant 0 : index
    %0 = vector.load %arg2[%c0, %c0_0, %c0_1] : memref<9x1x256xf32, #tpu.memory_space<vmem>>, vector<1x1x256xf32>
    %1 = vector.shape_cast %0 : vector<1x1x256xf32> to vector<1x256xf32>
    %c1 = arith.constant 1 : index
    %c0_2 = arith.constant 0 : index
    %c0_3 = arith.constant 0 : index
    %2 = vector.load %arg2[%c1, %c0_2, %c0_3] : memref<9x1x256xf32, #tpu.memory_space<vmem>>, vector<1x1x256xf32>
    %3 = vector.shape_cast %2 : vector<1x1x256xf32> to vector<1x256xf32>
    %c2 = arith.constant 2 : index
    %c0_4 = arith.constant 0 : index
    %c0_5 = arith.constant 0 : index
    %4 = vector.load %arg2[%c2, %c0_4, %c0_5] : memref<9x1x256xf32, #tpu.memory_space<vmem>>, vector<1x1x256xf32>
    %5 = vector.shape_cast %4 : vector<1x1x256xf32> to vector<1x256xf32>
    %c3 = arith.constant 3 : index
    %c0_6 = arith.constant 0 : index
    %c0_7 = arith.constant 0 : index
    %6 = vector.load %arg2[%c3, %c0_6, %c0_7] : memref<9x1x256xf32, #tpu.memory_space<vmem>>, vector<1x1x256xf32>
    %7 = vector.shape_cast %6 : vector<1x1x256xf32> to vector<1x256xf32>
    %c5 = arith.constant 5 : index
    %c0_8 = arith.constant 0 : index
    %c0_9 = arith.constant 0 : index
    %8 = vector.load %arg2[%c5, %c0_8, %c0_9] : memref<9x1x256xf32, #tpu.memory_space<vmem>>, vector<1x1x256xf32>
    %9 = vector.shape_cast %8 : vector<1x1x256xf32> to vector<1x256xf32>
    %c6 = arith.constant 6 : index
    %c0_10 = arith.constant 0 : index
    %c0_11 = arith.constant 0 : index
    %10 = vector.load %arg2[%c6, %c0_10, %c0_11] : memref<9x1x256xf32, #tpu.memory_space<vmem>>, vector<1x1x256xf32>
    %11 = vector.shape_cast %10 : vector<1x1x256xf32> to vector<1x256xf32>
    %c7 = arith.constant 7 : index
    %c0_12 = arith.constant 0 : index
    %c0_13 = arith.constant 0 : index
    %12 = vector.load %arg2[%c7, %c0_12, %c0_13] : memref<9x1x256xf32, #tpu.memory_space<vmem>>, vector<1x1x256xf32>
    %13 = vector.shape_cast %12 : vector<1x1x256xf32> to vector<1x256xf32>
    %c8 = arith.constant 8 : index
    %c0_14 = arith.constant 0 : index
    %c0_15 = arith.constant 0 : index
    %14 = vector.load %arg2[%c8, %c0_14, %c0_15] : memref<9x1x256xf32, #tpu.memory_space<vmem>>, vector<1x1x256xf32>
    %15 = vector.shape_cast %14 : vector<1x1x256xf32> to vector<1x256xf32>
    %c0_16 = arith.constant 0 : index
    %c0_17 = arith.constant 0 : index
    %c0_18 = arith.constant 0 : index
    %16 = vector.load %arg1[%c0_16, %c0_17, %c0_18] : memref<1x8x256xf32, #tpu.memory_space<vmem>>, vector<1x8x256xf32>
    %17 = vector.shape_cast %16 : vector<1x8x256xf32> to vector<8x256xf32>
    %c0_19 = arith.constant 0 : index
    %c0_20 = arith.constant 0 : index
    %18 = vector.load %arg3[%c0_19, %c0_20] : memref<64x72xf32, #tpu.memory_space<vmem>>, vector<64x72xf32>
    %c0_21 = arith.constant 0 : index
    %c0_22 = arith.constant 0 : index
    %19 = vector.load %arg4[%c0_21, %c0_22] : memref<64x1xf32, #tpu.memory_space<vmem>>, vector<64x1xf32>
    %20 = vector.extract_strided_slice %17 {offsets = [0, 239], sizes = [8, 17], strides = [1, 1]} : vector<8x256xf32> to vector<8x17xf32>
    %21 = vector.extract_strided_slice %17 {offsets = [0, 0], sizes = [8, 239], strides = [1, 1]} : vector<8x256xf32> to vector<8x239xf32>
    %22 = tpu.concatenate %20, %21 in 1 : vector<8x17xf32>, vector<8x239xf32> -> vector<8x256xf32>
    %23 = vector.broadcast %1 : vector<1x256xf32> to vector<8x256xf32>
    %24 = arith.mulf %22, %23 : vector<8x256xf32>
    %25 = vector.extract_strided_slice %17 {offsets = [0, 240], sizes = [8, 16], strides = [1, 1]} : vector<8x256xf32> to vector<8x16xf32>
    %26 = vector.extract_strided_slice %17 {offsets = [0, 0], sizes = [8, 240], strides = [1, 1]} : vector<8x256xf32> to vector<8x240xf32>
    %27 = tpu.concatenate %25, %26 in 1 : vector<8x16xf32>, vector<8x240xf32> -> vector<8x256xf32>
    %28 = vector.broadcast %3 : vector<1x256xf32> to vector<8x256xf32>
    %29 = arith.mulf %27, %28 : vector<8x256xf32>
    %30 = vector.extract_strided_slice %17 {offsets = [0, 241], sizes = [8, 15], strides = [1, 1]} : vector<8x256xf32> to vector<8x15xf32>
    %31 = vector.extract_strided_slice %17 {offsets = [0, 0], sizes = [8, 241], strides = [1, 1]} : vector<8x256xf32> to vector<8x241xf32>
    %32 = tpu.concatenate %30, %31 in 1 : vector<8x15xf32>, vector<8x241xf32> -> vector<8x256xf32>
    %33 = vector.broadcast %5 : vector<1x256xf32> to vector<8x256xf32>
    %34 = arith.mulf %32, %33 : vector<8x256xf32>
    %35 = vector.extract_strided_slice %17 {offsets = [0, 255], sizes = [8, 1], strides = [1, 1]} : vector<8x256xf32> to vector<8x1xf32>
    %36 = vector.extract_strided_slice %17 {offsets = [0, 0], sizes = [8, 255], strides = [1, 1]} : vector<8x256xf32> to vector<8x255xf32>
    %37 = tpu.concatenate %35, %36 in 1 : vector<8x1xf32>, vector<8x255xf32> -> vector<8x256xf32>
    %38 = vector.broadcast %7 : vector<1x256xf32> to vector<8x256xf32>
    %39 = arith.mulf %37, %38 : vector<8x256xf32>
    %40 = vector.extract_strided_slice %17 {offsets = [0, 1], sizes = [8, 255], strides = [1, 1]} : vector<8x256xf32> to vector<8x255xf32>
    %41 = vector.extract_strided_slice %17 {offsets = [0, 0], sizes = [8, 1], strides = [1, 1]} : vector<8x256xf32> to vector<8x1xf32>
    %42 = tpu.concatenate %40, %41 in 1 : vector<8x255xf32>, vector<8x1xf32> -> vector<8x256xf32>
    %43 = vector.broadcast %9 : vector<1x256xf32> to vector<8x256xf32>
    %44 = arith.mulf %42, %43 : vector<8x256xf32>
    %45 = vector.extract_strided_slice %17 {offsets = [0, 15], sizes = [8, 241], strides = [1, 1]} : vector<8x256xf32> to vector<8x241xf32>
    %46 = vector.extract_strided_slice %17 {offsets = [0, 0], sizes = [8, 15], strides = [1, 1]} : vector<8x256xf32> to vector<8x15xf32>
    %47 = tpu.concatenate %45, %46 in 1 : vector<8x241xf32>, vector<8x15xf32> -> vector<8x256xf32>
    %48 = vector.broadcast %11 : vector<1x256xf32> to vector<8x256xf32>
    %49 = arith.mulf %47, %48 : vector<8x256xf32>
    %50 = vector.extract_strided_slice %17 {offsets = [0, 16], sizes = [8, 240], strides = [1, 1]} : vector<8x256xf32> to vector<8x240xf32>
    %51 = vector.extract_strided_slice %17 {offsets = [0, 0], sizes = [8, 16], strides = [1, 1]} : vector<8x256xf32> to vector<8x16xf32>
    %52 = tpu.concatenate %50, %51 in 1 : vector<8x240xf32>, vector<8x16xf32> -> vector<8x256xf32>
    %53 = vector.broadcast %13 : vector<1x256xf32> to vector<8x256xf32>
    %54 = arith.mulf %52, %53 : vector<8x256xf32>
    %55 = vector.extract_strided_slice %17 {offsets = [0, 17], sizes = [8, 239], strides = [1, 1]} : vector<8x256xf32> to vector<8x239xf32>
    %56 = vector.extract_strided_slice %17 {offsets = [0, 0], sizes = [8, 17], strides = [1, 1]} : vector<8x256xf32> to vector<8x17xf32>
    %57 = tpu.concatenate %55, %56 in 1 : vector<8x239xf32>, vector<8x17xf32> -> vector<8x256xf32>
    %58 = vector.broadcast %15 : vector<1x256xf32> to vector<8x256xf32>
    %59 = arith.mulf %57, %58 : vector<8x256xf32>
    %60 = tpu.concatenate %24, %29, %34, %39, %17, %44, %49, %54, %59 in 0 : vector<8x256xf32>, vector<8x256xf32>, vector<8x256xf32>, vector<8x256xf32>, vector<8x256xf32>, vector<8x256xf32>, vector<8x256xf32>, vector<8x256xf32>, vector<8x256xf32> -> vector<72x256xf32>
    %cst = arith.constant dense<0.000000e+00> : vector<64x256xf32>
    %61 = tpu.matmul %18, %60, %cst {dimension_numbers = #tpu.dot_dimension_numbers<[1], [0], [0], [1], [0, 0, 1, 1], [], []>} : vector<64x72xf32>, vector<72x256xf32>, vector<64x256xf32> -> vector<64x256xf32>
    %62 = vector.broadcast %19 : vector<64x1xf32> to vector<64x256xf32>
    %63 = arith.addf %61, %62 : vector<64x256xf32>
    %64 = arith.negf %63 : vector<64x256xf32>
    %65 = math.exp %64 : vector<64x256xf32>
    %cst_23 = arith.constant 1.000000e+00 : f32
    %66 = vector.broadcast %cst_23 : f32 to vector<64x256xf32>
    %67 = arith.addf %66, %65 : vector<64x256xf32>
    %68 = arith.divf %66, %67 : vector<64x256xf32>
    %69 = arith.mulf %63, %68 : vector<64x256xf32>
    %70 = vector.extract_strided_slice %69 {offsets = [0, 0], sizes = [32, 256], strides = [1, 1]} : vector<64x256xf32> to vector<32x256xf32>
    %71 = vector.extract_strided_slice %69 {offsets = [32, 0], sizes = [32, 256], strides = [1, 1]} : vector<64x256xf32> to vector<32x256xf32>
    %c0_24 = arith.constant 0 : index
    %c0_25 = arith.constant 0 : index
    %c0_26 = arith.constant 0 : index
    %72 = vector.load %arg5[%c0_24, %c0_25, %c0_26] : memref<2x32x288xf32, #tpu.memory_space<vmem>>, vector<1x32x288xf32>
    %73 = vector.shape_cast %72 : vector<1x32x288xf32> to vector<32x288xf32>
    %c0_27 = arith.constant 0 : index
    %c0_28 = arith.constant 0 : index
    %c0_29 = arith.constant 0 : index
    %74 = vector.load %arg6[%c0_27, %c0_28, %c0_29] : memref<2x32x1xf32, #tpu.memory_space<vmem>>, vector<1x32x1xf32>
    %75 = vector.shape_cast %74 : vector<1x32x1xf32> to vector<32x1xf32>
    %76 = vector.extract_strided_slice %70 {offsets = [0, 239], sizes = [32, 17], strides = [1, 1]} : vector<32x256xf32> to vector<32x17xf32>
    %77 = vector.extract_strided_slice %70 {offsets = [0, 0], sizes = [32, 239], strides = [1, 1]} : vector<32x256xf32> to vector<32x239xf32>
    %78 = tpu.concatenate %76, %77 in 1 : vector<32x17xf32>, vector<32x239xf32> -> vector<32x256xf32>
    %79 = vector.broadcast %1 : vector<1x256xf32> to vector<32x256xf32>
    %80 = arith.mulf %78, %79 : vector<32x256xf32>
    %81 = vector.extract_strided_slice %70 {offsets = [0, 240], sizes = [32, 16], strides = [1, 1]} : vector<32x256xf32> to vector<32x16xf32>
    %82 = vector.extract_strided_slice %70 {offsets = [0, 0], sizes = [32, 240], strides = [1, 1]} : vector<32x256xf32> to vector<32x240xf32>
    %83 = tpu.concatenate %81, %82 in 1 : vector<32x16xf32>, vector<32x240xf32> -> vector<32x256xf32>
    %84 = vector.broadcast %3 : vector<1x256xf32> to vector<32x256xf32>
    %85 = arith.mulf %83, %84 : vector<32x256xf32>
    %86 = vector.extract_strided_slice %70 {offsets = [0, 241], sizes = [32, 15], strides = [1, 1]} : vector<32x256xf32> to vector<32x15xf32>
    %87 = vector.extract_strided_slice %70 {offsets = [0, 0], sizes = [32, 241], strides = [1, 1]} : vector<32x256xf32> to vector<32x241xf32>
    %88 = tpu.concatenate %86, %87 in 1 : vector<32x15xf32>, vector<32x241xf32> -> vector<32x256xf32>
    %89 = vector.broadcast %5 : vector<1x256xf32> to vector<32x256xf32>
    %90 = arith.mulf %88, %89 : vector<32x256xf32>
    %91 = vector.extract_strided_slice %70 {offsets = [0, 255], sizes = [32, 1], strides = [1, 1]} : vector<32x256xf32> to vector<32x1xf32>
    %92 = vector.extract_strided_slice %70 {offsets = [0, 0], sizes = [32, 255], strides = [1, 1]} : vector<32x256xf32> to vector<32x255xf32>
    %93 = tpu.concatenate %91, %92 in 1 : vector<32x1xf32>, vector<32x255xf32> -> vector<32x256xf32>
    %94 = vector.broadcast %7 : vector<1x256xf32> to vector<32x256xf32>
    %95 = arith.mulf %93, %94 : vector<32x256xf32>
    %96 = vector.extract_strided_slice %70 {offsets = [0, 1], sizes = [32, 255], strides = [1, 1]} : vector<32x256xf32> to vector<32x255xf32>
    %97 = vector.extract_strided_slice %70 {offsets = [0, 0], sizes = [32, 1], strides = [1, 1]} : vector<32x256xf32> to vector<32x1xf32>
    %98 = tpu.concatenate %96, %97 in 1 : vector<32x255xf32>, vector<32x1xf32> -> vector<32x256xf32>
    %99 = vector.broadcast %9 : vector<1x256xf32> to vector<32x256xf32>
    %100 = arith.mulf %98, %99 : vector<32x256xf32>
    %101 = vector.extract_strided_slice %70 {offsets = [0, 15], sizes = [32, 241], strides = [1, 1]} : vector<32x256xf32> to vector<32x241xf32>
    %102 = vector.extract_strided_slice %70 {offsets = [0, 0], sizes = [32, 15], strides = [1, 1]} : vector<32x256xf32> to vector<32x15xf32>
    %103 = tpu.concatenate %101, %102 in 1 : vector<32x241xf32>, vector<32x15xf32> -> vector<32x256xf32>
    %104 = vector.broadcast %11 : vector<1x256xf32> to vector<32x256xf32>
    %105 = arith.mulf %103, %104 : vector<32x256xf32>
    %106 = vector.extract_strided_slice %70 {offsets = [0, 16], sizes = [32, 240], strides = [1, 1]} : vector<32x256xf32> to vector<32x240xf32>
    %107 = vector.extract_strided_slice %70 {offsets = [0, 0], sizes = [32, 16], strides = [1, 1]} : vector<32x256xf32> to vector<32x16xf32>
    %108 = tpu.concatenate %106, %107 in 1 : vector<32x240xf32>, vector<32x16xf32> -> vector<32x256xf32>
    %109 = vector.broadcast %13 : vector<1x256xf32> to vector<32x256xf32>
    %110 = arith.mulf %108, %109 : vector<32x256xf32>
    %111 = vector.extract_strided_slice %70 {offsets = [0, 17], sizes = [32, 239], strides = [1, 1]} : vector<32x256xf32> to vector<32x239xf32>
    %112 = vector.extract_strided_slice %70 {offsets = [0, 0], sizes = [32, 17], strides = [1, 1]} : vector<32x256xf32> to vector<32x17xf32>
    %113 = tpu.concatenate %111, %112 in 1 : vector<32x239xf32>, vector<32x17xf32> -> vector<32x256xf32>
    %114 = vector.broadcast %15 : vector<1x256xf32> to vector<32x256xf32>
    %115 = arith.mulf %113, %114 : vector<32x256xf32>
    %116 = tpu.concatenate %80, %85, %90, %95, %70, %100, %105, %110, %115 in 0 : vector<32x256xf32>, vector<32x256xf32>, vector<32x256xf32>, vector<32x256xf32>, vector<32x256xf32>, vector<32x256xf32>, vector<32x256xf32>, vector<32x256xf32>, vector<32x256xf32> -> vector<288x256xf32>
    %cst_30 = arith.constant dense<0.000000e+00> : vector<32x256xf32>
    %117 = tpu.matmul %73, %116, %cst_30 {dimension_numbers = #tpu.dot_dimension_numbers<[1], [0], [0], [1], [0, 0, 1, 1], [], []>} : vector<32x288xf32>, vector<288x256xf32>, vector<32x256xf32> -> vector<32x256xf32>
    %118 = vector.broadcast %75 : vector<32x1xf32> to vector<32x256xf32>
    %119 = arith.addf %117, %118 : vector<32x256xf32>
    %120 = arith.negf %119 : vector<32x256xf32>
    %121 = math.exp %120 : vector<32x256xf32>
    %cst_31 = arith.constant 1.000000e+00 : f32
    %122 = vector.broadcast %cst_31 : f32 to vector<32x256xf32>
    %123 = arith.addf %122, %121 : vector<32x256xf32>
    %124 = arith.divf %122, %123 : vector<32x256xf32>
    %125 = arith.mulf %119, %124 : vector<32x256xf32>
    %c0_32 = arith.constant 0 : index
    %c0_33 = arith.constant 0 : index
    %c0_34 = arith.constant 0 : index
    %126 = vector.load %arg7[%c0_32, %c0_33, %c0_34] : memref<2x32x288xf32, #tpu.memory_space<vmem>>, vector<1x32x288xf32>
    %127 = vector.shape_cast %126 : vector<1x32x288xf32> to vector<32x288xf32>
    %c0_35 = arith.constant 0 : index
    %c0_36 = arith.constant 0 : index
    %c0_37 = arith.constant 0 : index
    %128 = vector.load %arg8[%c0_35, %c0_36, %c0_37] : memref<2x32x1xf32, #tpu.memory_space<vmem>>, vector<1x32x1xf32>
    %129 = vector.shape_cast %128 : vector<1x32x1xf32> to vector<32x1xf32>
    %130 = vector.extract_strided_slice %71 {offsets = [0, 239], sizes = [32, 17], strides = [1, 1]} : vector<32x256xf32> to vector<32x17xf32>
    %131 = vector.extract_strided_slice %71 {offsets = [0, 0], sizes = [32, 239], strides = [1, 1]} : vector<32x256xf32> to vector<32x239xf32>
    %132 = tpu.concatenate %130, %131 in 1 : vector<32x17xf32>, vector<32x239xf32> -> vector<32x256xf32>
    %133 = vector.broadcast %1 : vector<1x256xf32> to vector<32x256xf32>
    %134 = arith.mulf %132, %133 : vector<32x256xf32>
    %135 = vector.extract_strided_slice %71 {offsets = [0, 240], sizes = [32, 16], strides = [1, 1]} : vector<32x256xf32> to vector<32x16xf32>
    %136 = vector.extract_strided_slice %71 {offsets = [0, 0], sizes = [32, 240], strides = [1, 1]} : vector<32x256xf32> to vector<32x240xf32>
    %137 = tpu.concatenate %135, %136 in 1 : vector<32x16xf32>, vector<32x240xf32> -> vector<32x256xf32>
    %138 = vector.broadcast %3 : vector<1x256xf32> to vector<32x256xf32>
    %139 = arith.mulf %137, %138 : vector<32x256xf32>
    %140 = vector.extract_strided_slice %71 {offsets = [0, 241], sizes = [32, 15], strides = [1, 1]} : vector<32x256xf32> to vector<32x15xf32>
    %141 = vector.extract_strided_slice %71 {offsets = [0, 0], sizes = [32, 241], strides = [1, 1]} : vector<32x256xf32> to vector<32x241xf32>
    %142 = tpu.concatenate %140, %141 in 1 : vector<32x15xf32>, vector<32x241xf32> -> vector<32x256xf32>
    %143 = vector.broadcast %5 : vector<1x256xf32> to vector<32x256xf32>
    %144 = arith.mulf %142, %143 : vector<32x256xf32>
    %145 = vector.extract_strided_slice %71 {offsets = [0, 255], sizes = [32, 1], strides = [1, 1]} : vector<32x256xf32> to vector<32x1xf32>
    %146 = vector.extract_strided_slice %71 {offsets = [0, 0], sizes = [32, 255], strides = [1, 1]} : vector<32x256xf32> to vector<32x255xf32>
    %147 = tpu.concatenate %145, %146 in 1 : vector<32x1xf32>, vector<32x255xf32> -> vector<32x256xf32>
    %148 = vector.broadcast %7 : vector<1x256xf32> to vector<32x256xf32>
    %149 = arith.mulf %147, %148 : vector<32x256xf32>
    %150 = vector.extract_strided_slice %71 {offsets = [0, 1], sizes = [32, 255], strides = [1, 1]} : vector<32x256xf32> to vector<32x255xf32>
    %151 = vector.extract_strided_slice %71 {offsets = [0, 0], sizes = [32, 1], strides = [1, 1]} : vector<32x256xf32> to vector<32x1xf32>
    %152 = tpu.concatenate %150, %151 in 1 : vector<32x255xf32>, vector<32x1xf32> -> vector<32x256xf32>
    %153 = vector.broadcast %9 : vector<1x256xf32> to vector<32x256xf32>
    %154 = arith.mulf %152, %153 : vector<32x256xf32>
    %155 = vector.extract_strided_slice %71 {offsets = [0, 15], sizes = [32, 241], strides = [1, 1]} : vector<32x256xf32> to vector<32x241xf32>
    %156 = vector.extract_strided_slice %71 {offsets = [0, 0], sizes = [32, 15], strides = [1, 1]} : vector<32x256xf32> to vector<32x15xf32>
    %157 = tpu.concatenate %155, %156 in 1 : vector<32x241xf32>, vector<32x15xf32> -> vector<32x256xf32>
    %158 = vector.broadcast %11 : vector<1x256xf32> to vector<32x256xf32>
    %159 = arith.mulf %157, %158 : vector<32x256xf32>
    %160 = vector.extract_strided_slice %71 {offsets = [0, 16], sizes = [32, 240], strides = [1, 1]} : vector<32x256xf32> to vector<32x240xf32>
    %161 = vector.extract_strided_slice %71 {offsets = [0, 0], sizes = [32, 16], strides = [1, 1]} : vector<32x256xf32> to vector<32x16xf32>
    %162 = tpu.concatenate %160, %161 in 1 : vector<32x240xf32>, vector<32x16xf32> -> vector<32x256xf32>
    %163 = vector.broadcast %13 : vector<1x256xf32> to vector<32x256xf32>
    %164 = arith.mulf %162, %163 : vector<32x256xf32>
    %165 = vector.extract_strided_slice %71 {offsets = [0, 17], sizes = [32, 239], strides = [1, 1]} : vector<32x256xf32> to vector<32x239xf32>
    %166 = vector.extract_strided_slice %71 {offsets = [0, 0], sizes = [32, 17], strides = [1, 1]} : vector<32x256xf32> to vector<32x17xf32>
    %167 = tpu.concatenate %165, %166 in 1 : vector<32x239xf32>, vector<32x17xf32> -> vector<32x256xf32>
    %168 = vector.broadcast %15 : vector<1x256xf32> to vector<32x256xf32>
    %169 = arith.mulf %167, %168 : vector<32x256xf32>
    %170 = tpu.concatenate %134, %139, %144, %149, %71, %154, %159, %164, %169 in 0 : vector<32x256xf32>, vector<32x256xf32>, vector<32x256xf32>, vector<32x256xf32>, vector<32x256xf32>, vector<32x256xf32>, vector<32x256xf32>, vector<32x256xf32>, vector<32x256xf32> -> vector<288x256xf32>
    %cst_38 = arith.constant dense<0.000000e+00> : vector<32x256xf32>
    %171 = tpu.matmul %127, %170, %cst_38 {dimension_numbers = #tpu.dot_dimension_numbers<[1], [0], [0], [1], [0, 0, 1, 1], [], []>} : vector<32x288xf32>, vector<288x256xf32>, vector<32x256xf32> -> vector<32x256xf32>
    %172 = vector.broadcast %129 : vector<32x1xf32> to vector<32x256xf32>
    %173 = arith.addf %171, %172 : vector<32x256xf32>
    %174 = arith.negf %173 : vector<32x256xf32>
    %175 = math.exp %174 : vector<32x256xf32>
    %cst_39 = arith.constant 1.000000e+00 : f32
    %176 = vector.broadcast %cst_39 : f32 to vector<32x256xf32>
    %177 = arith.addf %176, %175 : vector<32x256xf32>
    %178 = arith.divf %176, %177 : vector<32x256xf32>
    %179 = arith.mulf %173, %178 : vector<32x256xf32>
    %c1_40 = arith.constant 1 : index
    %c0_41 = arith.constant 0 : index
    %c0_42 = arith.constant 0 : index
    %180 = vector.load %arg5[%c1_40, %c0_41, %c0_42] : memref<2x32x288xf32, #tpu.memory_space<vmem>>, vector<1x32x288xf32>
    %181 = vector.shape_cast %180 : vector<1x32x288xf32> to vector<32x288xf32>
    %c1_43 = arith.constant 1 : index
    %c0_44 = arith.constant 0 : index
    %c0_45 = arith.constant 0 : index
    %182 = vector.load %arg6[%c1_43, %c0_44, %c0_45] : memref<2x32x1xf32, #tpu.memory_space<vmem>>, vector<1x32x1xf32>
    %183 = vector.shape_cast %182 : vector<1x32x1xf32> to vector<32x1xf32>
    %184 = vector.extract_strided_slice %125 {offsets = [0, 239], sizes = [32, 17], strides = [1, 1]} : vector<32x256xf32> to vector<32x17xf32>
    %185 = vector.extract_strided_slice %125 {offsets = [0, 0], sizes = [32, 239], strides = [1, 1]} : vector<32x256xf32> to vector<32x239xf32>
    %186 = tpu.concatenate %184, %185 in 1 : vector<32x17xf32>, vector<32x239xf32> -> vector<32x256xf32>
    %187 = vector.broadcast %1 : vector<1x256xf32> to vector<32x256xf32>
    %188 = arith.mulf %186, %187 : vector<32x256xf32>
    %189 = vector.extract_strided_slice %125 {offsets = [0, 240], sizes = [32, 16], strides = [1, 1]} : vector<32x256xf32> to vector<32x16xf32>
    %190 = vector.extract_strided_slice %125 {offsets = [0, 0], sizes = [32, 240], strides = [1, 1]} : vector<32x256xf32> to vector<32x240xf32>
    %191 = tpu.concatenate %189, %190 in 1 : vector<32x16xf32>, vector<32x240xf32> -> vector<32x256xf32>
    %192 = vector.broadcast %3 : vector<1x256xf32> to vector<32x256xf32>
    %193 = arith.mulf %191, %192 : vector<32x256xf32>
    %194 = vector.extract_strided_slice %125 {offsets = [0, 241], sizes = [32, 15], strides = [1, 1]} : vector<32x256xf32> to vector<32x15xf32>
    %195 = vector.extract_strided_slice %125 {offsets = [0, 0], sizes = [32, 241], strides = [1, 1]} : vector<32x256xf32> to vector<32x241xf32>
    %196 = tpu.concatenate %194, %195 in 1 : vector<32x15xf32>, vector<32x241xf32> -> vector<32x256xf32>
    %197 = vector.broadcast %5 : vector<1x256xf32> to vector<32x256xf32>
    %198 = arith.mulf %196, %197 : vector<32x256xf32>
    %199 = vector.extract_strided_slice %125 {offsets = [0, 255], sizes = [32, 1], strides = [1, 1]} : vector<32x256xf32> to vector<32x1xf32>
    %200 = vector.extract_strided_slice %125 {offsets = [0, 0], sizes = [32, 255], strides = [1, 1]} : vector<32x256xf32> to vector<32x255xf32>
    %201 = tpu.concatenate %199, %200 in 1 : vector<32x1xf32>, vector<32x255xf32> -> vector<32x256xf32>
    %202 = vector.broadcast %7 : vector<1x256xf32> to vector<32x256xf32>
    %203 = arith.mulf %201, %202 : vector<32x256xf32>
    %204 = vector.extract_strided_slice %125 {offsets = [0, 1], sizes = [32, 255], strides = [1, 1]} : vector<32x256xf32> to vector<32x255xf32>
    %205 = vector.extract_strided_slice %125 {offsets = [0, 0], sizes = [32, 1], strides = [1, 1]} : vector<32x256xf32> to vector<32x1xf32>
    %206 = tpu.concatenate %204, %205 in 1 : vector<32x255xf32>, vector<32x1xf32> -> vector<32x256xf32>
    %207 = vector.broadcast %9 : vector<1x256xf32> to vector<32x256xf32>
    %208 = arith.mulf %206, %207 : vector<32x256xf32>
    %209 = vector.extract_strided_slice %125 {offsets = [0, 15], sizes = [32, 241], strides = [1, 1]} : vector<32x256xf32> to vector<32x241xf32>
    %210 = vector.extract_strided_slice %125 {offsets = [0, 0], sizes = [32, 15], strides = [1, 1]} : vector<32x256xf32> to vector<32x15xf32>
    %211 = tpu.concatenate %209, %210 in 1 : vector<32x241xf32>, vector<32x15xf32> -> vector<32x256xf32>
    %212 = vector.broadcast %11 : vector<1x256xf32> to vector<32x256xf32>
    %213 = arith.mulf %211, %212 : vector<32x256xf32>
    %214 = vector.extract_strided_slice %125 {offsets = [0, 16], sizes = [32, 240], strides = [1, 1]} : vector<32x256xf32> to vector<32x240xf32>
    %215 = vector.extract_strided_slice %125 {offsets = [0, 0], sizes = [32, 16], strides = [1, 1]} : vector<32x256xf32> to vector<32x16xf32>
    %216 = tpu.concatenate %214, %215 in 1 : vector<32x240xf32>, vector<32x16xf32> -> vector<32x256xf32>
    %217 = vector.broadcast %13 : vector<1x256xf32> to vector<32x256xf32>
    %218 = arith.mulf %216, %217 : vector<32x256xf32>
    %219 = vector.extract_strided_slice %125 {offsets = [0, 17], sizes = [32, 239], strides = [1, 1]} : vector<32x256xf32> to vector<32x239xf32>
    %220 = vector.extract_strided_slice %125 {offsets = [0, 0], sizes = [32, 17], strides = [1, 1]} : vector<32x256xf32> to vector<32x17xf32>
    %221 = tpu.concatenate %219, %220 in 1 : vector<32x239xf32>, vector<32x17xf32> -> vector<32x256xf32>
    %222 = vector.broadcast %15 : vector<1x256xf32> to vector<32x256xf32>
    %223 = arith.mulf %221, %222 : vector<32x256xf32>
    %224 = tpu.concatenate %188, %193, %198, %203, %125, %208, %213, %218, %223 in 0 : vector<32x256xf32>, vector<32x256xf32>, vector<32x256xf32>, vector<32x256xf32>, vector<32x256xf32>, vector<32x256xf32>, vector<32x256xf32>, vector<32x256xf32>, vector<32x256xf32> -> vector<288x256xf32>
    %cst_46 = arith.constant dense<0.000000e+00> : vector<32x256xf32>
    %225 = tpu.matmul %181, %224, %cst_46 {dimension_numbers = #tpu.dot_dimension_numbers<[1], [0], [0], [1], [0, 0, 1, 1], [], []>} : vector<32x288xf32>, vector<288x256xf32>, vector<32x256xf32> -> vector<32x256xf32>
    %226 = vector.broadcast %183 : vector<32x1xf32> to vector<32x256xf32>
    %227 = arith.addf %225, %226 : vector<32x256xf32>
    %228 = arith.negf %227 : vector<32x256xf32>
    %229 = math.exp %228 : vector<32x256xf32>
    %cst_47 = arith.constant 1.000000e+00 : f32
    %230 = vector.broadcast %cst_47 : f32 to vector<32x256xf32>
    %231 = arith.addf %230, %229 : vector<32x256xf32>
    %232 = arith.divf %230, %231 : vector<32x256xf32>
    %233 = arith.mulf %227, %232 : vector<32x256xf32>
    %c1_48 = arith.constant 1 : index
    %c0_49 = arith.constant 0 : index
    %c0_50 = arith.constant 0 : index
    %234 = vector.load %arg7[%c1_48, %c0_49, %c0_50] : memref<2x32x288xf32, #tpu.memory_space<vmem>>, vector<1x32x288xf32>
    %235 = vector.shape_cast %234 : vector<1x32x288xf32> to vector<32x288xf32>
    %c1_51 = arith.constant 1 : index
    %c0_52 = arith.constant 0 : index
    %c0_53 = arith.constant 0 : index
    %236 = vector.load %arg8[%c1_51, %c0_52, %c0_53] : memref<2x32x1xf32, #tpu.memory_space<vmem>>, vector<1x32x1xf32>
    %237 = vector.shape_cast %236 : vector<1x32x1xf32> to vector<32x1xf32>
    %238 = vector.extract_strided_slice %179 {offsets = [0, 239], sizes = [32, 17], strides = [1, 1]} : vector<32x256xf32> to vector<32x17xf32>
    %239 = vector.extract_strided_slice %179 {offsets = [0, 0], sizes = [32, 239], strides = [1, 1]} : vector<32x256xf32> to vector<32x239xf32>
    %240 = tpu.concatenate %238, %239 in 1 : vector<32x17xf32>, vector<32x239xf32> -> vector<32x256xf32>
    %241 = vector.broadcast %1 : vector<1x256xf32> to vector<32x256xf32>
    %242 = arith.mulf %240, %241 : vector<32x256xf32>
    %243 = vector.extract_strided_slice %179 {offsets = [0, 240], sizes = [32, 16], strides = [1, 1]} : vector<32x256xf32> to vector<32x16xf32>
    %244 = vector.extract_strided_slice %179 {offsets = [0, 0], sizes = [32, 240], strides = [1, 1]} : vector<32x256xf32> to vector<32x240xf32>
    %245 = tpu.concatenate %243, %244 in 1 : vector<32x16xf32>, vector<32x240xf32> -> vector<32x256xf32>
    %246 = vector.broadcast %3 : vector<1x256xf32> to vector<32x256xf32>
    %247 = arith.mulf %245, %246 : vector<32x256xf32>
    %248 = vector.extract_strided_slice %179 {offsets = [0, 241], sizes = [32, 15], strides = [1, 1]} : vector<32x256xf32> to vector<32x15xf32>
    %249 = vector.extract_strided_slice %179 {offsets = [0, 0], sizes = [32, 241], strides = [1, 1]} : vector<32x256xf32> to vector<32x241xf32>
    %250 = tpu.concatenate %248, %249 in 1 : vector<32x15xf32>, vector<32x241xf32> -> vector<32x256xf32>
    %251 = vector.broadcast %5 : vector<1x256xf32> to vector<32x256xf32>
    %252 = arith.mulf %250, %251 : vector<32x256xf32>
    %253 = vector.extract_strided_slice %179 {offsets = [0, 255], sizes = [32, 1], strides = [1, 1]} : vector<32x256xf32> to vector<32x1xf32>
    %254 = vector.extract_strided_slice %179 {offsets = [0, 0], sizes = [32, 255], strides = [1, 1]} : vector<32x256xf32> to vector<32x255xf32>
    %255 = tpu.concatenate %253, %254 in 1 : vector<32x1xf32>, vector<32x255xf32> -> vector<32x256xf32>
    %256 = vector.broadcast %7 : vector<1x256xf32> to vector<32x256xf32>
    %257 = arith.mulf %255, %256 : vector<32x256xf32>
    %258 = vector.extract_strided_slice %179 {offsets = [0, 1], sizes = [32, 255], strides = [1, 1]} : vector<32x256xf32> to vector<32x255xf32>
    %259 = vector.extract_strided_slice %179 {offsets = [0, 0], sizes = [32, 1], strides = [1, 1]} : vector<32x256xf32> to vector<32x1xf32>
    %260 = tpu.concatenate %258, %259 in 1 : vector<32x255xf32>, vector<32x1xf32> -> vector<32x256xf32>
    %261 = vector.broadcast %9 : vector<1x256xf32> to vector<32x256xf32>
    %262 = arith.mulf %260, %261 : vector<32x256xf32>
    %263 = vector.extract_strided_slice %179 {offsets = [0, 15], sizes = [32, 241], strides = [1, 1]} : vector<32x256xf32> to vector<32x241xf32>
    %264 = vector.extract_strided_slice %179 {offsets = [0, 0], sizes = [32, 15], strides = [1, 1]} : vector<32x256xf32> to vector<32x15xf32>
    %265 = tpu.concatenate %263, %264 in 1 : vector<32x241xf32>, vector<32x15xf32> -> vector<32x256xf32>
    %266 = vector.broadcast %11 : vector<1x256xf32> to vector<32x256xf32>
    %267 = arith.mulf %265, %266 : vector<32x256xf32>
    %268 = vector.extract_strided_slice %179 {offsets = [0, 16], sizes = [32, 240], strides = [1, 1]} : vector<32x256xf32> to vector<32x240xf32>
    %269 = vector.extract_strided_slice %179 {offsets = [0, 0], sizes = [32, 16], strides = [1, 1]} : vector<32x256xf32> to vector<32x16xf32>
    %270 = tpu.concatenate %268, %269 in 1 : vector<32x240xf32>, vector<32x16xf32> -> vector<32x256xf32>
    %271 = vector.broadcast %13 : vector<1x256xf32> to vector<32x256xf32>
    %272 = arith.mulf %270, %271 : vector<32x256xf32>
    %273 = vector.extract_strided_slice %179 {offsets = [0, 17], sizes = [32, 239], strides = [1, 1]} : vector<32x256xf32> to vector<32x239xf32>
    %274 = vector.extract_strided_slice %179 {offsets = [0, 0], sizes = [32, 17], strides = [1, 1]} : vector<32x256xf32> to vector<32x17xf32>
    %275 = tpu.concatenate %273, %274 in 1 : vector<32x239xf32>, vector<32x17xf32> -> vector<32x256xf32>
    %276 = vector.broadcast %15 : vector<1x256xf32> to vector<32x256xf32>
    %277 = arith.mulf %275, %276 : vector<32x256xf32>
    %278 = tpu.concatenate %242, %247, %252, %257, %179, %262, %267, %272, %277 in 0 : vector<32x256xf32>, vector<32x256xf32>, vector<32x256xf32>, vector<32x256xf32>, vector<32x256xf32>, vector<32x256xf32>, vector<32x256xf32>, vector<32x256xf32>, vector<32x256xf32> -> vector<288x256xf32>
    %cst_54 = arith.constant dense<0.000000e+00> : vector<32x256xf32>
    %279 = tpu.matmul %235, %278, %cst_54 {dimension_numbers = #tpu.dot_dimension_numbers<[1], [0], [0], [1], [0, 0, 1, 1], [], []>} : vector<32x288xf32>, vector<288x256xf32>, vector<32x256xf32> -> vector<32x256xf32>
    %280 = vector.broadcast %237 : vector<32x1xf32> to vector<32x256xf32>
    %281 = arith.addf %279, %280 : vector<32x256xf32>
    %282 = arith.negf %281 : vector<32x256xf32>
    %283 = math.exp %282 : vector<32x256xf32>
    %cst_55 = arith.constant 1.000000e+00 : f32
    %284 = vector.broadcast %cst_55 : f32 to vector<32x256xf32>
    %285 = arith.addf %284, %283 : vector<32x256xf32>
    %286 = arith.divf %284, %285 : vector<32x256xf32>
    %287 = arith.mulf %281, %286 : vector<32x256xf32>
    %288 = tpu.concatenate %233, %287 in 0 : vector<32x256xf32>, vector<32x256xf32> -> vector<64x256xf32>
    %c0_56 = arith.constant 0 : index
    %c0_57 = arith.constant 0 : index
    %289 = vector.load %arg9[%c0_56, %c0_57] : memref<6x64xf32, #tpu.memory_space<vmem>>, vector<6x64xf32>
    %cst_58 = arith.constant dense<0.000000e+00> : vector<6x256xf32>
    %290 = tpu.matmul %289, %288, %cst_58 {dimension_numbers = #tpu.dot_dimension_numbers<[1], [0], [0], [1], [0, 0, 1, 1], [], []>} : vector<6x64xf32>, vector<64x256xf32>, vector<6x256xf32> -> vector<6x256xf32>
    %c0_59 = arith.constant 0 : index
    %c0_60 = arith.constant 0 : index
    %291 = vector.load %arg10[%c0_59, %c0_60] : memref<6x1xf32, #tpu.memory_space<vmem>>, vector<6x1xf32>
    %292 = vector.broadcast %291 : vector<6x1xf32> to vector<6x256xf32>
    %293 = arith.addf %290, %292 : vector<6x256xf32>
    %c0_61 = arith.constant 0 : index
    %c0_62 = arith.constant 0 : index
    %c0_63 = arith.constant 0 : index
    %294 = vector.load %arg11[%c0_61, %c0_62, %c0_63] : memref<1x6x256xf32, #tpu.memory_space<vmem>>, vector<1x6x256xf32>
    %295 = vector.shape_cast %294 : vector<1x6x256xf32> to vector<6x256xf32>
    %296 = vector.shape_cast %293 : vector<6x256xf32> to vector<1x6x256xf32>
    tpu.vector_store %arg11[%c0_61, %c0_62, %c0_63], %296 {strides = array<i32>} : memref<1x6x256xf32, #tpu.memory_space<vmem>>, vector<1x6x256xf32>,
    return
  }
  func.func @transform_0(%arg0: i32) -> (i32, i32, i32) {
    %c0_i32 = arith.constant 0 : i32
    %c0_i32_0 = arith.constant 0 : i32
    %c0_i32_1 = arith.constant 0 : i32
    return %arg0, %c0_i32, %c0_i32_0 : i32, i32, i32
  }
  func.func @transform_1(%arg0: i32) -> (i32, i32, i32) {
    %c0_i32 = arith.constant 0 : i32
    %c0_i32_0 = arith.constant 0 : i32
    %c0_i32_1 = arith.constant 0 : i32
    %c0_i32_2 = arith.constant 0 : i32
    return %c0_i32, %c0_i32_0, %c0_i32_1 : i32, i32, i32
  }
  func.func @transform_2(%arg0: i32) -> (i32, i32) {
    %c0_i32 = arith.constant 0 : i32
    %c0_i32_0 = arith.constant 0 : i32
    %c0_i32_1 = arith.constant 0 : i32
    return %c0_i32, %c0_i32_0 : i32, i32
  }
  func.func @transform_3(%arg0: i32) -> (i32, i32) {
    %c0_i32 = arith.constant 0 : i32
    %c0_i32_0 = arith.constant 0 : i32
    %c0_i32_1 = arith.constant 0 : i32
    return %c0_i32, %c0_i32_0 : i32, i32
  }
  func.func @transform_4(%arg0: i32) -> (i32, i32, i32) {
    %c0_i32 = arith.constant 0 : i32
    %c0_i32_0 = arith.constant 0 : i32
    %c0_i32_1 = arith.constant 0 : i32
    %c0_i32_2 = arith.constant 0 : i32
    return %c0_i32, %c0_i32_0, %c0_i32_1 : i32, i32, i32
  }
  func.func @transform_5(%arg0: i32) -> (i32, i32, i32) {
    %c0_i32 = arith.constant 0 : i32
    %c0_i32_0 = arith.constant 0 : i32
    %c0_i32_1 = arith.constant 0 : i32
    %c0_i32_2 = arith.constant 0 : i32
    return %c0_i32, %c0_i32_0, %c0_i32_1 : i32, i32, i32
  }
  func.func @transform_6(%arg0: i32) -> (i32, i32, i32) {
    %c0_i32 = arith.constant 0 : i32
    %c0_i32_0 = arith.constant 0 : i32
    %c0_i32_1 = arith.constant 0 : i32
    %c0_i32_2 = arith.constant 0 : i32
    return %c0_i32, %c0_i32_0, %c0_i32_1 : i32, i32, i32
  }
  func.func @transform_7(%arg0: i32) -> (i32, i32, i32) {
    %c0_i32 = arith.constant 0 : i32
    %c0_i32_0 = arith.constant 0 : i32
    %c0_i32_1 = arith.constant 0 : i32
    %c0_i32_2 = arith.constant 0 : i32
    return %c0_i32, %c0_i32_0, %c0_i32_1 : i32, i32, i32
  }
  func.func @transform_8(%arg0: i32) -> (i32, i32) {
    %c0_i32 = arith.constant 0 : i32
    %c0_i32_0 = arith.constant 0 : i32
    %c0_i32_1 = arith.constant 0 : i32
    return %c0_i32, %c0_i32_0 : i32, i32
  }
  func.func @transform_9(%arg0: i32) -> (i32, i32) {
    %c0_i32 = arith.constant 0 : i32
    %c0_i32_0 = arith.constant 0 : i32
    %c0_i32_1 = arith.constant 0 : i32
    return %c0_i32, %c0_i32_0 : i32, i32
  }
  func.func @transform_10(%arg0: i32) -> (i32, i32, i32) {
    %c0_i32 = arith.constant 0 : i32
    %c0_i32_0 = arith.constant 0 : i32
    %c0_i32_1 = arith.constant 0 : i32
    return %arg0, %c0_i32, %c0_i32_0 : i32, i32, i32
  }
}

</mosaic_0001>

<bundles_post_ra>
// kernel: fcos_head_forward.1
= control target key start
LH: loop header
LB: loop body
LE: loop exit
PB: predicated region body
PF: predicated region fallthrough
CT: control target
= control target key end

     0   :  { %s4375_s13 = smov 0   ;;  %s6752_s0 = inlined_call_operand.vmem [shape: f32[2,8,256], index: 0, kind: input, shape index: {}]   ;;  %s6753_s1 = inlined_call_operand.vmem [shape: f32[9,1,256], index: 1, kind: input, shape index: {}]   ;;  %s6754_s2 = inlined_call_operand.vmem [shape: f32[64,72], index: 2, kind: input, shape index: {}]   ;;  %s6755_s3 = inlined_call_operand.vmem [shape: f32[64,1], index: 3, kind: input, shape index: {}]   ;;  %s6756_s4 = inlined_call_operand.vmem [shape: f32[2,32,288], index: 4, kind: input, shape index: {}]   ;;  %s6757_s5 = inlined_call_operand.vmem [shape: f32[2,32,1], index: 5, kind: input, shape index: {}]   ;;  %s6758_s6 = inlined_call_operand.vmem [shape: f32[2,32,288], index: 6, kind: input, shape index: {}]   ;;  %s6759_s7 = inlined_call_operand.vmem [shape: f32[2,32,1], index: 7, kind: input, shape index: {}]   ;;  %s6760_s8 = inlined_call_operand.vmem [shape: f32[6,64], index: 8, kind: input, shape index: {}]   ;;  %s6761_s9 = inlined_call_operand.vmem [shape: f32[6,1], index: 9, kind: input, shape index: {}]   ;;  %s6762_s10 = inlined_call_operand.vmem [shape: f32[2,6,256], index: 10, kind: output, shape index: {}]  }
   0x1 LB: > { %s3581_s14 = sadd.s32 4294967295, %s4308_s13   ;;  %p3585_p0 = scmp.ge.s32.totalorder %s4308_s13, 1  ;;  %s4308_s13 = sphi %s4375_s13, %s20_s13  }
   0x2   : > { %p312_p1 = scmp.lt.s32.totalorder %s4308_s13, 3 }
   0x4   : > { %p313_p2 = pnand %p3585_p0, %p312_p1 }
   0x6   : > { %316 = sbr.rel (%p313_p2) target bundleno = 1867 (0x74b), region = 60 }
   0xd   : > { %p350_p3 = scmp.lt.s32.totalorder %s3581_s14, 1  ;;  %s4310_s19 = smov 16   ;;  %v6764_v2 = vmov 0.0   ;;  %v385_v3 = vld [vmem:[%s6755_s3] sm:$0xff]  ;;  %v4319_v4 = vmov 0   ;;  %v386_v5 = vld [vmem:[%s6755_s3 + $0x8] sm:$0xff]  ;;  %v406_v12 = vlaneseq }
   0xe   : > { %s4311_s20 = smov 17   ;;  %s4312_s21 = smov 15   ;;  %708 = vmatprep.mubr.f32.mxu0 %v6764_v2  ;;  %4108 = vset.pattern.permute.xlu0 %v4319_v4  ;;  %v388_v6 = vld [vmem:[%s6755_s3 + $0x18] sm:$0xff]  ;;  %v387_v7 = vld [vmem:[%s6755_s3 + $0x10] sm:$0xff]  ;;  %v390_v8 = vld [vmem:[%s6755_s3 + $0x28] sm:$0xff]  ;;  %vm423_vm0 = vcmask 130048  }
   0xf   : > { %s6920_s14 = smov (!%p350_p3, %s3581_s14), 1  ;;  %s4313_s22 = smov 1   ;;  %4109 = vset.pattern.permute.xlu1 %v4319_v4  ;;  %v389_v9 = vld [vmem:[%s6755_s3 + $0x20] sm:$0xff]  ;;  %v392_v10 = vld [vmem:[%s6755_s3 + $0x38] sm:$0xff]  ;;  %v391_v11 = vld [vmem:[%s6755_s3 + $0x30] sm:$0xff]  ;;  %v407_v13 = vshrl.u32 %v406_v12, 7 }
  0x10   : > { %s6763_s15 = sshll.u32 %s6920_s14, 4  ;;  %s4314_s23 = smov 127   ;;  %v360_v16 = vld [vmem:[%s6753_s1] sm:$0x3]  ;;  %v3590_v17 = vld [vmem:[%s6753_s1 + $0x2] sm:$0x3] }
  0x11   : > { %s354_s18 = scalar_lea.vmem %s6752_s0, %s6763_s15  ;;  %s4315_s24 = smov 113   ;;  %v4452_v14 = vsub.s32 0, %v407_v13  ;;  %v4454_v15 = vsub.s32 1, %v407_v13  ;;  %vm400_vm1 = vcmask 138240   ;;  %v3591_v34 = vld [vmem:[%s6753_s1 + $0x4] sm:$0x3] }
  0x12   : > { %v4391_v0 = vld [vmem:[%s354_s18 + $0x8] sm:$0xff]  ;;  %v4397_v1 = vld [vmem:[%s354_s18] sm:$0xff]  ;;  %s4317_s25 = smov 112   ;;  %s4318_s26 = smov 111   ;;  %vm446_vm2 = vcmask 121856   ;;  %vm469_vm3 = vcmask 7168  }
  0x13   : > { %418 = vrot.lane.b32.xlu1 %v4391_v0, %s4310_s19  ;;  %394 = vrot.lane.b32.xlu0 %v4391_v0, %s4311_s20  ;;  %v4463_v20 = vrot.slane %v360_v16, %v4454_v15  ;;  %v4466_v21 = vrot.slane %v3590_v17, %v4454_v15  ;;  %v4469_v22 = vrot.slane %v360_v16, %v4452_v14  ;;  %v3592_v35 = vld [vmem:[%s6753_s1 + $0x6] sm:$0x3]  ;;  %v3593_v44 = vld [vmem:[%s6753_s1 + $0xa] sm:$0x3]  ;;  %vm491_vm4 = vcmask 1039360   ;;  %s6918_s17 = sshll.u32 %s6920_s14, 4 }
  0x14   : > { %v4472_v23 = vrot.slane %v3590_v17, %v4452_v14  ;;  %v4489_v40 = vrot.slane %v3591_v34, %v4452_v14  ;;  %v4492_v41 = vrot.slane %v3591_v34, %v4454_v15  ;;  %v4495_v42 = vrot.slane %v3592_v35, %v4452_v14  ;;  %v3594_v4 = vld [vmem:[%s6753_s1 + $0xc] sm:$0x3]  ;;  %s359_s28 = scalar_lea.vmem %s6762_s10, %s6918_s17 }
  0x15   : > { %6825 = vst [vmem:[#allocation2_spill] sm:$0xff] %v4463_v20  ;;  %6826 = vst [vmem:[#allocation3_spill] sm:$0xff] %v4469_v22  ;;  %v4498_v43 = vrot.slane %v3592_v35, %v4454_v15  ;;  %v4508_v51 = vrot.slane %v3593_v44, %v4452_v14  ;;  %v4511_v52 = vrot.slane %v3593_v44, %v4454_v15  ;;  %vm514_vm5 = vcmask 924672   ;;  %v380_v44 = vld [vmem:[%s6754_s2 + $0x18] sm:$0xff] }
  0x16   : > { %vm537_vm6 = vcmask 916480   ;;  %vm560_vm7 = vcmask 908288   ;;  %vm619_vm8 = vcmask 588800   ;;  %vm1265_vm9 = vcmask 261120  }
  0x17   : > { %421 = vrot.lane.b32.xlu1 %v4397_v1, %s4310_s19  ;;  %398 = vrot.lane.b32.xlu0 %v4397_v1, %s4311_s20  ;;  %vm3449_vm10 = vcmask 523264  }
  0x1b   : > { %444 = vrot.lane.b32.xlu1 %v4397_v1, %s4312_s21  ;;  %441 = vrot.lane.b32.xlu0 %v4391_v0, %s4312_s21 }
  0x1f   : > { %467 = vrot.lane.b32.xlu1 %v4397_v1, %s4313_s22  ;;  %464 = vrot.lane.b32.xlu0 %v4391_v0, %s4313_s22 }
  0x23   : > { %489 = vrot.lane.b32.xlu1 %v4391_v0, %s4314_s23  ;;  %487 = vrot.lane.b32.xlu0 %v4397_v1, %s4314_s23 }
  0x27   : > { %512 = vrot.lane.b32.xlu1 %v4391_v0, %s4315_s24  ;;  %510 = vrot.lane.b32.xlu0 %v4397_v1, %s4315_s24 }
  0x2b   : > { %535 = vrot.lane.b32.xlu1 %v4391_v0, %s4317_s25  ;;  %533 = vrot.lane.b32.xlu0 %v4397_v1, %s4317_s25 }
  0x2f   : > { %558 = vrot.lane.b32.xlu1 %v4391_v0, %s4318_s26  ;;  %556 = vrot.lane.b32.xlu0 %v4397_v1, %s4318_s26 }
  0x33   : > { %581 = vperm.xlu0 %4108, %v385_v3   ;;  %586 = vperm.xlu1 %4109, %v386_v5   ;;  %v3595_v5 = vld [vmem:[%s6753_s1 + $0xe] sm:$0x3] }
  0x34   : > { %v4536_v12 = vrot.slane %v3595_v5, %v4452_v14  ;;  %v4539_v13 = vrot.slane %v3595_v5, %v4454_v15 }
  0x36   : > { %6829 = vst [vmem:[#allocation6_spill] sm:$0xff] %v4536_v12  ;;  %6830 = vst [vmem:[#allocation7_spill] sm:$0xff] %v4539_v13 }
  0x37   : > { %596 = vperm.xlu0 %4108, %v388_v6   ;;  %591 = vperm.xlu1 %4109, %v387_v7  }
  0x3b   : > { %606 = vperm.xlu0 %4108, %v390_v8   ;;  %601 = vperm.xlu1 %4109, %v389_v9  }
  0x3f   : > { %616 = vperm.xlu0 %4108, %v392_v10   ;;  %611 = vperm.xlu1 %4109, %v391_v11   ;;  %v4530_v10 = vrot.slane %v3594_v4, %v4452_v14  ;;  %v4533_v11 = vrot.slane %v3594_v4, %v4454_v15 }
  0x41   : > { %6827 = vst [vmem:[#allocation4_spill] sm:$0xff] %v4530_v10  ;;  %6828 = vst [vmem:[#allocation5_spill] sm:$0xff] %v4533_v11 }
  0x85   : > { %v419_v18 = vpop.permute.xlu1 %418  ;;  %v395_v19 = vpop.permute.xlu0 %394 }
  0x89   : > { %v422_v24 = vpop.permute.xlu1 %421  ;;  %v399_v25 = vpop.permute.xlu0 %398 }
  0x8a   : > { %v427_v26 = vsel %vm423_vm0, %v419_v18, %v422_v24  ;;  %v404_v27 = vsel %vm400_vm1, %v395_v19, %v399_v25  ;;  %v401_v28 = vsel %vm400_vm1, %v399_v25, %v395_v19  ;;  %v424_v29 = vsel %vm423_vm0, %v422_v24, %v419_v18 }
  0x8b   : > { %v417_v30 = vmul.f32 %v4463_v20, %v401_v28  ;;  %v440_v31 = vmul.f32 %v4466_v21, %v424_v29  ;;  %v416_v32 = vmul.f32 %v4469_v22, %v404_v27  ;;  %v439_v33 = vmul.f32 %v4472_v23, %v427_v26 }
  0x8d   : > { %v445_v36 = vpop.permute.xlu1 %444  ;;  %v442_v37 = vpop.permute.xlu0 %441  ;;  %v3706_v38 = vpack.c.bf16 %v440_v31, %v417_v30  ;;  %v3708_v39 = vpack.c.bf16 %v439_v33, %v416_v32 }
  0x8e   : > { %v447_v45 = vsel %vm446_vm2, %v445_v36, %v442_v37  ;;  %v450_v46 = vsel %vm446_vm2, %v442_v37, %v445_v36 }
  0x8f   : > { %3707 = vmatprep.subr.bf16.mxu0 %v3706_v38  ;;  %v462_v53 = vmul.f32 %v4489_v40, %v450_v46  ;;  %v463_v54 = vmul.f32 %v4492_v41, %v447_v45  ;;  %v378_v38 = vld [vmem:[%s6754_s2 + $0x8] sm:$0xff]  ;;  %v381_v45 = vld [vmem:[%s6754_s2 + $0x20] sm:$0xff] }
  0x90   : > { %3709 = vmatpush1.bf16.msra.mxu0 %v3708_v39  ;;  %v379_v39 = vld [vmem:[%s6754_s2 + $0x10] sm:$0xff]  ;;  %v382_v46 = vld [vmem:[%s6754_s2 + $0x28] sm:$0xff] }
  0x91   : > { %v468_v47 = vpop.permute.xlu1 %467  ;;  %v465_v48 = vpop.permute.xlu0 %464 }
  0x92   : > { %v470_v49 = vsel %vm469_vm3, %v468_v47, %v465_v48  ;;  %v473_v50 = vsel %vm469_vm3, %v465_v48, %v468_v47  ;;  %v383_v47 = vld [vmem:[%s6754_s2 + $0x30] sm:$0xff]  ;;  %v384_v48 = vld [vmem:[%s6754_s2 + $0x38] sm:$0xff] }
  0x93   : > { %v485_v55 = vmul.f32 %v4495_v42, %v473_v50  ;;  %v486_v56 = vmul.f32 %v4498_v43, %v470_v49 }
  0x95   : > { %v490_v57 = vpop.permute.xlu1 %489  ;;  %v488_v58 = vpop.permute.xlu0 %487  ;;  %v3710_v59 = vpack.c.bf16 %v486_v56, %v463_v54  ;;  %v3712_v60 = vpack.c.bf16 %v485_v55, %v462_v53 }
  0x96   : > { %v492_v61 = vsel %vm491_vm4, %v488_v58, %v490_v57  ;;  %v496_v62 = vsel %vm491_vm4, %v490_v57, %v488_v58 }
  0x97   : > { %v508_v63 = vmul.f32 %v4508_v51, %v492_v61  ;;  %v509_v3 = vmul.f32 %v4511_v52, %v496_v62  ;;  %3711 = vmatprep.subr.bf16.mxu0 %v3710_v59 }
  0x98   : > { %3713 = vmatpush1.bf16.msra.mxu0 %v3712_v60 }
  0x99   : > { %v513_v6 = vpop.permute.xlu1 %512  ;;  %v511_v7 = vpop.permute.xlu0 %510  ;;  %v3714_v8 = vpack.c.bf16 %v509_v3, %v4391_v0  ;;  %v3716_v9 = vpack.c.bf16 %v508_v63, %v4397_v1  ;;  %v3596_v0 = vld [vmem:[%s6753_s1 + $0x10] sm:$0x3] }
  0x9a   : > { %v515_v1 = vsel %vm514_vm5, %v511_v7, %v513_v6  ;;  %v519_v16 = vsel %vm514_vm5, %v513_v6, %v511_v7  ;;  %v4549_v25 = vrot.slane %v3596_v0, %v4454_v15  ;;  %v4556_v30 = vrot.slane %v3596_v0, %v4452_v14  ;;  %v377_v14 = vld [vmem:[%s6754_s2] sm:$0xff] }
  0x9b   : > { %3715 = vmatprep.subr.bf16.mxu0 %v3714_v8  ;;  %v531_v26 = vmul.f32 %v4530_v10, %v515_v1  ;;  %v532_v27 = vmul.f32 %v4533_v11, %v519_v16 }
  0x9c   : > { %3717 = vmatpush1.bf16.msra.mxu0 %v3716_v9  ;;  %6831 = vst [vmem:[#allocation8_spill] sm:$0xff] %v4549_v25  ;;  %6832 = vst [vmem:[#allocation9_spill] sm:$0xff] %v4556_v30 }
  0x9d   : > { %v536_v17 = vpop.permute.xlu1 %535  ;;  %v534_v18 = vpop.permute.xlu0 %533 }
  0x9e   : > { %v538_v19 = vsel %vm537_vm6, %v534_v18, %v536_v17  ;;  %v542_v24 = vsel %vm537_vm6, %v536_v17, %v534_v18 }
  0x9f   : > { %v554_v28 = vmul.f32 %v4536_v12, %v538_v19  ;;  %v555_v29 = vmul.f32 %v4539_v13, %v542_v24 }
  0xa1   : > { %v559_v31 = vpop.permute.xlu1 %558  ;;  %v3718_v32 = vpack.c.bf16 %v555_v29, %v532_v27  ;;  %v557_v33 = vpop.permute.xlu0 %556  ;;  %v3720_v34 = vpack.c.bf16 %v554_v28, %v531_v26 }
  0xa2   : > { %v561_v35 = vsel %vm560_vm7, %v557_v33, %v559_v31  ;;  %v565_v15 = vsel %vm560_vm7, %v559_v31, %v557_v33 }
  0xa3   : > { %3719 = vmatprep.subr.bf16.mxu0 %v3718_v32  ;;  %v578_v36 = vmul.f32 %v4549_v25, %v565_v15  ;;  %v577_v37 = vmul.f32 %v4556_v30, %v561_v35 }
  0xa4   : > { %3721 = vmatpush1.bf16.msra.mxu0 %v3720_v34 }
  0xa5   : > { %660 = vmatprep.subr.mxu0 %v578_v36 }
  0xa8   : > { %661 = vmatpush1.msra.mxu0 %v577_v37 }
  0xa9   : > { %3597 = vmatmul.mubr.msk.f32.vlgmr.msra.gmra.mrb[0].mxu0 %vm619_vm8, %v377_v14 }
  0xaa   : > { %714 = vmatprep.mubr.f32.mxu0 %v6764_v2 }
  0xad   : > { %3598 = vmatmul.mubr.msk.f32.gmra.mrb[2].mxu0 %vm619_vm8, %v378_v38 }
  0xae   : > { %720 = vmatprep.mubr.f32.mxu0 %v6764_v2 }
  0xb1   : > { %3599 = vmatmul.mubr.msk.f32.gmra.mrb[4].mxu0 %vm619_vm8, %v379_v39 }
  0xb2   : > { %726 = vmatprep.mubr.f32.mxu0 %v6764_v2  ;;  %v582_v49 = vpop.permute.xlu0 %581  ;;  %v587_v56 = vpop.permute.xlu1 %586 }
  0xb5   : > { %3600 = vmatmul.mubr.msk.f32.gmra.mrb[6].mxu0 %vm619_vm8, %v380_v44 }
  0xb6   : > { %732 = vmatprep.mubr.f32.mxu0 %v6764_v2  ;;  %v592_v38 = vpop.permute.xlu1 %591 }
  0xb9   : > { %3601 = vmatmul.mubr.msk.f32.gmra.mrb[8].mxu0 %vm619_vm8, %v381_v45 }
  0xba   : > { %738 = vmatprep.mubr.f32.mxu0 %v6764_v2 }
  0xbd   : > { %3602 = vmatmul.mubr.msk.f32.gmra.mrb[10].mxu0 %vm619_vm8, %v382_v46 }
  0xbe   : > { %744 = vmatprep.mubr.f32.mxu0 %v6764_v2 }
  0xc1   : > { %3603 = vmatmul.mubr.msk.f32.gmra.mrb[12].mxu0 %vm619_vm8, %v383_v47 }
  0xc2   : > { %750 = vmatprep.mubr.f32.mxu0 %v6764_v2 }
  0xc5   : > { %3604 = vmatmul.mubr.msk.f32.gmra.mrb[14].mxu0 %vm619_vm8, %v384_v48 }
 0x17c   : > { %v710_v50 = vpop.f32.mrb[0].mxu0 }
 0x17d   : > { %v711_v53 = vadd.f32 %v710_v50, %v582_v49  ;;  %v712_v54 = vpop.f32.mrb[1].mxu0 }
 0x17e   : > { %v713_v55 = vadd.f32 %v712_v54, %v582_v49  ;;  %v597_v49 = vpop.permute.xlu0 %596 }
 0x17f   : > { %v3605_v57 = vmul.f32 -1.442695, %v711_v53 }
 0x180   : > { %v3606_v58 = vmul.f32 -1.442695, %v713_v55  ;;  %v716_v59 = vpop.f32.mrb[2].mxu0 }
 0x181   : > { %4110 = vpow2.f32 %v3605_v57  ;;  %v717_v60 = vadd.f32 %v716_v59, %v587_v56  ;;  %v718_v61 = vpop.f32.mrb[3].mxu0 }
 0x182   : > { %4112 = vpow2.f32 %v3606_v58  ;;  %v719_v16 = vadd.f32 %v718_v61, %v587_v56 }
 0x183   : > { %v3607_v62 = vmul.f32 -1.442695, %v717_v60 }
 0x184   : > { %v722_v63 = vpop.f32.mrb[4].mxu0  ;;  %v3608_v24 = vmul.f32 -1.442695, %v719_v16 }
 0x185   : > { %v724_v3 = vpop.f32.mrb[5].mxu0  ;;  %4114 = vpow2.f32 %v3607_v62  ;;  %v723_v39 = vadd.f32 %v722_v63, %v592_v38 }
 0x186   : > { %v725_v44 = vadd.f32 %v724_v3, %v592_v38 }
 0x187   : > { %v3609_v45 = vmul.f32 -1.442695, %v723_v39 }
 0x188   : > { %v728_v4 = vpop.f32.mrb[6].mxu0  ;;  %v3610_v46 = vmul.f32 -1.442695, %v725_v44 }
 0x189   : > { %v4601_v5 = vpop.f32.mrb[7].mxu0  ;;  %v729_v50 = vadd.f32 %v728_v4, %v597_v49 }
 0x18a   : > { %v731_v58 = vadd.f32 %v4601_v5, %v597_v49 }
 0x18b   : > { %v4111_v6 = vpop.eup %4110 }
 0x18c   : > { %v4113_v7 = vpop.eup %4112  ;;  %v805_v8 = vadd.f32 1.0, %v4111_v6  ;;  %v4603_v9 = vpop.f32.mrb[8].mxu0 }
 0x18d   : > { %v806_v0 = vadd.f32 1.0, %v4113_v7  ;;  %v4605_v1 = vpop.f32.mrb[9].mxu0 }
 0x18e   : > { %4116 = vrcp.f32 %v805_v8 }
 0x18f   : > { %4118 = vrcp.f32 %v806_v0  ;;  %v4115_v19 = vpop.eup %4114  ;;  %v602_v0 = vpop.permute.xlu1 %601 }
 0x190   : > { %v4607_v17 = vpop.f32.mrb[10].mxu0  ;;  %v807_v27 = vadd.f32 1.0, %v4115_v19  ;;  %4120 = vpow2.f32 %v3608_v24  ;;  %v737_v19 = vadd.f32 %v4605_v1, %v602_v0 }
 0x191   : > { %v4609_v18 = vpop.f32.mrb[11].mxu0 }
 0x192   : > { %4122 = vrcp.f32 %v807_v27  ;;  %v3614_v27 = vmul.f32 -1.442695, %v737_v19 }
 0x193   : > { %v612_v49 = vpop.permute.xlu1 %611 }
 0x194   : > { %v4611_v26 = vpop.f32.mrb[12].mxu0 }
 0x195   : > { %v4613_v28 = vpop.f32.mrb[13].mxu0 }
 0x198   : > { %v4117_v29 = vpop.eup %4116  ;;  %v4615_v31 = vpop.f32.mrb[14].mxu0 }
 0x199   : > { %v4119_v32 = vpop.eup %4118  ;;  %v4617_v33 = vmul.f32 %v4117_v29, %v711_v53  ;;  %v4619_v34 = vpop.f32.mrb[15].mxu0  ;;  %v3611_v53 = vmul.f32 -1.442695, %v729_v50 }
 0x19a   : > { %v4621_v35 = vmul.f32 %v4119_v32, %v713_v55  ;;  %v4121_v15 = vpop.eup %4120  ;;  %v607_v32 = vpop.permute.xlu0 %606 }
 0x19b   : > { %905 = vrot.lane.b32.xlu1 %v4617_v33, %s4311_s20  ;;  %v808_v37 = vadd.f32 1.0, %v4121_v15 }
 0x19c   : > { %1071 = vrot.lane.b32.xlu0 %v4621_v35, %s4314_s23  ;;  %v4123_v36 = vpop.eup %4122 }
 0x19d   : > { %v4635_v14 = vmul.f32 %v4123_v36, %v717_v60  ;;  %4124 = vrcp.f32 %v808_v37  ;;  %v3612_v60 = vmul.f32 -1.442695, %v731_v58 }
 0x19e   : > { %4126 = vpow2.f32 %v3609_v45 }
 0x19f   : > { %949 = vrot.lane.b32.xlu1 %v4617_v33, %s4310_s19  ;;  %4128 = vpow2.f32 %v3610_v46 }
 0x1a0   : > { %1115 = vrot.lane.b32.xlu0 %v4621_v35, %s4315_s24  ;;  %4130 = vpow2.f32 %v3611_v53  ;;  %v617_v53 = vpop.permute.xlu0 %616 }
 0x1a3   : > { %993 = vrot.lane.b32.xlu1 %v4617_v33, %s4312_s21 }
 0x1a4   : > { %1159 = vrot.lane.b32.xlu0 %v4621_v35, %s4317_s25 }
 0x1a7   : > { %1037 = vrot.lane.b32.xlu1 %v4617_v33, %s4313_s22  ;;  %v4125_v47 = vpop.eup %4124 }
 0x1a8   : > { %907 = vrot.lane.b32.xlu0 %v4635_v14, %s4311_s20  ;;  %v4653_v48 = vmul.f32 %v4125_v47, %v719_v16  ;;  %v4127_v54 = vpop.eup %4126  ;;  %v735_v16 = vadd.f32 %v4603_v9, %v602_v0  ;;  %v741_v9 = vadd.f32 %v4607_v17, %v607_v32 }
 0x1a9   : > { %v4129_v55 = vpop.eup %4128  ;;  %v809_v56 = vadd.f32 1.0, %v4127_v54 }
 0x1aa   : > { %v810_v57 = vadd.f32 1.0, %v4129_v55  ;;  %v4131_v59 = vpop.eup %4130  ;;  %v3613_v24 = vmul.f32 -1.442695, %v735_v16  ;;  %v3615_v15 = vmul.f32 -1.442695, %v741_v9 }
 0x1ab   : > { %1069 = vrot.lane.b32.xlu1 %v4617_v33, %s4314_s23  ;;  %4132 = vrcp.f32 %v809_v56  ;;  %v811_v61 = vadd.f32 1.0, %v4131_v59 }
 0x1ac   : > { %951 = vrot.lane.b32.xlu0 %v4635_v14, %s4310_s19  ;;  %4134 = vrcp.f32 %v810_v57 }
 0x1ad   : > { %4136 = vpow2.f32 %v3612_v60 }
 0x1ae   : > { %4138 = vrcp.f32 %v811_v61 }
 0x1af   : > { %1113 = vrot.lane.b32.xlu1 %v4617_v33, %s4315_s24 }
 0x1b0   : > { %995 = vrot.lane.b32.xlu0 %v4635_v14, %s4312_s21 }
 0x1b3   : > { %1157 = vrot.lane.b32.xlu1 %v4617_v33, %s4317_s25 }
 0x1b4   : > { %1039 = vrot.lane.b32.xlu0 %v4635_v14, %s4313_s22 }
 0x1b5   : > { %v4133_v62 = vpop.eup %4132 }
 0x1b6   : > { %v4135_v63 = vpop.eup %4134  ;;  %v4684_v3 = vmul.f32 %v4133_v62, %v723_v39  ;;  %v743_v39 = vadd.f32 %v4609_v18, %v607_v32 }
 0x1b7   : > { %889 = vrot.lane.b32.xlu1 %v4621_v35, %s4311_s20  ;;  %v4686_v4 = vmul.f32 %v4135_v63, %v725_v44  ;;  %v4137_v5 = vpop.eup %4136  ;;  %v4773_v63 = vadd.f32 %v4611_v26, %v612_v49 }
 0x1b8   : > { %891 = vrot.lane.b32.xlu0 %v4653_v48, %s4311_s20  ;;  %v4139_v6 = vpop.eup %4138  ;;  %v812_v7 = vadd.f32 1.0, %v4137_v5  ;;  %v3616_v45 = vmul.f32 -1.442695, %v743_v39  ;;  %v4778_v5 = vadd.f32 %v4613_v28, %v612_v49 }
 0x1b9   : > { %v4700_v8 = vmul.f32 %v4139_v6, %v729_v50  ;;  %v3617_v0 = vmul.f32 -1.442695, %v4773_v63 }
 0x1ba   : > { %4140 = vrcp.f32 %v812_v7  ;;  %v3618_v26 = vmul.f32 -1.442695, %v4778_v5 }
 0x1bb   : > { %937 = vrot.lane.b32.xlu1 %v4621_v35, %s4310_s19  ;;  %4142 = vpow2.f32 %v3613_v24 }
 0x1bc   : > { %939 = vrot.lane.b32.xlu0 %v4653_v48, %s4310_s19  ;;  %4144 = vpow2.f32 %v3614_v27 }
 0x1bd   : > { %4146 = vpow2.f32 %v3615_v15 }
 0x1bf   : > { %981 = vrot.lane.b32.xlu1 %v4621_v35, %s4312_s21 }
 0x1c0   : > { %983 = vrot.lane.b32.xlu0 %v4653_v48, %s4312_s21 }
 0x1c3   : > { %1025 = vrot.lane.b32.xlu1 %v4621_v35, %s4313_s22 }
 0x1c4   : > { %1027 = vrot.lane.b32.xlu0 %v4653_v48, %s4313_s22  ;;  %v4141_v29 = vpop.eup %4140 }
 0x1c5   : > { %v4721_v1 = vmul.f32 %v4141_v29, %v731_v58  ;;  %v4143_v17 = vpop.eup %4142 }
 0x1c6   : > { %v4145_v36 = vpop.eup %4144  ;;  %v813_v37 = vadd.f32 1.0, %v4143_v17 }
 0x1c7   : > { %1073 = vrot.lane.b32.xlu1 %v4635_v14, %s4314_s23  ;;  %v814_v38 = vadd.f32 1.0, %v4145_v36  ;;  %v4147_v44 = vpop.eup %4146 }
 0x1c8   : > { %1075 = vrot.lane.b32.xlu0 %v4653_v48, %s4314_s23  ;;  %4148 = vrcp.f32 %v813_v37  ;;  %v815_v46 = vadd.f32 1.0, %v4147_v44 }
 0x1c9   : > { %4150 = vrcp.f32 %v814_v38 }
 0x1ca   : > { %4152 = vpow2.f32 %v3616_v45 }
 0x1cb   : > { %1117 = vrot.lane.b32.xlu1 %v4635_v14, %s4315_s24  ;;  %4154 = vrcp.f32 %v815_v46 }
 0x1cc   : > { %1119 = vrot.lane.b32.xlu0 %v4653_v48, %s4315_s24 }
 0x1cf   : > { %1161 = vrot.lane.b32.xlu1 %v4635_v14, %s4317_s25 }
 0x1d0   : > { %1163 = vrot.lane.b32.xlu0 %v4653_v48, %s4317_s25 }
 0x1d2   : > { %v4149_v18 = vpop.eup %4148 }
 0x1d3   : > { %909 = vrot.lane.b32.xlu1 %v4684_v3, %s4311_s20  ;;  %v4151_v47 = vpop.eup %4150  ;;  %v4752_v50 = vmul.f32 %v4149_v18, %v735_v16  ;;  %v4791_v16 = vadd.f32 %v4615_v31, %v617_v53 }
 0x1d4   : > { %1079 = vrot.lane.b32.xlu0 %v4686_v4, %s4314_s23  ;;  %v4754_v54 = vmul.f32 %v4151_v47, %v737_v19  ;;  %v4153_v56 = vpop.eup %4152 }
 0x1d5   : > { %v4155_v58 = vpop.eup %4154  ;;  %v816_v59 = vadd.f32 1.0, %v4153_v56  ;;  %v3619_v24 = vmul.f32 -1.442695, %v4791_v16 }
 0x1d6   : > { %6833 = vst [vmem:[#allocation10_spill] sm:$0xff] %v4754_v54  ;;  %v4768_v61 = vmul.f32 %v4155_v58, %v741_v9 }
 0x1d7   : > { %953 = vrot.lane.b32.xlu1 %v4684_v3, %s4310_s19  ;;  %4156 = vrcp.f32 %v816_v59 }
 0x1d8   : > { %1123 = vrot.lane.b32.xlu0 %v4686_v4, %s4315_s24  ;;  %4158 = vpow2.f32 %v3617_v0 }
 0x1d9   : > { %4160 = vpow2.f32 %v3618_v26 }
 0x1da   : > { %4162 = vpow2.f32 %v3619_v24 }
 0x1db   : > { %997 = vrot.lane.b32.xlu1 %v4684_v3, %s4312_s21 }
 0x1dc   : > { %1167 = vrot.lane.b32.xlu0 %v4686_v4, %s4317_s25 }
 0x1df   : > { %1041 = vrot.lane.b32.xlu1 %v4684_v3, %s4313_s22 }
 0x1e0   : > { %911 = vrot.lane.b32.xlu0 %v4700_v8, %s4311_s20 }
 0x1e1   : > { %v4157_v29 = vpop.eup %4156 }
 0x1e2   : > { %v4812_v9 = vmul.f32 %v4157_v29, %v743_v39  ;;  %v4159_v17 = vpop.eup %4158  ;;  %v4827_v39 = vadd.f32 %v4619_v34, %v617_v53 }
 0x1e3   : > { %1077 = vrot.lane.b32.xlu1 %v4684_v3, %s4314_s23  ;;  %v4161_v37 = vpop.eup %4160  ;;  %v817_v44 = vadd.f32 1.0, %v4159_v17 }
 0x1e4   : > { %955 = vrot.lane.b32.xlu0 %v4700_v8, %s4310_s19  ;;  %6837 = vst [vmem:[#allocation14_spill] sm:$0xff] %v4812_v9  ;;  %v818_v45 = vadd.f32 1.0, %v4161_v37  ;;  %v4163_v18 = vpop.eup %4162  ;;  %v3620_v0 = vmul.f32 -1.442695, %v4827_v39 }
 0x1e5   : > { %4164 = vrcp.f32 %v817_v44  ;;  %v819_v24 = vadd.f32 1.0, %v4163_v18 }
 0x1e6   : > { %4166 = vrcp.f32 %v818_v45 }
 0x1e7   : > { %1121 = vrot.lane.b32.xlu1 %v4684_v3, %s4315_s24  ;;  %4168 = vpow2.f32 %v3620_v0 }
 0x1e8   : > { %999 = vrot.lane.b32.xlu0 %v4700_v8, %s4312_s21  ;;  %4170 = vrcp.f32 %v819_v24 }
 0x1eb   : > { %1165 = vrot.lane.b32.xlu1 %v4684_v3, %s4317_s25 }
 0x1ec   : > { %1043 = vrot.lane.b32.xlu0 %v4700_v8, %s4313_s22 }
 0x1ef   : > { %893 = vrot.lane.b32.xlu1 %v4686_v4, %s4311_s20  ;;  %v4165_v18 = vpop.eup %4164 }
 0x1f0   : > { %895 = vrot.lane.b32.xlu0 %v4721_v1, %s4311_s20 }
 0x1f3   : > { %941 = vrot.lane.b32.xlu1 %v4686_v4, %s4310_s19 }
 0x1f4   : > { %943 = vrot.lane.b32.xlu0 %v4721_v1, %s4310_s19 }
 0x1f7   : > { %985 = vrot.lane.b32.xlu1 %v4686_v4, %s4312_s21 }
 0x1f8   : > { %987 = vrot.lane.b32.xlu0 %v4721_v1, %s4312_s21 }
 0x1fb   : > { %1029 = vrot.lane.b32.xlu1 %v4686_v4, %s4313_s22 }
 0x1fc   : > { %1031 = vrot.lane.b32.xlu0 %v4721_v1, %s4313_s22 }
 0x1ff   : > { %1081 = vrot.lane.b32.xlu1 %v4700_v8, %s4314_s23 }
 0x200   : > { %1083 = vrot.lane.b32.xlu0 %v4721_v1, %s4314_s23 }
 0x203   : > { %1125 = vrot.lane.b32.xlu1 %v4700_v8, %s4315_s24 }
 0x204   : > { %1127 = vrot.lane.b32.xlu0 %v4721_v1, %s4315_s24 }
 0x207   : > { %1169 = vrot.lane.b32.xlu1 %v4700_v8, %s4317_s25 }
 0x208   : > { %1171 = vrot.lane.b32.xlu0 %v4721_v1, %s4317_s25 }
 0x20b   : > { %1548 = vrot.lane.b32.xlu1 %v4752_v50, %s4311_s20 }
 0x20c   : > { %1714 = vrot.lane.b32.xlu0 %v4754_v54, %s4314_s23 }
 0x20d   : > { %v906_v55 = vpop.permute.xlu1 %905 }
 0x20e   : > { %v4760_v57 = vpop.permute.xlu0 %1071 }
 0x20f   : > { %1592 = vrot.lane.b32.xlu1 %v4752_v50, %s4310_s19 }
 0x210   : > { %1758 = vrot.lane.b32.xlu0 %v4754_v54, %s4315_s24 }
 0x211   : > { %v4766_v60 = vpop.permute.xlu1 %949 }
 0x212   : > { %v4770_v62 = vpop.permute.xlu0 %1115 }
 0x213   : > { %6834 = vst [vmem:[#allocation11_spill] sm:$0xff] %v4770_v62  ;;  %1636 = vrot.lane.b32.xlu1 %v4752_v50, %s4312_s21 }
 0x214   : > { %1550 = vrot.lane.b32.xlu0 %v4768_v61, %s4311_s20 }
 0x215   : > { %v4782_v6 = vpop.permute.xlu1 %993 }
 0x216   : > { %v4784_v7 = vpop.permute.xlu0 %1159 }
 0x217   : > { %6835 = vst [vmem:[#allocation12_spill] sm:$0xff] %v4784_v7  ;;  %1680 = vrot.lane.b32.xlu1 %v4752_v50, %s4313_s22 }
 0x218   : > { %1594 = vrot.lane.b32.xlu0 %v4768_v61, %s4310_s19 }
 0x219   : > { %v4795_v28 = vpop.permute.xlu1 %1037 }
 0x21a   : > { %v908_v19 = vpop.permute.xlu0 %907 }
 0x21b   : > { %1712 = vrot.lane.b32.xlu1 %v4752_v50, %s4314_s23 }
 0x21c   : > { %1638 = vrot.lane.b32.xlu0 %v4768_v61, %s4312_s21 }
 0x21d   : > { %v4802_v27 = vpop.permute.xlu1 %1069 }
 0x21e   : > { %v4804_v31 = vpop.permute.xlu0 %951 }
 0x21f   : > { %1756 = vrot.lane.b32.xlu1 %v4752_v50, %s4315_s24 }
 0x220   : > { %1682 = vrot.lane.b32.xlu0 %v4768_v61, %s4313_s22 }
 0x221   : > { %v4810_v32 = vpop.permute.xlu1 %1113 }
 0x222   : > { %6836 = vst [vmem:[#allocation13_spill] sm:$0xff] %v4810_v32  ;;  %v4814_v15 = vpop.permute.xlu0 %995 }
 0x223   : > { %1532 = vrot.lane.b32.xlu1 %v4754_v54, %s4311_s20 }
 0x224   : > { %1534 = vrot.lane.b32.xlu0 %v4812_v9, %s4311_s20 }
 0x225   : > { %v4820_v36 = vpop.permute.xlu1 %1157 }
 0x226   : > { %6838 = vst [vmem:[#allocation15_spill] sm:$0xff] %v4820_v36  ;;  %v4822_v38 = vpop.permute.xlu0 %1039 }
 0x227   : > { %1580 = vrot.lane.b32.xlu1 %v4754_v54, %s4310_s19 }
 0x228   : > { %1582 = vrot.lane.b32.xlu0 %v4812_v9, %s4310_s19 }
 0x229   : > { %v890_v46 = vpop.permute.xlu1 %889 }
 0x22a   : > { %v925_v47 = vsel %vm400_vm1, %v890_v46, %v906_v55  ;;  %v892_v49 = vpop.permute.xlu0 %891  ;;  %v913_v56 = vsel %vm400_vm1, %v906_v55, %v890_v46 }
 0x22b   : > { %v926_v58 = vsel %vm400_vm1, %v892_v49, %v908_v19  ;;  %1624 = vrot.lane.b32.xlu1 %v4754_v54, %s4312_s21  ;;  %v914_v59 = vsel %vm400_vm1, %v908_v19, %v892_v49  ;;  %v930_v34 = vmul.f32 %v913_v56, %v4463_v20  ;;  %v929_v53 = vmul.f32 %v925_v47, %v4469_v22  ;;  %v4167_v49 = vpop.eup %4166 }
 0x22c   : > { %1626 = vrot.lane.b32.xlu0 %v4812_v9, %s4312_s21  ;;  %v932_v26 = vmul.f32 %v914_v59, %v4463_v20  ;;  %v931_v55 = vmul.f32 %v926_v58, %v4469_v22  ;;  %v4869_v56 = vmul.f32 %v4165_v18, %v4773_v63  ;;  %v4169_v59 = vpop.eup %4168 }
 0x22d   : > { %v4844_v29 = vpop.permute.xlu1 %937  ;;  %v4171_v0 = vpop.eup %4170 }
 0x22e   : > { %v4846_v17 = vpop.permute.xlu0 %939  ;;  %v3722_v19 = vpack.c.bf16 %v932_v26, %v930_v34  ;;  %v3724_v37 = vpack.c.bf16 %v931_v55, %v929_v53  ;;  %v4874_v34 = vmul.f32 %v4167_v49, %v4778_v5  ;;  %v820_v26 = vadd.f32 1.0, %v4169_v59 }
 0x22f   : > { %1668 = vrot.lane.b32.xlu1 %v4754_v54, %s4313_s22  ;;  %v4885_v63 = vmul.f32 %v4171_v0, %v4791_v16  ;;  %v957_v7 = vsel %vm423_vm0, %v4766_v60, %v4844_v29 }
 0x230   : > { %1670 = vrot.lane.b32.xlu0 %v4812_v9, %s4313_s22  ;;  %3723 = vmatprep.subr.bf16.mxu1 %v3722_v19  ;;  %4172 = vrcp.f32 %v820_v26 }
 0x231   : > { %v4852_v44 = vpop.permute.xlu1 %981  ;;  %3725 = vmatpush1.bf16.msra.mxu1 %v3724_v37 }
 0x232   : > { %v4854_v45 = vpop.permute.xlu0 %983 }
 0x233   : > { %1716 = vrot.lane.b32.xlu1 %v4768_v61, %s4314_s23 }
 0x234   : > { %1718 = vrot.lane.b32.xlu0 %v4812_v9, %s4314_s23 }
 0x235   : > { %v4860_v46 = vpop.permute.xlu1 %1025 }
 0x236   : > { %v4862_v47 = vpop.permute.xlu0 %1027 }
 0x237   : > { %1760 = vrot.lane.b32.xlu1 %v4768_v61, %s4315_s24 }
 0x238   : > { %1762 = vrot.lane.b32.xlu0 %v4812_v9, %s4315_s24 }
 0x239   : > { %v4871_v58 = vpop.permute.xlu1 %1073 }
 0x23a   : > { %v4876_v53 = vpop.permute.xlu0 %1075  ;;  %v4173_v59 = vpop.eup %4172 }
 0x23b   : > { %1552 = vrot.lane.b32.xlu1 %v4869_v56, %s4311_s20  ;;  %v4916_v26 = vmul.f32 %v4173_v59, %v4827_v39 }
 0x23c   : > { %1722 = vrot.lane.b32.xlu0 %v4874_v34, %s4314_s23 }
 0x23d   : > { %v4882_v55 = vpop.permute.xlu1 %1117 }
 0x23e   : > { %v4887_v24 = vpop.permute.xlu0 %1119 }
 0x23f   : > { %6839 = vst [vmem:[#allocation16_spill] sm:$0xff] %v4887_v24  ;;  %1596 = vrot.lane.b32.xlu1 %v4869_v56, %s4310_s19 }
 0x240   : > { %1554 = vrot.lane.b32.xlu0 %v4885_v63, %s4311_s20 }
 0x241   : > { %v4893_v5 = vpop.permute.xlu1 %1161 }
 0x242   : > { %6840 = vst [vmem:[#allocation17_spill] sm:$0xff] %v4893_v5  ;;  %v4895_v19 = vpop.permute.xlu0 %1163 }
 0x243   : > { %6841 = vst [vmem:[#allocation18_spill] sm:$0xff] %v4895_v19  ;;  %1640 = vrot.lane.b32.xlu1 %v4869_v56, %s4312_s21  ;;  %v970_v19 = vsel %vm423_vm0, %v4846_v17, %v4804_v31 }
 0x244   : > { %1598 = vrot.lane.b32.xlu0 %v4885_v63, %s4310_s19 }
 0x245   : > { %v910_v16 = vpop.permute.xlu1 %909 }
 0x246   : > { %v4901_v37 = vpop.permute.xlu0 %1079 }
 0x247   : > { %1684 = vrot.lane.b32.xlu1 %v4869_v56, %s4313_s22 }
 0x248   : > { %1642 = vrot.lane.b32.xlu0 %v4885_v63, %s4312_s21 }
 0x249   : > { %v954_v18 = vpop.permute.xlu1 %953 }
 0x24a   : > { %v4907_v49 = vpop.permute.xlu0 %1123 }
 0x24b   : > { %6842 = vst [vmem:[#allocation19_spill] sm:$0xff] %v4907_v49  ;;  %1720 = vrot.lane.b32.xlu1 %v4869_v56, %s4314_s23  ;;  %v958_v49 = vsel %vm423_vm0, %v4804_v31, %v4846_v17 }
 0x24c   : > { %1686 = vrot.lane.b32.xlu0 %v4885_v63, %s4313_s22  ;;  %v976_v5 = vmul.f32 %v958_v49, %v4466_v21 }
 0x24d   : > { %v4913_v0 = vpop.permute.xlu1 %997 }
 0x24e   : > { %v4918_v2 = vpop.permute.xlu0 %1167 }
 0x24f   : > { %6843 = vst [vmem:[#allocation20_spill] sm:$0xff] %v4918_v2  ;;  %1536 = vrot.lane.b32.xlu1 %v4874_v34, %s4311_s20 }
 0x250   : > { %1538 = vrot.lane.b32.xlu0 %v4916_v26, %s4311_s20 }
 0x251   : > { %v4924_v25 = vpop.permute.xlu1 %1041 }
 0x252   : > { %v912_v30 = vpop.permute.xlu0 %911 }
 0x253   : > { %1764 = vrot.lane.b32.xlu1 %v4869_v56, %s4315_s24 }
 0x254   : > { %1766 = vrot.lane.b32.xlu0 %v4874_v34, %s4315_s24 }
 0x255   : > { %v4930_v12 = vpop.permute.xlu1 %1077 }
 0x256   : > { %v956_v39 = vpop.permute.xlu0 %955 }
 0x257   : > { %1584 = vrot.lane.b32.xlu1 %v4874_v34, %s4310_s19 }
 0x258   : > { %1586 = vrot.lane.b32.xlu0 %v4916_v26, %s4310_s19 }
 0x259   : > { %v4936_v59 = vpop.permute.xlu1 %1121 }
 0x25a   : > { %6844 = vst [vmem:[#allocation21_spill] sm:$0xff] %v4936_v59  ;;  %v4938_v2 = vpop.permute.xlu0 %999  ;;  %v974_v59 = vmul.f32 %v957_v7, %v4466_v21 }
 0x25b   : > { %1628 = vrot.lane.b32.xlu1 %v4874_v34, %s4312_s21 }
 0x25c   : > { %1802 = vrot.lane.b32.xlu0 %v4754_v54, %s4317_s25 }
 0x25d   : > { %v4944_v13 = vpop.permute.xlu1 %1165 }
 0x25e   : > { %6845 = vst [vmem:[#allocation22_spill] sm:$0xff] %v4944_v13  ;;  %v4949_v36 = vpop.permute.xlu0 %1043  ;;  %v969_v13 = vsel %vm423_vm0, %v4844_v29, %v4766_v60 }
 0x25f   : > { %1672 = vrot.lane.b32.xlu1 %v4874_v34, %s4313_s22 }
 0x260   : > { %1630 = vrot.lane.b32.xlu0 %v4916_v26, %s4312_s21 }
 0x261   : > { %v894_v10 = vpop.permute.xlu1 %893 }
 0x262   : > { %v915_v54 = vsel %vm400_vm1, %v910_v16, %v894_v10  ;;  %v927_v11 = vsel %vm400_vm1, %v894_v10, %v910_v16  ;;  %v896_v62 = vpop.permute.xlu0 %895  ;;  %v973_v10 = vmul.f32 %v969_v13, %v4472_v23 }
 0x263   : > { %v933_v32 = vmul.f32 %v927_v11, %v4469_v22  ;;  %v934_v24 = vmul.f32 %v915_v54, %v4463_v20  ;;  %v916_v60 = vsel %vm400_vm1, %v912_v30, %v896_v62  ;;  %v928_v7 = vsel %vm400_vm1, %v896_v62, %v912_v30  ;;  %1724 = vrot.lane.b32.xlu1 %v4885_v63, %s4314_s23 }
 0x264   : > { %v935_v31 = vmul.f32 %v928_v7, %v4469_v22  ;;  %v936_v29 = vmul.f32 %v916_v60, %v4463_v20  ;;  %1806 = vrot.lane.b32.xlu0 %v4812_v9, %s4317_s25  ;;  %v975_v11 = vmul.f32 %v970_v19, %v4472_v23  ;;  %v1001_v54 = vsel %vm446_vm2, %v4782_v6, %v4852_v44 }
 0x265   : > { %v942_v17 = vpop.permute.xlu1 %941  ;;  %v1002_v60 = vsel %vm446_vm2, %v4814_v15, %v4854_v45  ;;  %v3730_v19 = vpack.c.bf16 %v976_v5, %v974_v59 }
 0x266   : > { %v959_v30 = vsel %vm423_vm0, %v954_v18, %v942_v17  ;;  %v944_v62 = vpop.permute.xlu0 %943  ;;  %v3726_v16 = vpack.c.bf16 %v936_v29, %v934_v24  ;;  %v3728_v49 = vpack.c.bf16 %v935_v31, %v933_v32  ;;  %v971_v7 = vsel %vm423_vm0, %v942_v17, %v954_v18 }
 0x267   : > { %v960_v13 = vsel %vm423_vm0, %v956_v39, %v944_v62  ;;  %1768 = vrot.lane.b32.xlu1 %v4885_v63, %s4315_s24  ;;  %v978_v20 = vmul.f32 %v959_v30, %v4466_v21  ;;  %v972_v22 = vsel %vm423_vm0, %v944_v62, %v956_v39  ;;  %v1013_v24 = vsel %vm446_vm2, %v4852_v44, %v4782_v6 }
 0x268   : > { %v980_v9 = vmul.f32 %v960_v13, %v4466_v21  ;;  %1674 = vrot.lane.b32.xlu0 %v4916_v26, %s4313_s22  ;;  %3727 = vmatprep.subr.bf16.mxu1 %v3726_v16  ;;  %v1018_v18 = vmul.f32 %v1001_v54, %v4492_v41  ;;  %v3732_v59 = vpack.c.bf16 %v975_v11, %v973_v10 }
 0x269   : > { %v986_v32 = vpop.permute.xlu1 %985  ;;  %3729 = vmatpush1.bf16.msra.mxu1 %v3728_v49  ;;  %v1014_v39 = vsel %vm446_vm2, %v4854_v45, %v4814_v15  ;;  %v1020_v31 = vmul.f32 %v1002_v60, %v4492_v41  ;;  %v977_v29 = vmul.f32 %v971_v7, %v4472_v23  ;;  %v979_v17 = vmul.f32 %v972_v22, %v4472_v23 }
 0x26a   : > { %3731 = vmatprep.subr.bf16.mxu1 %v3730_v19  ;;  %v988_v5 = vpop.permute.xlu0 %987  ;;  %v3734_v6 = vpack.c.bf16 %v980_v9, %v978_v20  ;;  %v1003_v44 = vsel %vm446_vm2, %v4913_v0, %v986_v32  ;;  %v1017_v45 = vmul.f32 %v1013_v24, %v4489_v40  ;;  %v1019_v11 = vmul.f32 %v1014_v39, %v4489_v40 }
 0x26b   : > { %1800 = vrot.lane.b32.xlu1 %v4752_v50, %s4317_s25  ;;  %v1004_v10 = vsel %vm446_vm2, %v4938_v2, %v988_v5  ;;  %v1045_v54 = vsel %vm469_vm3, %v4795_v28, %v4860_v46  ;;  %v1046_v20 = vsel %vm469_vm3, %v4822_v38, %v4862_v47  ;;  %v3736_v9 = vpack.c.bf16 %v979_v17, %v977_v29 }
 0x26c   : > { %1810 = vrot.lane.b32.xlu0 %v4874_v34, %s4317_s25  ;;  %v3738_v30 = vpack.c.bf16 %v1020_v31, %v1018_v18  ;;  %v1015_v62 = vsel %vm446_vm2, %v986_v32, %v4913_v0  ;;  %v1022_v16 = vmul.f32 %v1003_v44, %v4492_v41  ;;  %v1016_v49 = vsel %vm446_vm2, %v988_v5, %v4938_v2  ;;  %v870_v18 = vld [vmem:[%s6756_s4 + $0x8] sm:$0xff] }
 0x26d   : > { %v1030_v15 = vpop.permute.xlu1 %1029  ;;  %3733 = vmatpush1.bf16.msra.mxu1 %v3732_v59  ;;  %v1024_v60 = vmul.f32 %v1004_v10, %v4492_v41  ;;  %v3740_v19 = vpack.c.bf16 %v1019_v11, %v1017_v45  ;;  %v1062_v24 = vmul.f32 %v1045_v54, %v4498_v43  ;;  %v1064_v0 = vmul.f32 %v1046_v20, %v4498_v43 }
 0x26e   : > { %3735 = vmatprep.subr.bf16.mxu1 %v3734_v6  ;;  %v1032_v22 = vpop.permute.xlu0 %1031  ;;  %v1021_v32 = vmul.f32 %v1015_v62, %v4489_v40  ;;  %v1023_v2 = vmul.f32 %v1016_v49, %v4489_v40  ;;  %v1057_v5 = vsel %vm469_vm3, %v4860_v46, %v4795_v28  ;;  %v1058_v59 = vsel %vm469_vm3, %v4862_v47, %v4822_v38 }
 0x26f   : > { %1804 = vrot.lane.b32.xlu1 %v4768_v61, %s4317_s25  ;;  %v3742_v39 = vpack.c.bf16 %v1024_v60, %v1022_v16  ;;  %1342 = vmatprep.mubr.f32.mxu1 %v870_v18  ;;  %v1047_v31 = vsel %vm469_vm3, %v4924_v25, %v1030_v15  ;;  %v1048_v29 = vsel %vm469_vm3, %v4949_v36, %v1032_v22 }
 0x270   : > { %1203 = vrot.lane.b32.xlu0 %v4621_v35, %s4318_s26  ;;  %v1061_v46 = vmul.f32 %v1057_v5, %v4495_v42  ;;  %v1063_v38 = vmul.f32 %v1058_v59, %v4495_v42  ;;  %v3744_v47 = vpack.c.bf16 %v1023_v2, %v1021_v32  ;;  %v3746_v6 = vpack.c.bf16 %v1064_v0, %v1062_v24  ;;  %v1513_v2 = vld [vmem:[%s6758_s6 + $0x8] sm:$0xff] }
 0x271   : > { %v5032_v7 = vpop.permute.xlu1 %1081  ;;  %3737 = vmatpush1.bf16.msra.mxu1 %v3736_v9  ;;  %v1059_v44 = vsel %vm469_vm3, %v1030_v15, %v4924_v25  ;;  %v1066_v10 = vmul.f32 %v1047_v31, %v4498_v43  ;;  %v1060_v45 = vsel %vm469_vm3, %v1032_v22, %v4949_v36  ;;  %v1068_v11 = vmul.f32 %v1048_v29, %v4498_v43  ;;  %v6846_v31 = vld [vmem:[#allocation16_spill] sm:$0xff] }
 0x272   : > { %3739 = vmatprep.subr.bf16.mxu1 %v3738_v30  ;;  %v5034_v13 = vpop.permute.xlu0 %1083  ;;  %v1065_v9 = vmul.f32 %v1059_v44, %v4495_v42  ;;  %v1067_v25 = vmul.f32 %v1060_v45, %v4495_v42  ;;  %v3748_v15 = vpack.c.bf16 %v1063_v38, %v1061_v46  ;;  %v3754_v16 = vpack.c.bf16 %v4653_v48, %v4621_v35  ;;  %v6848_v38 = vld [vmem:[#allocation11_spill] sm:$0xff]  ;;  %v6850_v45 = vld [vmem:[#allocation10_spill] sm:$0xff] }
 0x273   : > { %1808 = vrot.lane.b32.xlu1 %v4869_v56, %s4317_s25  ;;  %v3750_v36 = vpack.c.bf16 %v1068_v11, %v1066_v10  ;;  %v1102_v49 = vsel %vm491_vm4, %v4876_v53, %v4871_v58  ;;  %v1101_v24 = vsel %vm491_vm4, %v4760_v57, %v4802_v27  ;;  %v3756_v35 = vpack.c.bf16 %v4635_v14, %v4617_v33 }
 0x274   : > { %1207 = vrot.lane.b32.xlu0 %v4653_v48, %s4318_s26  ;;  %v3752_v62 = vpack.c.bf16 %v1067_v25, %v1065_v9  ;;  %v1086_v48 = vsel %vm491_vm4, %v4871_v58, %v4876_v53  ;;  %v1108_v0 = vmul.f32 %v1102_v49, %v4511_v52  ;;  %v3758_v32 = vpack.c.bf16 %v4721_v1, %v4686_v4 }
 0x275   : > { %v5057_v17 = vpop.permute.xlu1 %1125  ;;  %3741 = vmatpush1.bf16.msra.mxu1 %v3740_v19  ;;  %1984 = vmatprep.mubr.f32.mxu0 %v1513_v2  ;;  %v1085_v58 = vsel %vm491_vm4, %v4802_v27, %v4760_v57  ;;  %v1106_v53 = vmul.f32 %v1101_v24, %v4511_v52  ;;  %v1103_v18 = vsel %vm491_vm4, %v4901_v37, %v4930_v12 }
 0x276   : > { %3743 = vmatprep.subr.bf16.mxu1 %v3742_v39  ;;  %v5059_v28 = vpop.permute.xlu0 %1127  ;;  %v3760_v5 = vpack.c.bf16 %v4700_v8, %v4684_v3  ;;  %v1088_v57 = vsel %vm491_vm4, %v5032_v7, %v5034_v13  ;;  %v1105_v39 = vmul.f32 %v1085_v58, %v4508_v51  ;;  %v1146_v29 = vsel %vm514_vm5, %v6846_v31, %v4882_v55 }
 0x277   : > { %1812 = vrot.lane.b32.xlu1 %v4885_v63, %s4317_s25  ;;  %v3762_v59 = vpack.c.bf16 %v1108_v0, %v1106_v53  ;;  %v1130_v10 = vsel %vm514_vm5, %v4882_v55, %v6846_v31  ;;  %v1148_v25 = vsel %vm514_vm5, %v5059_v28, %v5057_v17  ;;  %v6854_v0 = vld [vmem:[#allocation21_spill] sm:$0xff]  ;;  %v6856_v53 = vld [vmem:[#allocation15_spill] sm:$0xff] }
 0x278   : > { %1726 = vrot.lane.b32.xlu0 %v4916_v26, %s4314_s23 }
 0x279   : > { %v5073_v54 = vpop.permute.xlu1 %1169  ;;  %3745 = vmatpush1.bf16.msra.mxu1 %v3744_v47 }
 0x27a   : > { %3747 = vmatprep.subr.bf16.mxu1 %v3746_v6  ;;  %v5075_v20 = vpop.permute.xlu0 %1171  ;;  %v1111_v6 = vmul.f32 %v1088_v57, %v4508_v51  ;;  %v6858_v57 = vld [vmem:[#allocation14_spill] sm:$0xff] }
 0x27b   : > { %1201 = vrot.lane.b32.xlu1 %v4617_v33, %s4318_s26  ;;  %v1104_v33 = vsel %vm491_vm4, %v5034_v13, %v5032_v7  ;;  %v6847_v13 = vld [vmem:[#allocation13_spill] sm:$0xff] }
 0x27c   : > { %1211 = vrot.lane.b32.xlu0 %v4686_v4, %s4318_s26  ;;  %v1112_v27 = vmul.f32 %v1104_v33, %v4511_v52  ;;  %v1145_v47 = vsel %vm514_vm5, %v6848_v38, %v6847_v13  ;;  %v1132_v33 = vsel %vm514_vm5, %v5057_v17, %v5059_v28 }
 0x27d   : > { %v5083_v22 = vpop.permute.xlu1 %1548  ;;  %3749 = vmatpush1.bf16.msra.mxu1 %v3748_v15 }
 0x27e   : > { %3751 = vmatprep.subr.bf16.mxu1 %v3750_v36  ;;  %v5085_v30 = vpop.permute.xlu0 %1714  ;;  %v1129_v36 = vsel %vm514_vm5, %v6847_v13, %v6848_v38 }
 0x27f   : > { %1205 = vrot.lane.b32.xlu1 %v4635_v14, %s4318_s26 }
 0x280   : > { %1770 = vrot.lane.b32.xlu0 %v4916_v26, %s4315_s24 }
 0x281   : > { %v5096_v60 = vpop.permute.xlu1 %1592  ;;  %3753 = vmatpush1.bf16.msra.mxu1 %v3752_v62  ;;  %v6851_v62 = vld [vmem:[#allocation17_spill] sm:$0xff] }
 0x282   : > { %3755 = vmatprep.subr.bf16.mxu1 %v3754_v16  ;;  %v5098_v19 = vpop.permute.xlu0 %1758  ;;  %v6852_v16 = vld [vmem:[#allocation18_spill] sm:$0xff] }
 0x283   : > { %1209 = vrot.lane.b32.xlu1 %v4684_v3, %s4318_s26  ;;  %v1087_v3 = vsel %vm491_vm4, %v4930_v12, %v4901_v37  ;;  %v6849_v12 = vld [vmem:[#allocation5_spill] sm:$0xff]  ;;  %v1190_v49 = vsel %vm537_vm6, %v6852_v16, %v6851_v62 }
 0x284   : > { %1215 = vrot.lane.b32.xlu0 %v4721_v1, %s4318_s26  ;;  %v1107_v1 = vmul.f32 %v1086_v48, %v4508_v51  ;;  %v1152_v37 = vmul.f32 %v1146_v29, %v6849_v12  ;;  %v1109_v9 = vmul.f32 %v1087_v3, %v4508_v51  ;;  %v1150_v55 = vmul.f32 %v1145_v47, %v6849_v12 }
 0x285   : > { %v5121_v14 = vpop.permute.xlu1 %1636  ;;  %3757 = vmatpush1.bf16.msra.mxu1 %v3756_v35  ;;  %v6853_v35 = vld [vmem:[#allocation4_spill] sm:$0xff]  ;;  %v1174_v29 = vsel %vm537_vm6, %v6851_v62, %v6852_v16 }
 0x286   : > { %3759 = vmatprep.subr.bf16.mxu1 %v3758_v32  ;;  %v5127_v4 = vpop.permute.xlu0 %1550  ;;  %v3764_v44 = vpack.c.bf16 %v1107_v1, %v1105_v39  ;;  %v1151_v48 = vmul.f32 %v1130_v10, %v6853_v35  ;;  %v6855_v32 = vld [vmem:[#allocation19_spill] sm:$0xff]  ;;  %v3768_v58 = vpack.c.bf16 %v1111_v6, %v1109_v9  ;;  %v6857_v1 = vld [vmem:[#allocation12_spill] sm:$0xff]  ;;  %v1192_v9 = vsel %vm537_vm6, %v5075_v20, %v5073_v54 }
 0x287   : > { %1213 = vrot.lane.b32.xlu1 %v4700_v8, %s4318_s26  ;;  %v1110_v8 = vmul.f32 %v1103_v18, %v4511_v52  ;;  %v1147_v2 = vsel %vm514_vm5, %v6855_v32, %v6854_v0  ;;  %v1189_v18 = vsel %vm537_vm6, %v6857_v1, %v6856_v53  ;;  %v6859_v39 = vld [vmem:[#allocation7_spill] sm:$0xff]  ;;  %v1131_v17 = vsel %vm514_vm5, %v6854_v0, %v6855_v32  ;;  %v6862_v62 = vld [vmem:[#allocation20_spill] sm:$0xff] }
 0x288   : > { %1814 = vrot.lane.b32.xlu0 %v4916_v26, %s4317_s25  ;;  %v1196_v31 = vmul.f32 %v1190_v49, %v6859_v39  ;;  %v1154_v3 = vmul.f32 %v1147_v2, %v6849_v12  ;;  %v1194_v38 = vmul.f32 %v1189_v18, %v6859_v39  ;;  %v1153_v6 = vmul.f32 %v1131_v17, %v6853_v35  ;;  %v6863_v2 = vld [vmem:[#allocation3_spill] sm:$0xff] }
 0x289   : > { %v5147_v46 = vpop.permute.xlu1 %1680  ;;  %3761 = vmatpush1.bf16.msra.mxu1 %v3760_v5  ;;  %v3766_v11 = vpack.c.bf16 %v1112_v27, %v1110_v8  ;;  %v1156_v5 = vmul.f32 %v1148_v25, %v6849_v12  ;;  %v3770_v27 = vpack.c.bf16 %v1152_v37, %v1150_v55  ;;  %v1155_v8 = vmul.f32 %v1132_v33, %v6853_v35  ;;  %v6860_v37 = vld [vmem:[#allocation6_spill] sm:$0xff] }
 0x28a   : > { %3763 = vmatprep.subr.bf16.mxu1 %v3762_v59  ;;  %v5153_v7 = vpop.permute.xlu0 %1594  ;;  %v1149_v59 = vmul.f32 %v1129_v36, %v6853_v35  ;;  %v1173_v10 = vsel %vm537_vm6, %v6856_v53, %v6857_v1  ;;  %v3778_v36 = vpack.c.bf16 %v1196_v31, %v1194_v38  ;;  %v6861_v55 = vld [vmem:[#allocation22_spill] sm:$0xff] }
 0x28b   : > { %1844 = vrot.lane.b32.xlu1 %v4752_v50, %s4318_s26  ;;  %v1191_v16 = vsel %vm537_vm6, %v6862_v62, %v6861_v55  ;;  %v3776_v32 = vpack.c.bf16 %v1155_v8, %v1153_v6  ;;  %v1193_v31 = vmul.f32 %v1173_v10, %v6860_v37  ;;  %v883_v10 = vld [vmem:[%s6757_s5 + $0x10] sm:$0xff] }
 0x28c   : > { %1846 = vrot.lane.b32.xlu0 %v6850_v45, %s4318_s26  ;;  %v3772_v47 = vpack.c.bf16 %v1151_v48, %v1149_v59 }
 0x28d   : > { %v5171_v15 = vpop.permute.xlu1 %1712  ;;  %3765 = vmatpush1.bf16.msra.mxu1 %v3764_v44  ;;  %v3774_v44 = vpack.c.bf16 %v1156_v5, %v1154_v3  ;;  %v1200_v5 = vmul.f32 %v1192_v9, %v6859_v39 }
 0x28e   : > { %3767 = vmatprep.subr.bf16.mxu1 %v3766_v11  ;;  %v5180_v24 = vpop.permute.xlu0 %1638  ;;  %v1195_v11 = vmul.f32 %v1174_v29, %v6860_v37  ;;  %v1198_v29 = vmul.f32 %v1191_v16, %v6859_v39 }
 0x28f   : > { %1848 = vrot.lane.b32.xlu1 %v4768_v61, %s4318_s26 }
 0x290   : > { %1850 = vrot.lane.b32.xlu0 %v6858_v57, %s4318_s26  ;;  %v3780_v6 = vpack.c.bf16 %v1195_v11, %v1193_v31  ;;  %v879_v31 = vld [vmem:[%s6756_s4 + $0x50] sm:$0xff] }
 0x291   : > { %v5202_v28 = vpop.permute.xlu1 %1756  ;;  %3769 = vmatpush1.bf16.msra.mxu1 %v3768_v58  ;;  %v6864_v58 = vld [vmem:[#allocation2_spill] sm:$0xff] }
 0x292   : > { %3771 = vmatprep.subr.bf16.mxu1 %v3770_v27  ;;  %v5209_v13 = vpop.permute.xlu0 %1682 }
 0x293   : > { %1852 = vrot.lane.b32.xlu1 %v4869_v56, %s4318_s26 }
 0x294   : > { %1854 = vrot.lane.b32.xlu0 %v4874_v34, %s4318_s26 }
 0x295   : > { %v1533_v25 = vpop.permute.xlu1 %1532  ;;  %3773 = vmatpush1.bf16.msra.mxu1 %v3772_v47 }
 0x296   : > { %v1556_v49 = vsel %vm400_vm1, %v5083_v22, %v1533_v25  ;;  %v1568_v48 = vsel %vm400_vm1, %v1533_v25, %v5083_v22  ;;  %3775 = vmatprep.subr.bf16.mxu1 %v3774_v44  ;;  %v1535_v0 = vpop.permute.xlu0 %1534  ;;  %v1176_v22 = vsel %vm537_vm6, %v5073_v54, %v5075_v20  ;;  %v882_v54 = vld [vmem:[%s6757_s5 + $0x8] sm:$0xff]  ;;  %v1175_v20 = vsel %vm537_vm6, %v6861_v55, %v6862_v62  ;;  %v1524_v62 = vld [vmem:[%s6759_s7] sm:$0xff] }
 0x297   : > { %v1572_v33 = vmul.f32 %v1568_v48, %v6863_v2  ;;  %v1573_v53 = vmul.f32 %v1556_v49, %v6864_v58  ;;  %v1557_v1 = vsel %vm400_vm1, %v5127_v4, %v1535_v0  ;;  %v1569_v18 = vsel %vm400_vm1, %v1535_v0, %v5127_v4  ;;  %1856 = vrot.lane.b32.xlu1 %v4885_v63, %s4318_s26  ;;  %v881_v4 = vld [vmem:[%s6757_s5] sm:$0xff]  ;;  %v1525_v49 = vld [vmem:[%s6759_s7 + $0x8] sm:$0xff] }
 0x298   : > { %v1574_v27 = vmul.f32 %v1569_v18, %v6863_v2  ;;  %v1575_v59 = vmul.f32 %v1557_v1, %v6864_v58  ;;  %1858 = vrot.lane.b32.xlu0 %v4916_v26, %s4318_s26  ;;  %v1199_v47 = vmul.f32 %v1176_v22, %v6860_v37  ;;  %v3782_v44 = vpack.c.bf16 %v1200_v5, %v1198_v29  ;;  %v869_v48 = vld [vmem:[%s6756_s4] sm:$0xff]  ;;  %v1527_v1 = vld [vmem:[%s6759_s7 + $0x18] sm:$0xff] }
 0x299   : > { %v5251_v17 = vpop.permute.xlu1 %1580  ;;  %3777 = vmatpush1.bf16.msra.mxu1 %v3776_v32  ;;  %v1197_v9 = vmul.f32 %v1175_v20, %v6860_v37  ;;  %v873_v32 = vld [vmem:[%s6756_s4 + $0x20] sm:$0xff]  ;;  %v872_v18 = vld [vmem:[%s6756_s4 + $0x18] sm:$0xff]  ;;  %v878_v20 = vld [vmem:[%s6756_s4 + $0x48] sm:$0xff] }
 0x29a   : > { %v3796_v3 = vpack.c.bf16 %v1574_v27, %v1572_v33  ;;  %3779 = vmatprep.subr.bf16.mxu1 %v3778_v36  ;;  %v5260_v8 = vpop.permute.xlu0 %1582  ;;  %v3794_v38 = vpack.c.bf16 %v1575_v59, %v1573_v53  ;;  %v884_v36 = vld [vmem:[%s6757_s5 + $0x18] sm:$0xff]  ;;  %v1526_v33 = vld [vmem:[%s6759_s7 + $0x10] sm:$0xff] }
 0x29b   : > { %1247 = vperm.xlu1 %4109, %v881_v4   ;;  %v3784_v11 = vpack.c.bf16 %v1199_v47, %v1197_v9  ;;  %v876_v5 = vld [vmem:[%s6756_s4 + $0x38] sm:$0xff]  ;;  %v875_v59 = vld [vmem:[%s6756_s4 + $0x30] sm:$0xff] }
 0x29c   : > { %1252 = vperm.xlu0 %4108, %v882_v54   ;;  %3795 = vmatprep.subr.bf16.mxu0 %v3794_v38  ;;  %v6865_v38 = vmov 0.0  }
 0x29d   : > { %v5267_v25 = vpop.permute.xlu1 %1624  ;;  %3781 = vmatpush1.bf16.msra.mxu1 %v3780_v6  ;;  %3797 = vmatpush1.bf16.msra.mxu0 %v3796_v3 }
 0x29e   : > { %3783 = vmatprep.subr.bf16.mxu1 %v3782_v44  ;;  %v5272_v55 = vpop.permute.xlu0 %1626 }
 0x29f   : > { %1257 = vperm.xlu1 %4109, %v883_v10  }
 0x2a0   : > { %1262 = vperm.xlu0 %4108, %v884_v36  }
 0x2a1   : > { %v5277_v16 = vpop.permute.xlu1 %1668  ;;  %3785 = vmatpush1.bf16.msra.mxu1 %v3784_v11 }
 0x2a2   : > { %v5285_v0 = vpop.permute.xlu0 %1670 }
 0x2a3   : > { %1890 = vperm.xlu1 %4109, %v1524_v62   ;;  %v1600_v62 = vsel %vm423_vm0, %v5096_v60, %v5251_v17 }
 0x2a4   : > { %1895 = vperm.xlu0 %4108, %v1525_v49   ;;  %1343 = vmatmul.mubr.f32.vlgmr.msra.gmra.mrb[0].mxu1 %v869_v48  ;;  %v1601_v49 = vsel %vm423_vm0, %v5153_v7, %v5260_v8  ;;  %v1617_v37 = vmul.f32 %v1600_v62, %v4466_v21  ;;  %v1644_v62 = vsel %vm446_vm2, %v5121_v14, %v5267_v25 }
 0x2a5   : > { %v5293_v53 = vpop.permute.xlu1 %1716  ;;  %1348 = vmatprep.mubr.f32.mxu1 %v873_v32  ;;  %v1612_v32 = vsel %vm423_vm0, %v5251_v17, %v5096_v60  ;;  %v1619_v60 = vmul.f32 %v1601_v49, %v4466_v21 }
 0x2a6   : > { %v5301_v22 = vpop.permute.xlu0 %1718 }
 0x2a7   : > { %1900 = vperm.xlu1 %4109, %v1526_v33   ;;  %v1613_v33 = vsel %vm423_vm0, %v5260_v8, %v5153_v7  ;;  %v1616_v8 = vmul.f32 %v1612_v32, %v4472_v23  ;;  %v1656_v32 = vsel %vm446_vm2, %v5267_v25, %v5121_v14  ;;  %v1661_v14 = vmul.f32 %v1644_v62, %v4492_v41 }
 0x2a8   : > { %1905 = vperm.xlu0 %4108, %v1527_v1   ;;  %1349 = vmatmul.mubr.f32.gmra.mrb[2].mxu1 %v872_v18  ;;  %v1689_v62 = vsel %vm469_vm3, %v5209_v13, %v5285_v0 }
 0x2a9   : > { %v5306_v27 = vpop.permute.xlu1 %1760  ;;  %1354 = vmatprep.mubr.f32.mxu1 %v876_v5 }
 0x2aa   : > { %v5311_v4 = vpop.permute.xlu0 %1762 }
 0x2ac   : > { %1355 = vmatmul.mubr.f32.gmra.mrb[4].mxu1 %v875_v59 }
 0x2ad   : > { %v1553_v54 = vpop.permute.xlu1 %1552  ;;  %1360 = vmatprep.mubr.f32.mxu1 %v879_v31 }
 0x2ae   : > { %v5319_v29 = vpop.permute.xlu0 %1722 }
 0x2b0   : > { %1361 = vmatmul.mubr.f32.gmra.mrb[6].mxu1 %v878_v20 }
 0x2b1   : > { %v1597_v3 = vpop.permute.xlu1 %1596  ;;  %1431 = vmatprep.mubr.f32.mxu1 %v6865_v38 }
 0x2b2   : > { %v1555_v47 = vpop.permute.xlu0 %1554 }
 0x2b5   : > { %v1641_v6 = vpop.permute.xlu1 %1640 }
 0x2b6   : > { %v1599_v44 = vpop.permute.xlu0 %1598 }
 0x2b9   : > { %v5322_v10 = vpop.permute.xlu1 %1684 }
 0x2ba   : > { %v5324_v9 = vpop.permute.xlu0 %1642 }
 0x2bd   : > { %v5326_v36 = vpop.permute.xlu1 %1720 }
 0x2be   : > { %v5328_v11 = vpop.permute.xlu0 %1686 }
 0x2c1   : > { %v1537_v48 = vpop.permute.xlu1 %1536 }
 0x2c2   : > { %v1558_v1 = vsel %vm400_vm1, %v1553_v54, %v1537_v48  ;;  %v1570_v18 = vsel %vm400_vm1, %v1537_v48, %v1553_v54  ;;  %v1539_v5 = vpop.permute.xlu0 %1538  ;;  %v1618_v54 = vmul.f32 %v1613_v33, %v4472_v23 }
 0x2c3   : > { %v1576_v59 = vmul.f32 %v1570_v18, %v6863_v2  ;;  %v1577_v31 = vmul.f32 %v1558_v1, %v6864_v58  ;;  %v1559_v20 = vsel %vm400_vm1, %v1555_v47, %v1539_v5  ;;  %v1571_v38 = vsel %vm400_vm1, %v1539_v5, %v1555_v47 }
 0x2c4   : > { %v1578_v17 = vmul.f32 %v1571_v38, %v6863_v2  ;;  %v1579_v7 = vmul.f32 %v1559_v20, %v6864_v58  ;;  %v3802_v47 = vpack.c.bf16 %v1619_v60, %v1617_v37  ;;  %v3804_v5 = vpack.c.bf16 %v1618_v54, %v1616_v8 }
 0x2c5   : > { %v5354_v48 = vpop.permute.xlu1 %1764  ;;  %v1645_v38 = vsel %vm446_vm2, %v5180_v24, %v5272_v55 }
 0x2c6   : > { %v3800_v18 = vpack.c.bf16 %v1578_v17, %v1576_v59  ;;  %v5356_v1 = vpop.permute.xlu0 %1766  ;;  %v3798_v39 = vpack.c.bf16 %v1579_v7, %v1577_v31  ;;  %v1663_v25 = vmul.f32 %v1645_v38, %v4492_v41 }
 0x2c8   : > { %3799 = vmatprep.subr.bf16.mxu0 %v3798_v39  ;;  %v1657_v39 = vsel %vm446_vm2, %v5272_v55, %v5180_v24  ;;  %v3810_v38 = vpack.c.bf16 %v1663_v25, %v1661_v14 }
 0x2c9   : > { %v1585_v49 = vpop.permute.xlu1 %1584  ;;  %3801 = vmatpush1.bf16.msra.mxu0 %v3800_v18  ;;  %v1662_v8 = vmul.f32 %v1657_v39, %v4489_v40 }
 0x2ca   : > { %v1602_v37 = vsel %vm423_vm0, %v1597_v3, %v1585_v49  ;;  %v1614_v33 = vsel %vm423_vm0, %v1585_v49, %v1597_v3  ;;  %3803 = vmatprep.subr.bf16.mxu0 %v3802_v47  ;;  %v1587_v59 = vpop.permute.xlu0 %1586  ;;  %v1660_v3 = vmul.f32 %v1656_v32, %v4489_v40 }
 0x2cb   : > { %v1620_v31 = vmul.f32 %v1614_v33, %v4472_v23  ;;  %v1621_v20 = vmul.f32 %v1602_v37, %v4466_v21  ;;  %v1603_v60 = vsel %vm423_vm0, %v1599_v44, %v1587_v59  ;;  %v1615_v17 = vsel %vm423_vm0, %v1587_v59, %v1599_v44 }
 0x2cc   : > { %v1622_v24 = vmul.f32 %v1615_v17, %v4472_v23  ;;  %v1623_v55 = vmul.f32 %v1603_v60, %v4466_v21  ;;  %v1688_v44 = vsel %vm469_vm3, %v5147_v46, %v5277_v16  ;;  %v3812_v39 = vpack.c.bf16 %v1662_v8, %v1660_v3 }
 0x2cd   : > { %v1629_v7 = vpop.permute.xlu1 %1628  ;;  %3805 = vmatpush1.bf16.msra.mxu0 %v3804_v5  ;;  %v1700_v37 = vsel %vm469_vm3, %v5277_v16, %v5147_v46  ;;  %v1705_v33 = vmul.f32 %v1688_v44, %v4498_v43 }
 0x2ce   : > { %v3808_v54 = vpack.c.bf16 %v1622_v24, %v1620_v31  ;;  %v5382_v18 = vpop.permute.xlu0 %1802  ;;  %v3806_v47 = vpack.c.bf16 %v1623_v55, %v1621_v20  ;;  %v1646_v5 = vsel %vm446_vm2, %v1641_v6, %v1629_v7  ;;  %v1658_v49 = vsel %vm446_vm2, %v1629_v7, %v1641_v6 }
 0x2cf   : > { %v1701_v31 = vsel %vm469_vm3, %v5285_v0, %v5209_v13  ;;  %v1707_v20 = vmul.f32 %v1689_v62, %v4498_v43  ;;  %v1664_v17 = vmul.f32 %v1658_v49, %v4489_v40  ;;  %v1665_v46 = vmul.f32 %v1646_v5, %v4492_v41 }
 0x2d0   : > { %3807 = vmatprep.subr.bf16.mxu0 %v3806_v47  ;;  %v1704_v55 = vmul.f32 %v1700_v37, %v4495_v42  ;;  %v1706_v7 = vmul.f32 %v1701_v31, %v4495_v42  ;;  %v3826_v31 = vpack.c.bf16 %v6858_v57, %v6850_v45  ;;  %v3830_v57 = vpack.c.bf16 %v4916_v26, %v4874_v34 }
 0x2d1   : > { %v1673_v32 = vpop.permute.xlu1 %1672  ;;  %3809 = vmatpush1.bf16.msra.mxu0 %v3808_v54  ;;  %v1773_v34 = vsel %vm514_vm5, %v5306_v27, %v5311_v4  ;;  %v1789_v26 = vsel %vm514_vm5, %v5311_v4, %v5306_v27  ;;  %v1788_v27 = vsel %vm514_vm5, %v5098_v19, %v5202_v28 }
 0x2d2   : > { %3811 = vmatprep.subr.bf16.mxu0 %v3810_v38  ;;  %v1631_v59 = vpop.permute.xlu0 %1630  ;;  %v1690_v3 = vsel %vm469_vm3, %v5322_v10, %v1673_v32  ;;  %v1702_v8 = vsel %vm469_vm3, %v1673_v32, %v5322_v10  ;;  %v3820_v44 = vpack.c.bf16 %v1706_v7, %v1704_v55  ;;  %v1794_v7 = vmul.f32 %v1773_v34, %v6853_v35 }
 0x2d3   : > { %v1647_v6 = vsel %vm446_vm2, %v5324_v9, %v1631_v59  ;;  %v1659_v60 = vsel %vm446_vm2, %v1631_v59, %v5324_v9  ;;  %v3818_v9 = vpack.c.bf16 %v1707_v20, %v1705_v33  ;;  %v1708_v5 = vmul.f32 %v1702_v8, %v4495_v42 }
 0x2d4   : > { %v1666_v16 = vmul.f32 %v1659_v60, %v4489_v40  ;;  %v1667_v14 = vmul.f32 %v1647_v6, %v4492_v41  ;;  %v1709_v49 = vmul.f32 %v1690_v3, %v4498_v43  ;;  %v1744_v60 = vsel %vm491_vm4, %v5085_v30, %v5171_v15 }
 0x2d5   : > { %v5408_v25 = vpop.permute.xlu1 %1724  ;;  %3813 = vmatpush1.bf16.msra.mxu0 %v3812_v39 }
 0x2d6   : > { %v3816_v13 = vpack.c.bf16 %v1666_v16, %v1664_v17  ;;  %v5410_v0 = vpop.permute.xlu0 %1806  ;;  %v3814_v24 = vpack.c.bf16 %v1667_v14, %v1665_v46  ;;  %v1729_v17 = vsel %vm491_vm4, %v5293_v53, %v5301_v22  ;;  %v3828_v46 = vpack.c.bf16 %v4768_v61, %v4752_v50 }
 0x2d7   : > { %v1728_v16 = vsel %vm491_vm4, %v5171_v15, %v5085_v30  ;;  %v3832_v50 = vpack.c.bf16 %v4885_v63, %v4869_v56  ;;  %v1730_v15 = vsel %vm491_vm4, %v5326_v36, %v5319_v29  ;;  %v1772_v63 = vsel %vm514_vm5, %v5202_v28, %v5098_v19 }
 0x2d8   : > { %3815 = vmatprep.subr.bf16.mxu0 %v3814_v24  ;;  %v1750_v24 = vmul.f32 %v1729_v17, %v4508_v51  ;;  %v1748_v61 = vmul.f32 %v1728_v16, %v4508_v51  ;;  %v1752_v3 = vmul.f32 %v1730_v15, %v4508_v51  ;;  %v1792_v28 = vmul.f32 %v1772_v63, %v6853_v35  ;;  %v6869_v63 = vld [vmem:[#allocation6_spill] sm:$0xff] }
 0x2d9   : > { %v5418_v54 = vpop.permute.xlu1 %1768  ;;  %3817 = vmatpush1.bf16.msra.mxu0 %v3816_v13  ;;  %v1749_v13 = vmul.f32 %v1744_v60, %v4511_v52 }
 0x2da   : > { %3819 = vmatprep.subr.bf16.mxu0 %v3818_v9  ;;  %v1675_v47 = vpop.permute.xlu0 %1674  ;;  %v3836_v4 = vpack.c.bf16 %v1750_v24, %v1748_v61  ;;  %v1795_v9 = vmul.f32 %v1789_v26, %v6849_v12 }
 0x2db   : > { %v1691_v62 = vsel %vm469_vm3, %v5328_v11, %v1675_v47  ;;  %v1703_v38 = vsel %vm469_vm3, %v1675_v47, %v5328_v11  ;;  %v1745_v11 = vsel %vm491_vm4, %v5301_v22, %v5293_v53  ;;  %v1746_v22 = vsel %vm491_vm4, %v5319_v29, %v5326_v36 }
 0x2dc   : > { %v1710_v39 = vmul.f32 %v1703_v38, %v4495_v42  ;;  %v1711_v10 = vmul.f32 %v1691_v62, %v4498_v43  ;;  %v1751_v45 = vmul.f32 %v1745_v11, %v4511_v52  ;;  %v1753_v8 = vmul.f32 %v1746_v22, %v4511_v52 }
 0x2dd   : > { %v5428_v32 = vpop.permute.xlu1 %1800  ;;  %3821 = vmatpush1.bf16.msra.mxu0 %v3820_v44  ;;  %v1774_v44 = vsel %vm514_vm5, %v5354_v48, %v5356_v1  ;;  %v1793_v38 = vmul.f32 %v1788_v27, %v6849_v12 }
 0x2de   : > { %v3824_v37 = vpack.c.bf16 %v1710_v39, %v1708_v5  ;;  %v5430_v33 = vpop.permute.xlu0 %1810  ;;  %v3822_v59 = vpack.c.bf16 %v1711_v10, %v1709_v49  ;;  %v3834_v30 = vpack.c.bf16 %v1751_v45, %v1749_v13  ;;  %v1832_v17 = vsel %vm537_vm6, %v5382_v18, %v5428_v32 }
 0x2df   : > { %v3842_v11 = vpack.c.bf16 %v1795_v9, %v1793_v38 }
 0x2e0   : > { %3823 = vmatprep.subr.bf16.mxu0 %v3822_v59  ;;  %v3844_v59 = vpack.c.bf16 %v1794_v7, %v1792_v28 }
 0x2e1   : > { %v1805_v20 = vpop.permute.xlu1 %1804  ;;  %3825 = vmatpush1.bf16.msra.mxu0 %v3824_v37 }
 0x2e2   : > { %3827 = vmatprep.subr.bf16.mxu0 %v3826_v31  ;;  %v1204_v6 = vpop.permute.xlu0 %1203  ;;  %v1796_v31 = vmul.f32 %v1774_v44, %v6853_v35 }
 0x2e5   : > { %v5451_v14 = vpop.permute.xlu1 %1808  ;;  %3829 = vmatpush1.bf16.msra.mxu0 %v3828_v46 }
 0x2e6   : > { %3831 = vmatprep.subr.bf16.mxu0 %v3830_v57  ;;  %v1208_v53 = vpop.permute.xlu0 %1207  ;;  %v6867_v57 = vld [vmem:[#allocation8_spill] sm:$0xff]  ;;  %v1834_v28 = vsel %vm537_vm6, %v5430_v33, %v5451_v14 }
 0x2e9   : > { %v5470_v56 = vpop.permute.xlu1 %1812  ;;  %3833 = vmatpush1.bf16.msra.mxu0 %v3832_v50 }
 0x2ea   : > { %3835 = vmatprep.subr.bf16.mxu0 %v3834_v30  ;;  %v1727_v55 = vpop.permute.xlu0 %1726  ;;  %v6868_v30 = vld [vmem:[#allocation7_spill] sm:$0xff] }
 0x2eb   : > { %v1731_v29 = vsel %vm491_vm4, %v5408_v25, %v1727_v55  ;;  %v1747_v36 = vsel %vm491_vm4, %v1727_v55, %v5408_v25  ;;  %v1790_v25 = vsel %vm514_vm5, %v5356_v1, %v5354_v48  ;;  %v1817_v48 = vsel %vm537_vm6, %v1805_v20, %v5410_v0 }
 0x2ec   : > { %v1754_v47 = vmul.f32 %v1731_v29, %v4508_v51  ;;  %v1755_v19 = vmul.f32 %v1747_v36, %v4511_v52  ;;  %v1797_v60 = vmul.f32 %v1790_v25, %v6849_v12  ;;  %v1833_v1 = vsel %vm537_vm6, %v5410_v0, %v1805_v20 }
 0x2ed   : > { %v1202_v62 = vpop.permute.xlu1 %1201  ;;  %3837 = vmatpush1.bf16.msra.mxu0 %v3836_v4  ;;  %v1816_v20 = vsel %vm537_vm6, %v5428_v32, %v5382_v18  ;;  %v1839_v15 = vmul.f32 %v1833_v1, %v6868_v30  ;;  %v1838_v27 = vmul.f32 %v1817_v48, %v6869_v63  ;;  %v1837_v9 = vmul.f32 %v1832_v17, %v6868_v30 }
 0x2ee   : > { %v3840_v5 = vpack.c.bf16 %v1754_v47, %v1752_v3  ;;  %v1212_v49 = vpop.permute.xlu0 %1211  ;;  %v3838_v39 = vpack.c.bf16 %v1755_v19, %v1753_v8  ;;  %v1217_v10 = vsel %vm560_vm7, %v1202_v62, %v1204_v6  ;;  %v1233_v37 = vsel %vm560_vm7, %v1204_v6, %v1202_v62  ;;  %v6866_v6 = vld [vmem:[#allocation9_spill] sm:$0xff] }
 0x2ef   : > { %v1237_v45 = vmul.f32 %v1217_v10, %v6866_v6  ;;  %v1238_v16 = vmul.f32 %v1233_v37, %v6867_v57  ;;  %v1836_v3 = vmul.f32 %v1816_v20, %v6869_v63  ;;  %v3850_v8 = vpack.c.bf16 %v1839_v15, %v1837_v9 }
 0x2f0   : > { %3839 = vmatprep.subr.bf16.mxu0 %v3838_v39  ;;  %v1818_v19 = vsel %vm537_vm6, %v5451_v14, %v5430_v33 }
 0x2f1   : > { %v1206_v46 = vpop.permute.xlu1 %1205  ;;  %3841 = vmatpush1.bf16.msra.mxu0 %v3840_v5  ;;  %v3852_v47 = vpack.c.bf16 %v1838_v27, %v1836_v3  ;;  %v1840_v14 = vmul.f32 %v1818_v19, %v6869_v63  ;;  %v6870_v27 = vmov 0.0  }
 0x2f2   : > { %v1218_v13 = vsel %vm560_vm7, %v1206_v46, %v1208_v53  ;;  %v1234_v24 = vsel %vm560_vm7, %v1208_v53, %v1206_v46  ;;  %3843 = vmatprep.subr.bf16.mxu0 %v3842_v11  ;;  %v1771_v50 = vpop.permute.xlu0 %1770 }
 0x2f3   : > { %v1239_v61 = vmul.f32 %v1218_v13, %v6866_v6  ;;  %v1240_v34 = vmul.f32 %v1234_v24, %v6867_v57  ;;  %v1775_v26 = vsel %vm514_vm5, %v5418_v54, %v1771_v50  ;;  %v1791_v0 = vsel %vm514_vm5, %v1771_v50, %v5418_v54  ;;  %v1512_v50 = vld [vmem:[%s6758_s6] sm:$0xff] }
 0x2f4   : > { %v1798_v53 = vmul.f32 %v1775_v26, %v6853_v35  ;;  %v1799_v22 = vmul.f32 %v1791_v0, %v6849_v12 }
 0x2f5   : > { %v3788_v4 = vpack.c.bf16 %v1239_v61, %v1237_v45  ;;  %v1210_v55 = vpop.permute.xlu1 %1209  ;;  %3845 = vmatpush1.bf16.msra.mxu0 %v3844_v59  ;;  %v3786_v7 = vpack.c.bf16 %v1240_v34, %v1238_v16  ;;  %v1841_v59 = vmul.f32 %v1834_v28, %v6868_v30  ;;  %v1516_v34 = vld [vmem:[%s6758_s6 + $0x20] sm:$0xff]  ;;  %v1522_v28 = vld [vmem:[%s6758_s6 + $0x50] sm:$0xff] }
 0x2f6   : > { %v3848_v29 = vpack.c.bf16 %v1798_v53, %v1796_v31  ;;  %v1216_v54 = vpop.permute.xlu0 %1215  ;;  %v3846_v36 = vpack.c.bf16 %v1799_v22, %v1797_v60  ;;  %v1219_v18 = vsel %vm560_vm7, %v1210_v55, %v1212_v49  ;;  %v1235_v32 = vsel %vm560_vm7, %v1212_v49, %v1210_v55 }
 0x2f7   : > { %3787 = vmatprep.subr.bf16.mxu1 %v3786_v7  ;;  %v1241_v62 = vmul.f32 %v1219_v18, %v6866_v6  ;;  %v1242_v38 = vmul.f32 %v1235_v32, %v6867_v57  ;;  %v1515_v7 = vld [vmem:[%s6758_s6 + $0x18] sm:$0xff]  ;;  %v877_v18 = vld [vmem:[%s6756_s4 + $0x40] sm:$0xff] }
 0x2f8   : > { %3789 = vmatpush1.bf16.msra.mxu1 %v3788_v4  ;;  %3847 = vmatprep.subr.bf16.mxu0 %v3846_v36  ;;  %v874_v4 = vld [vmem:[%s6756_s4 + $0x28] sm:$0xff]  ;;  %v1519_v36 = vld [vmem:[%s6758_s6 + $0x38] sm:$0xff] }
 0x2f9   : > { %v1214_v44 = vpop.permute.xlu1 %1213  ;;  %3849 = vmatpush1.bf16.msra.mxu0 %v3848_v29 }
 0x2fa   : > { %v1220_v25 = vsel %vm560_vm7, %v1214_v44, %v1216_v54  ;;  %v1236_v5 = vsel %vm560_vm7, %v1216_v54, %v1214_v44  ;;  %3851 = vmatprep.subr.bf16.mxu0 %v3850_v8  ;;  %v1815_v49 = vpop.permute.xlu0 %1814 }
 0x2fb   : > { %v1243_v39 = vmul.f32 %v1220_v25, %v6866_v6  ;;  %v1244_v10 = vmul.f32 %v1236_v5, %v6867_v57  ;;  %v1819_v37 = vsel %vm537_vm6, %v5470_v56, %v1815_v49  ;;  %v1835_v33 = vsel %vm537_vm6, %v1815_v49, %v5470_v56  ;;  %v871_v56 = vld [vmem:[%s6756_s4 + $0x10] sm:$0xff] }
 0x2fc   : > { %v1842_v31 = vmul.f32 %v1819_v37, %v6869_v63  ;;  %v1843_v11 = vmul.f32 %v1835_v33, %v6868_v30 }
 0x2fd   : > { %v3792_v60 = vpack.c.bf16 %v1243_v39, %v1241_v62  ;;  %v1845_v17 = vpop.permute.xlu1 %1844  ;;  %3853 = vmatpush1.bf16.msra.mxu0 %v3852_v47  ;;  %v3790_v48 = vpack.c.bf16 %v1244_v10, %v1242_v38  ;;  %v1518_v47 = vld [vmem:[%s6758_s6 + $0x30] sm:$0xff]  ;;  %v880_v39 = vld [vmem:[%s6756_s4 + $0x58] sm:$0xff]  ;;  %v1521_v10 = vld [vmem:[%s6758_s6 + $0x48] sm:$0xff] }
 0x2fe   : > { %v3856_v1 = vpack.c.bf16 %v1842_v31, %v1840_v14  ;;  %v1847_v46 = vpop.permute.xlu0 %1846  ;;  %v3854_v45 = vpack.c.bf16 %v1843_v11, %v1841_v59  ;;  %v1514_v14 = vld [vmem:[%s6758_s6 + $0x10] sm:$0xff]  ;;  %v1517_v59 = vld [vmem:[%s6758_s6 + $0x28] sm:$0xff]  ;;  %v1520_v31 = vld [vmem:[%s6758_s6 + $0x40] sm:$0xff] }
 0x2ff   : > { %3791 = vmatprep.subr.bf16.mxu1 %v3790_v48  ;;  %v1860_v16 = vsel %vm560_vm7, %v1845_v17, %v1847_v46  ;;  %v1876_v13 = vsel %vm560_vm7, %v1847_v46, %v1845_v17  ;;  %v1523_v11 = vld [vmem:[%s6758_s6 + $0x58] sm:$0xff] }
 0x300   : > { %3793 = vmatpush1.bf16.msra.mxu1 %v3792_v60  ;;  %3855 = vmatprep.subr.bf16.mxu0 %v3854_v45  ;;  %v1880_v26 = vmul.f32 %v1860_v16, %v6866_v6  ;;  %v1881_v15 = vmul.f32 %v1876_v13, %v6867_v57 }
 0x301   : > { %v1849_v24 = vpop.permute.xlu1 %1848  ;;  %3857 = vmatpush1.bf16.msra.mxu0 %v3856_v1 }
 0x302   : > { %v1851_v61 = vpop.permute.xlu0 %1850 }
 0x303   : > { %v1861_v0 = vsel %vm560_vm7, %v1849_v24, %v1851_v61  ;;  %v1877_v20 = vsel %vm560_vm7, %v1851_v61, %v1849_v24  ;;  %3621 = vmatmul.mubr.msk.f32.vlgmr.msra.gmra.mrb[0].mxu1 %vm1265_vm9, %v871_v56 }
 0x304   : > { %v1882_v53 = vmul.f32 %v1861_v0, %v6866_v6  ;;  %v1883_v22 = vmul.f32 %v1877_v20, %v6867_v57  ;;  %1985 = vmatmul.mubr.f32.vlgmr.msra.gmra.mrb[16].mxu0 %v1512_v50  ;;  %1437 = vmatprep.mubr.f32.mxu1 %v6870_v27 }
 0x305   : > { %v1853_v55 = vpop.permute.xlu1 %1852  ;;  %1990 = vmatprep.mubr.f32.mxu0 %v1516_v34 }
 0x306   : > { %v3860_v9 = vpack.c.bf16 %v1882_v53, %v1880_v26  ;;  %v1855_v29 = vpop.permute.xlu0 %1854  ;;  %v3858_v54 = vpack.c.bf16 %v1883_v22, %v1881_v15 }
 0x307   : > { %3622 = vmatmul.mubr.msk.f32.gmra.mrb[2].mxu1 %vm1265_vm9, %v874_v4  ;;  %v1862_v3 = vsel %vm560_vm7, %v1853_v55, %v1855_v29  ;;  %v1878_v32 = vsel %vm560_vm7, %v1855_v29, %v1853_v55 }
 0x308   : > { %1991 = vmatmul.mubr.f32.gmra.mrb[18].mxu0 %v1515_v7  ;;  %3859 = vmatprep.subr.bf16.mxu0 %v3858_v54  ;;  %v1884_v44 = vmul.f32 %v1862_v3, %v6866_v6  ;;  %v1885_v25 = vmul.f32 %v1878_v32, %v6867_v57 }
 0x309   : > { %v1857_v8 = vpop.permute.xlu1 %1856  ;;  %3861 = vmatpush1.bf16.msra.mxu0 %v3860_v9  ;;  %1443 = vmatprep.mubr.f32.mxu1 %v6870_v27 }
 0x30a   : > { %v1859_v19 = vpop.permute.xlu0 %1858  ;;  %1996 = vmatprep.mubr.f32.mxu0 %v1519_v36 }
 0x30b   : > { %v1863_v62 = vsel %vm560_vm7, %v1857_v8, %v1859_v19  ;;  %v1879_v38 = vsel %vm560_vm7, %v1859_v19, %v1857_v8  ;;  %3623 = vmatmul.mubr.msk.f32.gmra.mrb[4].mxu1 %vm1265_vm9, %v877_v18 }
 0x30c   : > { %v1886_v5 = vmul.f32 %v1863_v62, %v6866_v6  ;;  %v1887_v49 = vmul.f32 %v1879_v38, %v6867_v57  ;;  %1997 = vmatmul.mubr.f32.gmra.mrb[20].mxu0 %v1518_v47  ;;  %1449 = vmatprep.mubr.f32.mxu1 %v6870_v27 }
 0x30d   : > { %2002 = vmatprep.mubr.f32.mxu0 %v1522_v28 }
 0x30e   : > { %v3864_v37 = vpack.c.bf16 %v1886_v5, %v1884_v44  ;;  %v3862_v33 = vpack.c.bf16 %v1887_v49, %v1885_v25 }
 0x30f   : > { %3624 = vmatmul.mubr.msk.f32.gmra.mrb[6].mxu1 %vm1265_vm9, %v880_v39 }
 0x310   : > { %2003 = vmatmul.mubr.f32.gmra.mrb[22].mxu0 %v1521_v10  ;;  %3863 = vmatprep.subr.bf16.mxu0 %v3862_v33 }
 0x311   : > { %3865 = vmatpush1.bf16.msra.mxu0 %v3864_v37  ;;  %2073 = vmatprep.mubr.f32.mxu0 %v6870_v27 }
 0x314   : > { %3633 = vmatmul.mubr.msk.f32.vlgmr.msra.gmra.mrb[16].mxu0 %vm1265_vm9, %v1514_v14 }
 0x315   : > { %2079 = vmatprep.mubr.f32.mxu0 %v6870_v27 }
 0x318   : > { %3634 = vmatmul.mubr.msk.f32.gmra.mrb[18].mxu0 %vm1265_vm9, %v1517_v59 }
 0x319   : > { %2085 = vmatprep.mubr.f32.mxu0 %v6870_v27 }
 0x31a   : > { %v1248_v60 = vpop.permute.xlu1 %1247 }
 0x31b   : > { %v1253_v16 = vpop.permute.xlu0 %1252 }
 0x31c   : > { %3635 = vmatmul.mubr.msk.f32.gmra.mrb[20].mxu0 %vm1265_vm9, %v1520_v31 }
 0x31d   : > { %2091 = vmatprep.mubr.f32.mxu0 %v6870_v27 }
 0x31e   : > { %v1258_v10 = vpop.permute.xlu1 %1257 }
 0x320   : > { %3636 = vmatmul.mubr.msk.f32.gmra.mrb[22].mxu0 %vm1265_vm9, %v1523_v11 }
 0x3d6   : > { %v1433_v17 = vpop.f32.mrb[0].mxu1 }
 0x3d7   : > { %v4026_v48 = vadd.f32 %v1433_v17, %v1248_v60  ;;  %v1435_v1 = vpop.f32.mrb[1].mxu1 }
 0x3d8   : > { %v4027_v46 = vadd.f32 %v1435_v1, %v1248_v60  ;;  %v1263_v60 = vpop.permute.xlu0 %1262 }
 0x3d9   : > { %v3625_v45 = vmul.f32 -1.442695, %v4026_v48 }
 0x3da   : > { %v3626_v56 = vmul.f32 -1.442695, %v4027_v46  ;;  %v1439_v13 = vpop.f32.mrb[2].mxu1 }
 0x3db   : > { %4174 = vpow2.f32 %v3625_v45  ;;  %v4028_v24 = vadd.f32 %v1439_v13, %v1253_v16  ;;  %v1441_v50 = vpop.f32.mrb[3].mxu1 }
 0x3dc   : > { %4176 = vpow2.f32 %v3626_v56  ;;  %v4029_v9 = vadd.f32 %v1441_v50, %v1253_v16 }
 0x3dd   : > { %v3627_v61 = vmul.f32 -1.442695, %v4028_v24 }
 0x3de   : > { %v1445_v34 = vpop.f32.mrb[4].mxu1  ;;  %v3628_v3 = vmul.f32 -1.442695, %v4029_v9 }
 0x3df   : > { %v1447_v26 = vpop.f32.mrb[5].mxu1  ;;  %4178 = vpow2.f32 %v3627_v61  ;;  %v4030_v37 = vadd.f32 %v1445_v34, %v1258_v10 }
 0x3e0   : > { %v4031_v33 = vadd.f32 %v1447_v26, %v1258_v10 }
 0x3e1   : > { %v3629_v14 = vmul.f32 -1.442695, %v4030_v37 }
 0x3e2   : > { %v1451_v0 = vpop.f32.mrb[6].mxu1  ;;  %v3630_v59 = vmul.f32 -1.442695, %v4031_v33 }
 0x3e3   : > { %v5624_v20 = vpop.f32.mrb[7].mxu1  ;;  %v4032_v17 = vadd.f32 %v1451_v0, %v1263_v60 }
 0x3e4   : > { %v4033_v56 = vadd.f32 %v5624_v20, %v1263_v60 }
 0x3e5   : > { %v4175_v15 = vpop.eup %4174 }
 0x3e6   : > { %v4177_v53 = vpop.eup %4176  ;;  %v1480_v22 = vadd.f32 1.0, %v4175_v15 }
 0x3e7   : > { %v1481_v4 = vadd.f32 1.0, %v4177_v53  ;;  %v5626_v55 = vpop.f32.mrb[16].mxu0 }
 0x3e8   : > { %4180 = vrcp.f32 %v1480_v22  ;;  %v5628_v7 = vpop.f32.mrb[17].mxu0 }
 0x3e9   : > { %4182 = vrcp.f32 %v1481_v4  ;;  %v4179_v54 = vpop.eup %4178  ;;  %v1891_v4 = vpop.permute.xlu1 %1890 }
 0x3ea   : > { %v1482_v18 = vadd.f32 1.0, %v4179_v54  ;;  %4184 = vpow2.f32 %v3628_v3  ;;  %v4035_v54 = vadd.f32 %v5628_v7, %v1891_v4 }
 0x3eb   : > { %v5630_v29 = vpop.f32.mrb[18].mxu0 }
 0x3ec   : > { %v5632_v36 = vpop.f32.mrb[19].mxu0  ;;  %4186 = vrcp.f32 %v1482_v18  ;;  %v3638_v18 = vmul.f32 -1.442695, %v4035_v54 }
 0x3ed   : > { %v1901_v60 = vpop.permute.xlu1 %1900 }
 0x3ef   : > { %v5634_v32 = vpop.f32.mrb[20].mxu0 }
 0x3f0   : > { %v5636_v8 = vpop.f32.mrb[21].mxu0 }
 0x3f2   : > { %v4181_v47 = vpop.eup %4180 }
 0x3f3   : > { %v4183_v19 = vpop.eup %4182  ;;  %v5638_v28 = vmul.f32 %v4181_v47, %v4026_v48  ;;  %v5640_v44 = vpop.f32.mrb[22].mxu0  ;;  %v3631_v48 = vmul.f32 -1.442695, %v4032_v17 }
 0x3f4   : > { %v5642_v62 = vmul.f32 %v4183_v19, %v4027_v46  ;;  %v5644_v38 = vpop.f32.mrb[23].mxu0  ;;  %v4185_v25 = vpop.eup %4184 }
 0x3f5   : > { %2192 = vrot.lane.b32.xlu1 %v5638_v28, %s4311_s20  ;;  %v1483_v49 = vadd.f32 1.0, %v4185_v25  ;;  %v1896_v19 = vpop.permute.xlu0 %1895 }
 0x3f6   : > { %2358 = vrot.lane.b32.xlu0 %v5642_v62, %s4314_s23  ;;  %v4187_v5 = vpop.eup %4186 }
 0x3f7   : > { %v5658_v39 = vmul.f32 %v4187_v5, %v4028_v24  ;;  %4188 = vrcp.f32 %v1483_v49  ;;  %v3632_v24 = vmul.f32 -1.442695, %v4033_v56 }
 0x3f8   : > { %4190 = vpow2.f32 %v3629_v14 }
 0x3f9   : > { %2236 = vrot.lane.b32.xlu1 %v5638_v28, %s4310_s19  ;;  %4192 = vpow2.f32 %v3630_v59 }
 0x3fa   : > { %2402 = vrot.lane.b32.xlu0 %v5642_v62, %s4315_s24  ;;  %4194 = vpow2.f32 %v3631_v48  ;;  %v1906_v48 = vpop.permute.xlu0 %1905 }
 0x3fd   : > { %2280 = vrot.lane.b32.xlu1 %v5638_v28, %s4312_s21 }
 0x3fe   : > { %2446 = vrot.lane.b32.xlu0 %v5642_v62, %s4317_s25 }
 0x401   : > { %2324 = vrot.lane.b32.xlu1 %v5638_v28, %s4313_s22  ;;  %v4189_v31 = vpop.eup %4188 }
 0x402   : > { %2194 = vrot.lane.b32.xlu0 %v5658_v39, %s4311_s20  ;;  %v5676_v11 = vmul.f32 %v4189_v31, %v4029_v9  ;;  %v4191_v1 = vpop.eup %4190  ;;  %v4034_v9 = vadd.f32 %v5626_v55, %v1891_v4  ;;  %v4036_v55 = vadd.f32 %v5630_v29, %v1896_v19 }
 0x403   : > { %v4193_v46 = vpop.eup %4192  ;;  %v1484_v45 = vadd.f32 1.0, %v4191_v1 }
 0x404   : > { %v1485_v16 = vadd.f32 1.0, %v4193_v46  ;;  %v4195_v13 = vpop.eup %4194  ;;  %v3637_v3 = vmul.f32 -1.442695, %v4034_v9  ;;  %v3639_v25 = vmul.f32 -1.442695, %v4036_v55 }
 0x405   : > { %2356 = vrot.lane.b32.xlu1 %v5638_v28, %s4314_s23  ;;  %4196 = vrcp.f32 %v1484_v45  ;;  %v1486_v50 = vadd.f32 1.0, %v4195_v13 }
 0x406   : > { %2238 = vrot.lane.b32.xlu0 %v5658_v39, %s4310_s19  ;;  %4198 = vrcp.f32 %v1485_v16 }
 0x407   : > { %4200 = vpow2.f32 %v3632_v24 }
 0x408   : > { %4202 = vrcp.f32 %v1486_v50 }
 0x409   : > { %2400 = vrot.lane.b32.xlu1 %v5638_v28, %s4315_s24 }
 0x40a   : > { %2282 = vrot.lane.b32.xlu0 %v5658_v39, %s4312_s21 }
 0x40d   : > { %2444 = vrot.lane.b32.xlu1 %v5638_v28, %s4317_s25 }
 0x40e   : > { %2326 = vrot.lane.b32.xlu0 %v5658_v39, %s4313_s22 }
 0x40f   : > { %v4197_v61 = vpop.eup %4196 }
 0x410   : > { %v4199_v34 = vpop.eup %4198  ;;  %v5707_v26 = vmul.f32 %v4197_v61, %v4030_v37  ;;  %v4037_v37 = vadd.f32 %v5632_v36, %v1896_v19 }
 0x411   : > { %2176 = vrot.lane.b32.xlu1 %v5642_v62, %s4311_s20  ;;  %v5709_v0 = vmul.f32 %v4199_v34, %v4031_v33  ;;  %v4201_v20 = vpop.eup %4200  ;;  %v5796_v34 = vadd.f32 %v5634_v32, %v1901_v60 }
 0x412   : > { %2178 = vrot.lane.b32.xlu0 %v5676_v11, %s4311_s20  ;;  %v4203_v15 = vpop.eup %4202  ;;  %v1487_v53 = vadd.f32 1.0, %v4201_v20  ;;  %v3640_v14 = vmul.f32 -1.442695, %v4037_v37  ;;  %v5801_v20 = vadd.f32 %v5636_v8, %v1901_v60 }
 0x413   : > { %v5723_v22 = vmul.f32 %v4203_v15, %v4032_v17  ;;  %v3641_v4 = vmul.f32 -1.442695, %v5796_v34 }
 0x414   : > { %4204 = vrcp.f32 %v1487_v53  ;;  %v3642_v32 = vmul.f32 -1.442695, %v5801_v20 }
 0x415   : > { %2224 = vrot.lane.b32.xlu1 %v5642_v62, %s4310_s19  ;;  %4206 = vpow2.f32 %v3637_v3 }
 0x416   : > { %2226 = vrot.lane.b32.xlu0 %v5676_v11, %s4310_s19  ;;  %4208 = vpow2.f32 %v3638_v18 }
 0x417   : > { %4210 = vpow2.f32 %v3639_v25 }
 0x419   : > { %2268 = vrot.lane.b32.xlu1 %v5642_v62, %s4312_s21 }
 0x41a   : > { %2270 = vrot.lane.b32.xlu0 %v5676_v11, %s4312_s21 }
 0x41d   : > { %2312 = vrot.lane.b32.xlu1 %v5642_v62, %s4313_s22 }
 0x41e   : > { %2314 = vrot.lane.b32.xlu0 %v5676_v11, %s4313_s22  ;;  %v4205_v47 = vpop.eup %4204 }
 0x41f   : > { %v5744_v7 = vmul.f32 %v4205_v47, %v4033_v56  ;;  %v4207_v29 = vpop.eup %4206 }
 0x420   : > { %v4209_v5 = vpop.eup %4208  ;;  %v2122_v49 = vadd.f32 1.0, %v4207_v29 }
 0x421   : > { %2360 = vrot.lane.b32.xlu1 %v5658_v39, %s4314_s23  ;;  %v2123_v10 = vadd.f32 1.0, %v4209_v5  ;;  %v4211_v33 = vpop.eup %4210 }
 0x422   : > { %2362 = vrot.lane.b32.xlu0 %v5676_v11, %s4314_s23  ;;  %4212 = vrcp.f32 %v2122_v49  ;;  %v2124_v59 = vadd.f32 1.0, %v4211_v33 }
 0x423   : > { %4214 = vrcp.f32 %v2123_v10 }
 0x424   : > { %4216 = vpow2.f32 %v3640_v14 }
 0x425   : > { %2404 = vrot.lane.b32.xlu1 %v5658_v39, %s4315_s24  ;;  %4218 = vrcp.f32 %v2124_v59 }
 0x426   : > { %2406 = vrot.lane.b32.xlu0 %v5676_v11, %s4315_s24 }
 0x429   : > { %2448 = vrot.lane.b32.xlu1 %v5658_v39, %s4317_s25 }
 0x42a   : > { %2450 = vrot.lane.b32.xlu0 %v5676_v11, %s4317_s25 }
 0x42c   : > { %v4213_v36 = vpop.eup %4212 }
 0x42d   : > { %2196 = vrot.lane.b32.xlu1 %v5707_v26, %s4311_s20  ;;  %v4215_v31 = vpop.eup %4214  ;;  %v5775_v17 = vmul.f32 %v4213_v36, %v4034_v9  ;;  %v5814_v9 = vadd.f32 %v5640_v44, %v1906_v48 }
 0x42e   : > { %2366 = vrot.lane.b32.xlu0 %v5709_v0, %s4314_s23  ;;  %v5777_v1 = vmul.f32 %v4215_v31, %v4035_v54  ;;  %v4217_v45 = vpop.eup %4216 }
 0x42f   : > { %v4219_v56 = vpop.eup %4218  ;;  %v2125_v13 = vadd.f32 1.0, %v4217_v45  ;;  %v3643_v3 = vmul.f32 -1.442695, %v5814_v9 }
 0x430   : > { %6871 = vst [vmem:[#allocation16_spill] sm:$0xff] %v5777_v1  ;;  %v5791_v50 = vmul.f32 %v4219_v56, %v4036_v55 }
 0x431   : > { %2240 = vrot.lane.b32.xlu1 %v5707_v26, %s4310_s19  ;;  %4220 = vrcp.f32 %v2125_v13 }
 0x432   : > { %2410 = vrot.lane.b32.xlu0 %v5709_v0, %s4315_s24  ;;  %4222 = vpow2.f32 %v3641_v4 }
 0x433   : > { %4224 = vpow2.f32 %v3642_v32 }
 0x434   : > { %4226 = vpow2.f32 %v3643_v3 }
 0x435   : > { %2284 = vrot.lane.b32.xlu1 %v5707_v26, %s4312_s21 }
 0x436   : > { %2454 = vrot.lane.b32.xlu0 %v5709_v0, %s4317_s25 }
 0x439   : > { %2328 = vrot.lane.b32.xlu1 %v5707_v26, %s4313_s22 }
 0x43a   : > { %2198 = vrot.lane.b32.xlu0 %v5723_v22, %s4311_s20 }
 0x43b   : > { %v4221_v47 = vpop.eup %4220 }
 0x43c   : > { %v5835_v55 = vmul.f32 %v4221_v47, %v4037_v37  ;;  %v4223_v29 = vpop.eup %4222  ;;  %v5850_v37 = vadd.f32 %v5644_v38, %v1906_v48 }
 0x43d   : > { %2364 = vrot.lane.b32.xlu1 %v5707_v26, %s4314_s23  ;;  %v4225_v49 = vpop.eup %4224  ;;  %v2126_v33 = vadd.f32 1.0, %v4223_v29 }
 0x43e   : > { %2242 = vrot.lane.b32.xlu0 %v5723_v22, %s4310_s19  ;;  %v2127_v14 = vadd.f32 1.0, %v4225_v49  ;;  %v4227_v36 = vpop.eup %4226  ;;  %v3644_v48 = vmul.f32 -1.442695, %v5850_v37 }
 0x43f   : > { %4228 = vrcp.f32 %v2126_v33 }
 0x440   : > { %4230 = vrcp.f32 %v2127_v14 }
 0x441   : > { %2408 = vrot.lane.b32.xlu1 %v5707_v26, %s4315_s24  ;;  %4232 = vpow2.f32 %v3644_v48 }
 0x442   : > { %2286 = vrot.lane.b32.xlu0 %v5723_v22, %s4312_s21 }
 0x445   : > { %2452 = vrot.lane.b32.xlu1 %v5707_v26, %s4317_s25 }
 0x446   : > { %2330 = vrot.lane.b32.xlu0 %v5723_v22, %s4313_s22 }
 0x449   : > { %2180 = vrot.lane.b32.xlu1 %v5709_v0, %s4311_s20 }
 0x44a   : > { %2182 = vrot.lane.b32.xlu0 %v5744_v7, %s4311_s20 }
 0x44d   : > { %2228 = vrot.lane.b32.xlu1 %v5709_v0, %s4310_s19 }
 0x44e   : > { %2230 = vrot.lane.b32.xlu0 %v5744_v7, %s4310_s19 }
 0x451   : > { %2272 = vrot.lane.b32.xlu1 %v5709_v0, %s4312_s21 }
 0x452   : > { %2274 = vrot.lane.b32.xlu0 %v5744_v7, %s4312_s21 }
 0x455   : > { %2316 = vrot.lane.b32.xlu1 %v5709_v0, %s4313_s22 }
 0x456   : > { %2318 = vrot.lane.b32.xlu0 %v5744_v7, %s4313_s22 }
 0x459   : > { %2368 = vrot.lane.b32.xlu1 %v5723_v22, %s4314_s23 }
 0x45a   : > { %2370 = vrot.lane.b32.xlu0 %v5744_v7, %s4314_s23 }
 0x45d   : > { %2412 = vrot.lane.b32.xlu1 %v5723_v22, %s4315_s24 }
 0x45e   : > { %2414 = vrot.lane.b32.xlu0 %v5744_v7, %s4315_s24 }
 0x461   : > { %2456 = vrot.lane.b32.xlu1 %v5723_v22, %s4317_s25 }
 0x462   : > { %2458 = vrot.lane.b32.xlu0 %v5744_v7, %s4317_s25 }
 0x465   : > { %2836 = vrot.lane.b32.xlu1 %v5775_v17, %s4311_s20 }
 0x466   : > { %3002 = vrot.lane.b32.xlu0 %v5777_v1, %s4314_s23 }
 0x467   : > { %v2193_v46 = vpop.permute.xlu1 %2192 }
 0x468   : > { %v5783_v16 = vpop.permute.xlu0 %2358 }
 0x469   : > { %2880 = vrot.lane.b32.xlu1 %v5775_v17, %s4310_s19 }
 0x46a   : > { %3046 = vrot.lane.b32.xlu0 %v5777_v1, %s4315_s24 }
 0x46b   : > { %v5789_v24 = vpop.permute.xlu1 %2236 }
 0x46c   : > { %v5793_v61 = vpop.permute.xlu0 %2402 }
 0x46d   : > { %6872 = vst [vmem:[#allocation13_spill] sm:$0xff] %v5793_v61  ;;  %2924 = vrot.lane.b32.xlu1 %v5775_v17, %s4312_s21 }
 0x46e   : > { %2838 = vrot.lane.b32.xlu0 %v5791_v50, %s4311_s20 }
 0x46f   : > { %v5805_v15 = vpop.permute.xlu1 %2280 }
 0x470   : > { %v5807_v53 = vpop.permute.xlu0 %2446 }
 0x471   : > { %6873 = vst [vmem:[#allocation11_spill] sm:$0xff] %v5807_v53  ;;  %2968 = vrot.lane.b32.xlu1 %v5775_v17, %s4313_s22 }
 0x472   : > { %2882 = vrot.lane.b32.xlu0 %v5791_v50, %s4310_s19 }
 0x473   : > { %v5818_v8 = vpop.permute.xlu1 %2324 }
 0x474   : > { %v2195_v54 = vpop.permute.xlu0 %2194 }
 0x475   : > { %3000 = vrot.lane.b32.xlu1 %v5775_v17, %s4314_s23 }
 0x476   : > { %2926 = vrot.lane.b32.xlu0 %v5791_v50, %s4312_s21 }
 0x477   : > { %v5825_v18 = vpop.permute.xlu1 %2356 }
 0x478   : > { %v5827_v44 = vpop.permute.xlu0 %2238 }
 0x479   : > { %3044 = vrot.lane.b32.xlu1 %v5775_v17, %s4315_s24 }
 0x47a   : > { %2970 = vrot.lane.b32.xlu0 %v5791_v50, %s4313_s22 }
 0x47b   : > { %v5833_v19 = vpop.permute.xlu1 %2400 }
 0x47c   : > { %6874 = vst [vmem:[#allocation10_spill] sm:$0xff] %v5833_v19  ;;  %v5837_v25 = vpop.permute.xlu0 %2282 }
 0x47d   : > { %2820 = vrot.lane.b32.xlu1 %v5777_v1, %s4311_s20 }
 0x47e   : > { %2822 = vrot.lane.b32.xlu0 %v5835_v55, %s4311_s20 }
 0x47f   : > { %v5843_v5 = vpop.permute.xlu1 %2444 }
 0x480   : > { %6875 = vst [vmem:[#allocation17_spill] sm:$0xff] %v5843_v5  ;;  %v5845_v10 = vpop.permute.xlu0 %2326 }
 0x481   : > { %2868 = vrot.lane.b32.xlu1 %v5777_v1, %s4310_s19 }
 0x482   : > { %2870 = vrot.lane.b32.xlu0 %v5835_v55, %s4310_s19 }
 0x483   : > { %v2177_v59 = vpop.permute.xlu1 %2176 }
 0x484   : > { %v2200_v31 = vsel %vm400_vm1, %v2193_v46, %v2177_v59  ;;  %v2212_v60 = vsel %vm400_vm1, %v2177_v59, %v2193_v46  ;;  %v2179_v45 = vpop.permute.xlu0 %2178  ;;  %v2128_v46 = vadd.f32 1.0, %v4227_v36  ;;  %v4229_v36 = vpop.eup %4228 }
 0x485   : > { %v2216_v56 = vmul.f32 %v2212_v60, %v6863_v2  ;;  %v2217_v13 = vmul.f32 %v2200_v31, %v6864_v58  ;;  %v2201_v4 = vsel %vm400_vm1, %v2195_v54, %v2179_v45  ;;  %v2213_v38 = vsel %vm400_vm1, %v2179_v45, %v2195_v54  ;;  %2912 = vrot.lane.b32.xlu1 %v5777_v1, %s4312_s21  ;;  %v4231_v60 = vpop.eup %4230 }
 0x486   : > { %v2218_v32 = vmul.f32 %v2213_v38, %v6863_v2  ;;  %v2219_v3 = vmul.f32 %v2201_v4, %v6864_v58  ;;  %2914 = vrot.lane.b32.xlu0 %v5835_v55, %s4312_s21  ;;  %4234 = vrcp.f32 %v2128_v46  ;;  %v5892_v45 = vmul.f32 %v4229_v36, %v5796_v34 }
 0x487   : > { %v5867_v47 = vpop.permute.xlu1 %2224  ;;  %v5897_v4 = vmul.f32 %v4231_v60, %v5801_v20 }
 0x488   : > { %v3868_v29 = vpack.c.bf16 %v2218_v32, %v2216_v56  ;;  %v5869_v49 = vpop.permute.xlu0 %2226  ;;  %v3866_v54 = vpack.c.bf16 %v2219_v3, %v2217_v13  ;;  %v4233_v13 = vpop.eup %4232  ;;  %v2244_v53 = vsel %vm423_vm0, %v5789_v24, %v5867_v47 }
 0x489   : > { %2956 = vrot.lane.b32.xlu1 %v5777_v1, %s4313_s22  ;;  %v2129_v32 = vadd.f32 1.0, %v4233_v13 }
 0x48a   : > { %2958 = vrot.lane.b32.xlu0 %v5835_v55, %s4313_s22  ;;  %3867 = vmatprep.subr.bf16.mxu1 %v3866_v54 }
 0x48b   : > { %v5875_v33 = vpop.permute.xlu1 %2268  ;;  %3869 = vmatpush1.bf16.msra.mxu1 %v3868_v29  ;;  %4236 = vrcp.f32 %v2129_v32 }
 0x48c   : > { %v5877_v14 = vpop.permute.xlu0 %2270 }
 0x48d   : > { %3004 = vrot.lane.b32.xlu1 %v5791_v50, %s4314_s23 }
 0x48e   : > { %3006 = vrot.lane.b32.xlu0 %v5835_v55, %s4314_s23 }
 0x48f   : > { %v5883_v59 = vpop.permute.xlu1 %2312 }
 0x490   : > { %v5885_v31 = vpop.permute.xlu0 %2314  ;;  %v4235_v48 = vpop.eup %4234 }
 0x491   : > { %3048 = vrot.lane.b32.xlu1 %v5791_v50, %s4315_s24  ;;  %v5908_v34 = vmul.f32 %v4235_v48, %v5814_v9 }
 0x492   : > { %3050 = vrot.lane.b32.xlu0 %v5835_v55, %s4315_s24 }
 0x493   : > { %v5894_v56 = vpop.permute.xlu1 %2360 }
 0x494   : > { %v5899_v38 = vpop.permute.xlu0 %2362 }
 0x495   : > { %2840 = vrot.lane.b32.xlu1 %v5892_v45, %s4311_s20  ;;  %v4237_v13 = vpop.eup %4236 }
 0x496   : > { %3010 = vrot.lane.b32.xlu0 %v5897_v4, %s4314_s23  ;;  %v5939_v32 = vmul.f32 %v4237_v13, %v5850_v37 }
 0x497   : > { %v5905_v3 = vpop.permute.xlu1 %2404 }
 0x498   : > { %v5910_v46 = vpop.permute.xlu0 %2406 }
 0x499   : > { %6876 = vst [vmem:[#allocation18_spill] sm:$0xff] %v5910_v46  ;;  %2884 = vrot.lane.b32.xlu1 %v5892_v45, %s4310_s19 }
 0x49a   : > { %2842 = vrot.lane.b32.xlu0 %v5908_v34, %s4311_s20 }
 0x49b   : > { %v5916_v20 = vpop.permute.xlu1 %2448 }
 0x49c   : > { %6877 = vst [vmem:[#allocation21_spill] sm:$0xff] %v5916_v20  ;;  %v5918_v29 = vpop.permute.xlu0 %2450 }
 0x49d   : > { %6878 = vst [vmem:[#allocation19_spill] sm:$0xff] %v5918_v29  ;;  %2928 = vrot.lane.b32.xlu1 %v5892_v45, %s4312_s21  ;;  %v2257_v29 = vsel %vm423_vm0, %v5869_v49, %v5827_v44 }
 0x49e   : > { %2886 = vrot.lane.b32.xlu0 %v5908_v34, %s4310_s19 }
 0x49f   : > { %v2197_v9 = vpop.permute.xlu1 %2196 }
 0x4a0   : > { %v5924_v54 = vpop.permute.xlu0 %2366 }
 0x4a1   : > { %2972 = vrot.lane.b32.xlu1 %v5892_v45, %s4313_s22 }
 0x4a2   : > { %2930 = vrot.lane.b32.xlu0 %v5908_v34, %s4312_s21 }
 0x4a3   : > { %v2241_v36 = vpop.permute.xlu1 %2240 }
 0x4a4   : > { %v5930_v60 = vpop.permute.xlu0 %2410 }
 0x4a5   : > { %6879 = vst [vmem:[#allocation15_spill] sm:$0xff] %v5930_v60  ;;  %3008 = vrot.lane.b32.xlu1 %v5892_v45, %s4314_s23  ;;  %v2245_v60 = vsel %vm423_vm0, %v5827_v44, %v5869_v49 }
 0x4a6   : > { %2974 = vrot.lane.b32.xlu0 %v5908_v34, %s4313_s22  ;;  %v2263_v20 = vmul.f32 %v2245_v60, %v4466_v21 }
 0x4a7   : > { %v5936_v48 = vpop.permute.xlu1 %2284 }
 0x4a8   : > { %v5941_v57 = vpop.permute.xlu0 %2454 }
 0x4a9   : > { %6880 = vst [vmem:[#allocation12_spill] sm:$0xff] %v5941_v57  ;;  %2824 = vrot.lane.b32.xlu1 %v5897_v4, %s4311_s20 }
 0x4aa   : > { %2826 = vrot.lane.b32.xlu0 %v5939_v32, %s4311_s20 }
 0x4ab   : > { %v5947_v6 = vpop.permute.xlu1 %2328 }
 0x4ac   : > { %v2199_v27 = vpop.permute.xlu0 %2198 }
 0x4ad   : > { %3052 = vrot.lane.b32.xlu1 %v5892_v45, %s4315_s24 }
 0x4ae   : > { %3054 = vrot.lane.b32.xlu0 %v5897_v4, %s4315_s24 }
 0x4af   : > { %v5953_v63 = vpop.permute.xlu1 %2364 }
 0x4b0   : > { %v2243_v37 = vpop.permute.xlu0 %2242 }
 0x4b1   : > { %2872 = vrot.lane.b32.xlu1 %v5897_v4, %s4310_s19 }
 0x4b2   : > { %2874 = vrot.lane.b32.xlu0 %v5939_v32, %s4310_s19 }
 0x4b3   : > { %v5959_v13 = vpop.permute.xlu1 %2408 }
 0x4b4   : > { %6881 = vst [vmem:[#allocation14_spill] sm:$0xff] %v5959_v13  ;;  %v5961_v57 = vpop.permute.xlu0 %2286  ;;  %v2261_v13 = vmul.f32 %v2244_v53, %v4466_v21 }
 0x4b5   : > { %2916 = vrot.lane.b32.xlu1 %v5897_v4, %s4312_s21 }
 0x4b6   : > { %3090 = vrot.lane.b32.xlu0 %v5777_v1, %s4317_s25 }
 0x4b7   : > { %v5967_v30 = vpop.permute.xlu1 %2452 }
 0x4b8   : > { %6882 = vst [vmem:[#allocation22_spill] sm:$0xff] %v5967_v30  ;;  %v5972_v5 = vpop.permute.xlu0 %2330  ;;  %v2256_v30 = vsel %vm423_vm0, %v5867_v47, %v5789_v24 }
 0x4b9   : > { %2960 = vrot.lane.b32.xlu1 %v5897_v4, %s4313_s22 }
 0x4ba   : > { %2918 = vrot.lane.b32.xlu0 %v5939_v32, %s4312_s21 }
 0x4bb   : > { %v2181_v35 = vpop.permute.xlu1 %2180 }
 0x4bc   : > { %v2202_v1 = vsel %vm400_vm1, %v2197_v9, %v2181_v35  ;;  %v2214_v12 = vsel %vm400_vm1, %v2181_v35, %v2197_v9  ;;  %v2183_v61 = vpop.permute.xlu0 %2182  ;;  %v2260_v35 = vmul.f32 %v2256_v30, %v4472_v23 }
 0x4bd   : > { %v2220_v19 = vmul.f32 %v2214_v12, %v6863_v2  ;;  %v2221_v46 = vmul.f32 %v2202_v1, %v6864_v58  ;;  %v2203_v24 = vsel %vm400_vm1, %v2199_v27, %v2183_v61  ;;  %v2215_v53 = vsel %vm400_vm1, %v2183_v61, %v2199_v27  ;;  %3012 = vrot.lane.b32.xlu1 %v5908_v34, %s4314_s23 }
 0x4be   : > { %v2222_v44 = vmul.f32 %v2215_v53, %v6863_v2  ;;  %v2223_v47 = vmul.f32 %v2203_v24, %v6864_v58  ;;  %3094 = vrot.lane.b32.xlu0 %v5835_v55, %s4317_s25  ;;  %v2262_v12 = vmul.f32 %v2257_v29, %v4472_v23  ;;  %v2288_v1 = vsel %vm446_vm2, %v5805_v15, %v5875_v33 }
 0x4bf   : > { %v2229_v49 = vpop.permute.xlu1 %2228  ;;  %v2289_v24 = vsel %vm446_vm2, %v5837_v25, %v5877_v14  ;;  %v3874_v29 = vpack.c.bf16 %v2263_v20, %v2261_v13 }
 0x4c0   : > { %v3872_v27 = vpack.c.bf16 %v2222_v44, %v2220_v19  ;;  %v2246_v61 = vsel %vm423_vm0, %v2241_v36, %v2229_v49  ;;  %v2231_v9 = vpop.permute.xlu0 %2230  ;;  %v3870_v60 = vpack.c.bf16 %v2223_v47, %v2221_v46  ;;  %v2258_v53 = vsel %vm423_vm0, %v2229_v49, %v2241_v36 }
 0x4c1   : > { %v2247_v30 = vsel %vm423_vm0, %v2243_v37, %v2231_v9  ;;  %3056 = vrot.lane.b32.xlu1 %v5908_v34, %s4315_s24  ;;  %v2265_v58 = vmul.f32 %v2246_v61, %v4466_v21  ;;  %v2259_v19 = vsel %vm423_vm0, %v2231_v9, %v2243_v37  ;;  %v3876_v47 = vpack.c.bf16 %v2262_v12, %v2260_v35 }
 0x4c2   : > { %v2267_v44 = vmul.f32 %v2247_v30, %v4466_v21  ;;  %2962 = vrot.lane.b32.xlu0 %v5939_v32, %s4313_s22  ;;  %3871 = vmatprep.subr.bf16.mxu1 %v3870_v60  ;;  %v2300_v36 = vsel %vm446_vm2, %v5875_v33, %v5805_v15  ;;  %v2305_v49 = vmul.f32 %v2288_v1, %v4492_v41 }
 0x4c3   : > { %v2273_v46 = vpop.permute.xlu1 %2272  ;;  %3873 = vmatpush1.bf16.msra.mxu1 %v3872_v27  ;;  %v2301_v37 = vsel %vm446_vm2, %v5877_v14, %v5837_v25  ;;  %v2307_v13 = vmul.f32 %v2289_v24, %v4492_v41  ;;  %v2264_v61 = vmul.f32 %v2258_v53, %v4472_v23  ;;  %v2266_v9 = vmul.f32 %v2259_v19, %v4472_v23 }
 0x4c4   : > { %3875 = vmatprep.subr.bf16.mxu1 %v3874_v29  ;;  %v2275_v20 = vpop.permute.xlu0 %2274  ;;  %v3878_v15 = vpack.c.bf16 %v2267_v44, %v2265_v58  ;;  %v2290_v33 = vsel %vm446_vm2, %v5936_v48, %v2273_v46  ;;  %v2304_v14 = vmul.f32 %v2300_v36, %v4489_v40  ;;  %v2306_v12 = vmul.f32 %v2301_v37, %v4489_v40 }
 0x4c5   : > { %3088 = vrot.lane.b32.xlu1 %v5775_v17, %s4317_s25  ;;  %v2291_v35 = vsel %vm446_vm2, %v5961_v57, %v2275_v20  ;;  %v2332_v27 = vsel %vm469_vm3, %v5818_v8, %v5883_v59  ;;  %v2333_v58 = vsel %vm469_vm3, %v5845_v10, %v5885_v31  ;;  %v3880_v60 = vpack.c.bf16 %v2266_v9, %v2264_v61 }
 0x4c6   : > { %3098 = vrot.lane.b32.xlu0 %v5897_v4, %s4317_s25  ;;  %v3882_v24 = vpack.c.bf16 %v2307_v13, %v2305_v49  ;;  %v2302_v53 = vsel %vm446_vm2, %v2273_v46, %v5936_v48  ;;  %v2309_v30 = vmul.f32 %v2290_v33, %v4492_v41  ;;  %v2303_v29 = vsel %vm446_vm2, %v2275_v20, %v5961_v57  ;;  %v3646_v20 = vld [vmem:[%s6756_s4 + $0x68] sm:$0xff] }
 0x4c7   : > { %v2317_v25 = vpop.permute.xlu1 %2316  ;;  %3877 = vmatpush1.bf16.msra.mxu1 %v3876_v47  ;;  %v2311_v19 = vmul.f32 %v2291_v35, %v4492_v41  ;;  %v3884_v47 = vpack.c.bf16 %v2306_v12, %v2304_v14  ;;  %v2349_v49 = vmul.f32 %v2332_v27, %v4498_v43  ;;  %v2351_v48 = vmul.f32 %v2333_v58, %v4498_v43 }
 0x4c8   : > { %3879 = vmatprep.subr.bf16.mxu1 %v3878_v15  ;;  %v2319_v1 = vpop.permute.xlu0 %2318  ;;  %v2308_v46 = vmul.f32 %v2302_v53, %v4489_v40  ;;  %v2310_v57 = vmul.f32 %v2303_v29, %v4489_v40  ;;  %v2344_v37 = vsel %vm469_vm3, %v5883_v59, %v5818_v8  ;;  %v2345_v13 = vsel %vm469_vm3, %v5885_v31, %v5845_v10 }
 0x4c9   : > { %3092 = vrot.lane.b32.xlu1 %v5791_v50, %s4317_s25  ;;  %v3886_v61 = vpack.c.bf16 %v2311_v19, %v2309_v30  ;;  %2628 = vmatprep.mubr.f32.mxu1 %v3646_v20  ;;  %v2334_v9 = vsel %vm469_vm3, %v5947_v6, %v2317_v25  ;;  %v2335_v15 = vsel %vm469_vm3, %v5972_v5, %v2319_v1 }
 0x4ca   : > { %2490 = vrot.lane.b32.xlu0 %v5642_v62, %s4318_s26  ;;  %v2348_v59 = vmul.f32 %v2344_v37, %v4495_v42  ;;  %v2350_v10 = vmul.f32 %v2345_v13, %v4495_v42  ;;  %v3888_v31 = vpack.c.bf16 %v2310_v57, %v2308_v46  ;;  %v3890_v35 = vpack.c.bf16 %v2351_v48, %v2349_v49  ;;  %v3674_v37 = vld [vmem:[%s6758_s6 + $0x68] sm:$0xff] }
 0x4cb   : > { %v6055_v44 = vpop.permute.xlu1 %2368  ;;  %3881 = vmatpush1.bf16.msra.mxu1 %v3880_v60  ;;  %v2346_v14 = vsel %vm469_vm3, %v2317_v25, %v5947_v6  ;;  %v2353_v12 = vmul.f32 %v2334_v9, %v4498_v43  ;;  %v2347_v27 = vsel %vm469_vm3, %v2319_v1, %v5972_v5  ;;  %v2355_v58 = vmul.f32 %v2335_v15, %v4498_v43 }
 0x4cc   : > { %3883 = vmatprep.subr.bf16.mxu1 %v3882_v24  ;;  %v6057_v36 = vpop.permute.xlu0 %2370  ;;  %v3892_v53 = vpack.c.bf16 %v2350_v10, %v2348_v59  ;;  %v2352_v30 = vmul.f32 %v2346_v14, %v4495_v42  ;;  %v2354_v6 = vmul.f32 %v2347_v27, %v4495_v42  ;;  %v3898_v19 = vpack.c.bf16 %v5676_v11, %v5642_v62  ;;  %v6883_v59 = vld [vmem:[#allocation18_spill] sm:$0xff] }
 0x4cd   : > { %3096 = vrot.lane.b32.xlu1 %v5892_v45, %s4317_s25  ;;  %v3894_v5 = vpack.c.bf16 %v2355_v58, %v2353_v12  ;;  %v2388_v46 = vsel %vm491_vm4, %v5783_v16, %v5825_v18  ;;  %v3900_v62 = vpack.c.bf16 %v5658_v39, %v5638_v28  ;;  %v3902_v20 = vpack.c.bf16 %v5744_v7, %v5709_v0 }
 0x4ce   : > { %2494 = vrot.lane.b32.xlu0 %v5676_v11, %s4318_s26  ;;  %v3896_v29 = vpack.c.bf16 %v2354_v6, %v2352_v30  ;;  %v2373_v11 = vsel %vm491_vm4, %v5894_v56, %v5899_v38  ;;  %3272 = vmatprep.mubr.f32.mxu0 %v3674_v37  ;;  %v2390_v13 = vsel %vm491_vm4, %v5924_v54, %v5953_v63  ;;  %v6890_v37 = vld [vmem:[#allocation4_spill] sm:$0xff] }
 0x4cf   : > { %v6080_v33 = vpop.permute.xlu1 %2412  ;;  %3885 = vmatpush1.bf16.msra.mxu1 %v3884_v47  ;;  %v2389_v47 = vsel %vm491_vm4, %v5899_v38, %v5894_v56  ;;  %v2372_v56 = vsel %vm491_vm4, %v5825_v18, %v5783_v16  ;;  %v2393_v38 = vmul.f32 %v2388_v46, %v4511_v52  ;;  %v2375_v16 = vsel %vm491_vm4, %v6055_v44, %v6057_v36  ;;  %v6889_v46 = vld [vmem:[#allocation19_spill] sm:$0xff] }
 0x4d0   : > { %3887 = vmatprep.subr.bf16.mxu1 %v3886_v61  ;;  %v6082_v8 = vpop.permute.xlu0 %2414  ;;  %v2395_v57 = vmul.f32 %v2389_v47, %v4511_v52  ;;  %v3904_v61 = vpack.c.bf16 %v5723_v22, %v5707_v26  ;;  %v2392_v15 = vmul.f32 %v2372_v56, %v4508_v51  ;;  %v2433_v10 = vsel %vm514_vm5, %v6883_v59, %v5905_v3  ;;  %v6888_v47 = vld [vmem:[#allocation21_spill] sm:$0xff]  ;;  %v6891_v56 = vld [vmem:[#allocation14_spill] sm:$0xff] }
 0x4d1   : > { %3100 = vrot.lane.b32.xlu1 %v5908_v34, %s4317_s25  ;;  %v2398_v27 = vmul.f32 %v2375_v16, %v4508_v51  ;;  %v2417_v58 = vsel %vm514_vm5, %v5905_v3, %v6883_v59  ;;  %v6893_v16 = vld [vmem:[#allocation17_spill] sm:$0xff] }
 0x4d2   : > { %3014 = vrot.lane.b32.xlu0 %v5939_v32, %s4314_s23  ;;  %v3906_v9 = vpack.c.bf16 %v2395_v57, %v2393_v38  ;;  %v6892_v38 = vld [vmem:[#allocation15_spill] sm:$0xff] }
 0x4d3   : > { %v6096_v60 = vpop.permute.xlu1 %2456  ;;  %3889 = vmatpush1.bf16.msra.mxu1 %v3888_v31 }
 0x4d4   : > { %3891 = vmatprep.subr.bf16.mxu1 %v3890_v35  ;;  %v6098_v24 = vpop.permute.xlu0 %2458  ;;  %v6885_v35 = vld [vmem:[#allocation13_spill] sm:$0xff] }
 0x4d5   : > { %2488 = vrot.lane.b32.xlu1 %v5638_v28, %s4318_s26  ;;  %v2391_v28 = vsel %vm491_vm4, %v6057_v36, %v6055_v44  ;;  %v6884_v36 = vld [vmem:[#allocation10_spill] sm:$0xff] }
 0x4d6   : > { %2498 = vrot.lane.b32.xlu0 %v5709_v0, %s4318_s26  ;;  %v2399_v18 = vmul.f32 %v2391_v28, %v4511_v52  ;;  %v2432_v14 = vsel %vm514_vm5, %v6885_v35, %v6884_v36  ;;  %v2416_v6 = vsel %vm514_vm5, %v6884_v36, %v6885_v35  ;;  %v2438_v28 = vmul.f32 %v2417_v58, %v6890_v37 }
 0x4d7   : > { %v6106_v25 = vpop.permute.xlu1 %2836  ;;  %3893 = vmatpush1.bf16.msra.mxu1 %v3892_v53  ;;  %v6887_v53 = vld [vmem:[#allocation16_spill] sm:$0xff]  ;;  %v2436_v59 = vmul.f32 %v2416_v6, %v6890_v37 }
 0x4d8   : > { %3895 = vmatprep.subr.bf16.mxu1 %v3894_v5  ;;  %v3003_v1 = vpop.permute.xlu0 %3002 }
 0x4d9   : > { %2492 = vrot.lane.b32.xlu1 %v5658_v39, %s4318_s26 }
 0x4da   : > { %3058 = vrot.lane.b32.xlu0 %v5939_v32, %s4315_s24 }
 0x4db   : > { %v6117_v49 = vpop.permute.xlu1 %2880  ;;  %3897 = vmatpush1.bf16.msra.mxu1 %v3896_v29  ;;  %v2435_v29 = vsel %vm514_vm5, %v6082_v8, %v6080_v33 }
 0x4dc   : > { %3899 = vmatprep.subr.bf16.mxu1 %v3898_v19  ;;  %v6119_v48 = vpop.permute.xlu0 %3046 }
 0x4dd   : > { %2496 = vrot.lane.b32.xlu1 %v5707_v26, %s4318_s26  ;;  %v2374_v26 = vsel %vm491_vm4, %v5953_v63, %v5924_v54  ;;  %v6886_v63 = vld [vmem:[#allocation5_spill] sm:$0xff] }
 0x4de   : > { %2502 = vrot.lane.b32.xlu0 %v5744_v7, %s4318_s26  ;;  %v2394_v7 = vmul.f32 %v2373_v11, %v4508_v51  ;;  %v2439_v54 = vmul.f32 %v2433_v10, %v6886_v63  ;;  %v2396_v5 = vmul.f32 %v2374_v26, %v4508_v51  ;;  %v2437_v3 = vmul.f32 %v2432_v14, %v6886_v63 }
 0x4df   : > { %v6142_v39 = vpop.permute.xlu1 %2924  ;;  %3901 = vmatpush1.bf16.msra.mxu1 %v3900_v62  ;;  %v2477_v62 = vsel %vm537_vm6, %v6889_v46, %v6888_v47  ;;  %v2461_v10 = vsel %vm537_vm6, %v6888_v47, %v6889_v46  ;;  %v2418_v26 = vsel %vm514_vm5, %v6891_v56, %v6892_v38  ;;  %v6897_v46 = vld [vmem:[#allocation22_spill] sm:$0xff] }
 0x4e0   : > { %3903 = vmatprep.subr.bf16.mxu1 %v3902_v20  ;;  %v6148_v0 = vpop.permute.xlu0 %2838  ;;  %v3908_v12 = vpack.c.bf16 %v2394_v7, %v2392_v15  ;;  %v2434_v7 = vsel %vm514_vm5, %v6892_v38, %v6891_v56  ;;  %v3914_v15 = vpack.c.bf16 %v2439_v54, %v2437_v3  ;;  %v3916_v54 = vpack.c.bf16 %v2438_v28, %v2436_v59 }
 0x4e1   : > { %2500 = vrot.lane.b32.xlu1 %v5723_v22, %s4318_s26  ;;  %v2397_v22 = vmul.f32 %v2390_v13, %v4511_v52  ;;  %v3912_v13 = vpack.c.bf16 %v2398_v27, %v2396_v5  ;;  %v2441_v36 = vmul.f32 %v2434_v7, %v6886_v63  ;;  %v6896_v5 = vld [vmem:[#allocation6_spill] sm:$0xff] }
 0x4e2   : > { %3102 = vrot.lane.b32.xlu0 %v5939_v32, %s4317_s25 }
 0x4e3   : > { %v6168_v31 = vpop.permute.xlu1 %2968  ;;  %3905 = vmatpush1.bf16.msra.mxu1 %v3904_v61  ;;  %v3910_v30 = vpack.c.bf16 %v2399_v18, %v2397_v22  ;;  %v2419_v61 = vsel %vm514_vm5, %v6080_v33, %v6082_v8  ;;  %v6895_v33 = vld [vmem:[#allocation7_spill] sm:$0xff] }
 0x4e4   : > { %3907 = vmatprep.subr.bf16.mxu1 %v3906_v9  ;;  %v6174_v44 = vpop.permute.xlu0 %2882  ;;  %v2443_v9 = vmul.f32 %v2435_v29, %v6886_v63  ;;  %v2483_v8 = vmul.f32 %v2477_v62, %v6895_v33  ;;  %v2442_v35 = vmul.f32 %v2419_v61, %v6890_v37  ;;  %v2482_v29 = vmul.f32 %v2461_v10, %v6896_v5  ;;  %v6898_v62 = vld [vmem:[#allocation12_spill] sm:$0xff] }
 0x4e5   : > { %3132 = vrot.lane.b32.xlu1 %v5775_v17, %s4318_s26  ;;  %v2478_v28 = vsel %vm537_vm6, %v6898_v62, %v6897_v46 }
 0x4e6   : > { %3134 = vrot.lane.b32.xlu0 %v6887_v53, %s4318_s26  ;;  %v3918_v6 = vpack.c.bf16 %v2443_v9, %v2441_v36 }
 0x4e7   : > { %v3001_v19 = vpop.permute.xlu1 %3000  ;;  %3909 = vmatpush1.bf16.msra.mxu1 %v3908_v12 }
 0x4e8   : > { %v6200_v11 = vsel %vm491_vm4, %v3001_v19, %v3003_v1  ;;  %v6203_v57 = vsel %vm491_vm4, %v3003_v1, %v3001_v19  ;;  %3911 = vmatprep.subr.bf16.mxu1 %v3910_v30  ;;  %v6205_v20 = vpop.permute.xlu0 %2926  ;;  %v6894_v1 = vld [vmem:[#allocation11_spill] sm:$0xff]  ;;  %v2440_v30 = vmul.f32 %v2418_v26, %v6890_v37  ;;  %v2479_v19 = vsel %vm537_vm6, %v6098_v24, %v6096_v60 }
 0x4e9   : > { %3136 = vrot.lane.b32.xlu1 %v5791_v50, %s4318_s26  ;;  %v2476_v18 = vsel %vm537_vm6, %v6894_v1, %v6893_v16 }
 0x4ea   : > { %3138 = vrot.lane.b32.xlu0 %v5835_v55, %s4318_s26  ;;  %v2481_v58 = vmul.f32 %v2476_v18, %v6895_v33  ;;  %v3920_v56 = vpack.c.bf16 %v2442_v35, %v2440_v30 }
 0x4eb   : > { %v3045_v22 = vpop.permute.xlu1 %3044  ;;  %3913 = vmatpush1.bf16.msra.mxu1 %v3912_v13 }
 0x4ec   : > { %v6234_v14 = vsel %vm514_vm5, %v3045_v22, %v6119_v48  ;;  %v6238_v12 = vsel %vm514_vm5, %v6119_v48, %v3045_v22  ;;  %3915 = vmatprep.subr.bf16.mxu1 %v3914_v15  ;;  %v6240_v27 = vpop.permute.xlu0 %2970  ;;  %v2460_v48 = vsel %vm537_vm6, %v6893_v16, %v6894_v1  ;;  %v3922_v47 = vpack.c.bf16 %v2483_v8, %v2481_v58  ;;  %v6899_v16 = vld [vmem:[#allocation2_spill] sm:$0xff] }
 0x4ed   : > { %3140 = vrot.lane.b32.xlu1 %v5892_v45, %s4318_s26  ;;  %v2463_v15 = vsel %vm537_vm6, %v6096_v60, %v6098_v24  ;;  %v2480_v8 = vmul.f32 %v2460_v48, %v6896_v5  ;;  %v3658_v60 = vld [vmem:[%s6757_s5 + $0x28] sm:$0xff]  ;;  %v2462_v24 = vsel %vm537_vm6, %v6897_v46, %v6898_v62  ;;  %v2485_v22 = vmul.f32 %v2478_v28, %v6895_v33  ;;  %v3659_v48 = vld [vmem:[%s6757_s5 + $0x30] sm:$0xff] }
 0x4ee   : > { %3142 = vrot.lane.b32.xlu0 %v5897_v4, %s4318_s26  ;;  %v2486_v30 = vmul.f32 %v2463_v15, %v6896_v5 }
 0x4ef   : > { %v2821_v3 = vpop.permute.xlu1 %2820  ;;  %3917 = vmatpush1.bf16.msra.mxu1 %v3916_v54  ;;  %v3924_v54 = vpack.c.bf16 %v2482_v29, %v2480_v8  ;;  %v3660_v29 = vld [vmem:[%s6757_s5 + $0x38] sm:$0xff] }
 0x4f0   : > { %v2844_v38 = vsel %vm400_vm1, %v6106_v25, %v2821_v3  ;;  %v2856_v7 = vsel %vm400_vm1, %v2821_v3, %v6106_v25  ;;  %3919 = vmatprep.subr.bf16.mxu1 %v3918_v6  ;;  %v2823_v13 = vpop.permute.xlu0 %2822  ;;  %v2487_v25 = vmul.f32 %v2479_v19, %v6895_v33  ;;  %v2484_v19 = vmul.f32 %v2462_v24, %v6896_v5 }
 0x4f1   : > { %v2860_v61 = vmul.f32 %v2856_v7, %v6863_v2  ;;  %v2861_v1 = vmul.f32 %v2844_v38, %v6899_v16  ;;  %v2845_v18 = vsel %vm400_vm1, %v6148_v0, %v2823_v13  ;;  %v2857_v9 = vsel %vm400_vm1, %v2823_v13, %v6148_v0  ;;  %3144 = vrot.lane.b32.xlu1 %v5908_v34, %s4318_s26  ;;  %v3657_v0 = vld [vmem:[%s6757_s5 + $0x20] sm:$0xff] }
 0x4f2   : > { %v2862_v59 = vmul.f32 %v2857_v9, %v6863_v2  ;;  %v2863_v10 = vmul.f32 %v2845_v18, %v6899_v16  ;;  %3146 = vrot.lane.b32.xlu0 %v5939_v32, %s4318_s26  ;;  %v3926_v6 = vpack.c.bf16 %v2487_v25, %v2485_v22  ;;  %v3928_v62 = vpack.c.bf16 %v2486_v30, %v2484_v19  ;;  %v3685_v7 = vld [vmem:[%s6759_s7 + $0x20] sm:$0xff]  ;;  %v3687_v22 = vld [vmem:[%s6759_s7 + $0x30] sm:$0xff] }
 0x4f3   : > { %v6282_v26 = vpop.permute.xlu1 %2868  ;;  %3921 = vmatpush1.bf16.msra.mxu1 %v3920_v56 }
 0x4f4   : > { %v3940_v36 = vpack.c.bf16 %v2862_v59, %v2860_v61  ;;  %3923 = vmatprep.subr.bf16.mxu1 %v3922_v47  ;;  %v6291_v35 = vpop.permute.xlu0 %2870  ;;  %v3938_v58 = vpack.c.bf16 %v2863_v10, %v2861_v1  ;;  %v3686_v61 = vld [vmem:[%s6759_s7 + $0x28] sm:$0xff]  ;;  %v3645_v1 = vld [vmem:[%s6756_s4 + $0x60] sm:$0xff] }
 0x4f5   : > { %2534 = vperm.xlu1 %4109, %v3657_v0   ;;  %v3649_v59 = vld [vmem:[%s6756_s4 + $0x80] sm:$0xff] }
 0x4f6   : > { %2539 = vperm.xlu0 %4108, %v3658_v60   ;;  %3939 = vmatprep.subr.bf16.mxu0 %v3938_v58  ;;  %v3688_v58 = vld [vmem:[%s6759_s7 + $0x38] sm:$0xff] }
 0x4f7   : > { %v6298_v3 = vpop.permute.xlu1 %2912  ;;  %3925 = vmatpush1.bf16.msra.mxu1 %v3924_v54  ;;  %3941 = vmatpush1.bf16.msra.mxu0 %v3940_v36 }
 0x4f8   : > { %v2944_v47 = vsel %vm446_vm2, %v6298_v3, %v6142_v39  ;;  %3927 = vmatprep.subr.bf16.mxu1 %v3926_v6  ;;  %v6306_v46 = vpop.permute.xlu0 %2914 }
 0x4f9   : > { %v6309_v28 = vmul.f32 %v2944_v47, %v4489_v40  ;;  %v2945_v56 = vsel %vm446_vm2, %v6306_v46, %v6205_v20  ;;  %2544 = vperm.xlu1 %4109, %v3659_v48   ;;  %v3652_v48 = vld [vmem:[%s6756_s4 + $0x98] sm:$0xff] }
 0x4fa   : > { %v6315_v38 = vmul.f32 %v2945_v56, %v4489_v40  ;;  %2549 = vperm.xlu0 %4108, %v3660_v29   ;;  %v6376_v29 = vmul.f32 %v6200_v11, %v4508_v51 }
 0x4fb   : > { %v2957_v13 = vpop.permute.xlu1 %2956  ;;  %3929 = vmatpush1.bf16.msra.mxu1 %v3928_v62  ;;  %v3443_v62 = vld [vmem:[%s6761_s9] sm:$0x3f] }
 0x4fc   : > { %v2976_v9 = vsel %vm469_vm3, %v6168_v31, %v2957_v13  ;;  %v2988_v15 = vsel %vm469_vm3, %v2957_v13, %v6168_v31  ;;  %v2959_v25 = vpop.permute.xlu0 %2958  ;;  %v2901_v13 = vsel %vm423_vm0, %v6291_v35, %v6174_v44 }
 0x4fd   : > { %v6336_v10 = vmul.f32 %v2988_v15, %v4495_v42  ;;  %v6339_v0 = vmul.f32 %v2976_v9, %v4498_v43  ;;  %v2977_v8 = vsel %vm469_vm3, %v6240_v27, %v2959_v25  ;;  %v2989_v60 = vsel %vm469_vm3, %v2959_v25, %v6240_v27  ;;  %3178 = vperm.xlu1 %4109, %v3685_v7   ;;  %v3648_v27 = vld [vmem:[%s6756_s4 + $0x78] sm:$0xff]  ;;  %v3651_v7 = vld [vmem:[%s6756_s4 + $0x90] sm:$0xff] }
 0x4fe   : > { %v6346_v31 = vmul.f32 %v2989_v60, %v4495_v42  ;;  %v6349_v24 = vmul.f32 %v2977_v8, %v4498_v43  ;;  %3183 = vperm.xlu0 %4108, %v3686_v61   ;;  %2629 = vmatmul.mubr.f32.vlgmr.msra.gmra.mrb[8].mxu1 %v3645_v1  ;;  %v3655_v61 = vld [vmem:[%s6756_s4 + $0xb0] sm:$0xff]  ;;  %v6396_v15 = vmul.f32 %v6234_v14, %v6890_v37 }
 0x4ff   : > { %v6354_v36 = vpop.permute.xlu1 %3004  ;;  %2634 = vmatprep.mubr.f32.mxu1 %v3649_v59  ;;  %v6400_v25 = vmul.f32 %v6238_v12, %v6886_v63  ;;  %v2900_v12 = vsel %vm423_vm0, %v6282_v26, %v6117_v49 }
 0x500   : > { %v6364_v30 = vpop.permute.xlu0 %3006  ;;  %6900 = vst [vmem:[#allocation20_spill] sm:$0xff] %v6396_v15 }
 0x501   : > { %v3017_v19 = vsel %vm491_vm4, %v6354_v36, %v6364_v30  ;;  %3188 = vperm.xlu1 %4109, %v3687_v22   ;;  %6901 = vst [vmem:[#allocation3_spill] sm:$0xff] %v6400_v25  ;;  %v3654_v22 = vld [vmem:[%s6756_s4 + $0xa8] sm:$0xff] }
 0x502   : > { %v6379_v47 = vmul.f32 %v3017_v19, %v4508_v51  ;;  %3193 = vperm.xlu0 %4108, %v3688_v58   ;;  %2635 = vmatmul.mubr.f32.gmra.mrb[10].mxu1 %v3648_v27 }
 0x503   : > { %v3049_v56 = vpop.permute.xlu1 %3048  ;;  %2640 = vmatprep.mubr.f32.mxu1 %v3652_v48  ;;  %v6903_v48 = vmov 0.0  }
 0x504   : > { %v3051_v11 = vpop.permute.xlu0 %3050 }
 0x505   : > { %v3061_v1 = vsel %vm514_vm5, %v3049_v56, %v3051_v11  ;;  %v3077_v9 = vsel %vm514_vm5, %v3051_v11, %v3049_v56  ;;  %3446 = vperm.xlu1 %4109, %v3443_v62  }
 0x506   : > { %v6403_v59 = vmul.f32 %v3061_v1, %v6890_v37  ;;  %v6406_v8 = vmul.f32 %v3077_v9, %v6886_v63  ;;  %2641 = vmatmul.mubr.f32.gmra.mrb[12].mxu1 %v3651_v7  ;;  %v2888_v9 = vsel %vm423_vm0, %v6117_v49, %v6282_v26 }
 0x507   : > { %v2841_v60 = vpop.permute.xlu1 %2840  ;;  %2646 = vmatprep.mubr.f32.mxu1 %v3655_v61  ;;  %v2905_v33 = vmul.f32 %v2888_v9, %v4466_v21 }
 0x508   : > { %6902 = vst [vmem:[#allocation18_spill] sm:$0xff] %v6403_v59  ;;  %v6413_v58 = vpop.permute.xlu0 %3010 }
 0x50a   : > { %2647 = vmatmul.mubr.f32.gmra.mrb[14].mxu1 %v3654_v22  ;;  %v2889_v22 = vsel %vm423_vm0, %v6174_v44, %v6291_v35 }
 0x50b   : > { %v2885_v27 = vpop.permute.xlu1 %2884  ;;  %2717 = vmatprep.mubr.f32.mxu1 %v6903_v48  ;;  %v2907_v49 = vmul.f32 %v2889_v22, %v4466_v21 }
 0x50c   : > { %v2843_v19 = vpop.permute.xlu0 %2842 }
 0x50f   : > { %v2929_v62 = vpop.permute.xlu1 %2928 }
 0x510   : > { %v2887_v56 = vpop.permute.xlu0 %2886 }
 0x513   : > { %v6418_v7 = vpop.permute.xlu1 %2972 }
 0x514   : > { %v2931_v11 = vpop.permute.xlu0 %2930 }
 0x517   : > { %v6420_v61 = vpop.permute.xlu1 %3008 }
 0x518   : > { %v6422_v1 = vpop.permute.xlu0 %2974 }
 0x51b   : > { %v2825_v14 = vpop.permute.xlu1 %2824 }
 0x51c   : > { %v2846_v54 = vsel %vm400_vm1, %v2841_v60, %v2825_v14  ;;  %v2858_v6 = vsel %vm400_vm1, %v2825_v14, %v2841_v60  ;;  %v2827_v18 = vpop.permute.xlu0 %2826  ;;  %v2904_v60 = vmul.f32 %v2900_v12, %v4472_v23 }
 0x51d   : > { %v2864_v48 = vmul.f32 %v2858_v6, %v6863_v2  ;;  %v2865_v15 = vmul.f32 %v2846_v54, %v6899_v16  ;;  %v2847_v59 = vsel %vm400_vm1, %v2843_v19, %v2827_v18  ;;  %v2859_v5 = vsel %vm400_vm1, %v2827_v18, %v2843_v19 }
 0x51e   : > { %v2866_v26 = vmul.f32 %v2859_v5, %v6863_v2  ;;  %v2867_v44 = vmul.f32 %v2847_v59, %v6899_v16  ;;  %v2906_v6 = vmul.f32 %v2901_v13, %v4472_v23  ;;  %v3946_v18 = vpack.c.bf16 %v2907_v49, %v2905_v33 }
 0x51f   : > { %v6446_v35 = vpop.permute.xlu1 %3052  ;;  %v2932_v19 = vsel %vm446_vm2, %v6142_v39, %v6298_v3  ;;  %v2933_v2 = vsel %vm446_vm2, %v6205_v20, %v6306_v46 }
 0x520   : > { %v3944_v14 = vpack.c.bf16 %v2866_v26, %v2864_v48  ;;  %v6450_v54 = vpop.permute.xlu0 %3054  ;;  %v3942_v25 = vpack.c.bf16 %v2867_v44, %v2865_v15  ;;  %v3948_v16 = vpack.c.bf16 %v2906_v6, %v2904_v60  ;;  %v2949_v3 = vmul.f32 %v2932_v19, %v4492_v41 }
 0x521   : > { %v2951_v20 = vmul.f32 %v2933_v2, %v4492_v41 }
 0x522   : > { %3943 = vmatprep.subr.bf16.mxu0 %v3942_v25 }
 0x523   : > { %v2873_v5 = vpop.permute.xlu1 %2872  ;;  %3945 = vmatpush1.bf16.msra.mxu0 %v3944_v14  ;;  %v3954_v26 = vpack.c.bf16 %v2951_v20, %v2949_v3 }
 0x524   : > { %v2890_v59 = vsel %vm423_vm0, %v2885_v27, %v2873_v5  ;;  %v2902_v13 = vsel %vm423_vm0, %v2873_v5, %v2885_v27  ;;  %3947 = vmatprep.subr.bf16.mxu0 %v3946_v18  ;;  %v2875_v12 = vpop.permute.xlu0 %2874 }
 0x525   : > { %v2908_v15 = vmul.f32 %v2902_v13, %v4472_v23  ;;  %v2909_v33 = vmul.f32 %v2890_v59, %v4466_v21  ;;  %v2891_v25 = vsel %vm423_vm0, %v2887_v56, %v2875_v12  ;;  %v2903_v39 = vsel %vm423_vm0, %v2875_v12, %v2887_v56 }
 0x526   : > { %v2910_v46 = vmul.f32 %v2903_v39, %v4472_v23  ;;  %v2911_v48 = vmul.f32 %v2891_v25, %v4466_v21 }
 0x527   : > { %v2917_v9 = vpop.permute.xlu1 %2916  ;;  %3949 = vmatpush1.bf16.msra.mxu0 %v3948_v16 }
 0x528   : > { %v3952_v27 = vpack.c.bf16 %v2910_v46, %v2908_v15  ;;  %v6468_v22 = vpop.permute.xlu0 %3090  ;;  %v3950_v49 = vpack.c.bf16 %v2911_v48, %v2909_v33  ;;  %v2934_v44 = vsel %vm446_vm2, %v2929_v62, %v2917_v9  ;;  %v2946_v56 = vsel %vm446_vm2, %v2917_v9, %v2929_v62 }
 0x529   : > { %v2952_v14 = vmul.f32 %v2946_v56, %v4489_v40  ;;  %v2953_v18 = vmul.f32 %v2934_v44, %v4492_v41  ;;  %v6904_v62 = vpack.c.bf16 %v6315_v38, %v6309_v28  ;;  %v3033_v48 = vsel %vm491_vm4, %v6364_v30, %v6354_v36 }
 0x52a   : > { %3951 = vmatprep.subr.bf16.mxu0 %v3950_v49  ;;  %v3974_v9 = vpack.c.bf16 %v5939_v32, %v5897_v4  ;;  %v3976_v36 = vpack.c.bf16 %v5908_v34, %v5892_v45  ;;  %v6907_v56 = vpack.c.bf16 %v6379_v47, %v6376_v29 }
 0x52b   : > { %v2961_v60 = vpop.permute.xlu1 %2960  ;;  %3953 = vmatpush1.bf16.msra.mxu0 %v3952_v27 }
 0x52c   : > { %3955 = vmatprep.subr.bf16.mxu0 %v3954_v26  ;;  %v2919_v6 = vpop.permute.xlu0 %2918  ;;  %v2990_v12 = vsel %vm469_vm3, %v2961_v60, %v6418_v7 }
 0x52d   : > { %v2935_v23 = vsel %vm446_vm2, %v2931_v11, %v2919_v6  ;;  %v2947_v21 = vsel %vm446_vm2, %v2919_v6, %v2931_v11  ;;  %v2978_v11 = vsel %vm469_vm3, %v6418_v7, %v2961_v60  ;;  %v2996_v33 = vmul.f32 %v2990_v12, %v4495_v42 }
 0x52e   : > { %v2954_v19 = vmul.f32 %v2947_v21, %v4489_v40  ;;  %v2955_v2 = vmul.f32 %v2935_v23, %v4492_v41  ;;  %v6905_v40 = vpack.c.bf16 %v6349_v24, %v6339_v0  ;;  %v2997_v25 = vmul.f32 %v2978_v11, %v4498_v43  ;;  %v6910_v11 = vld [vmem:[#allocation3_spill] sm:$0xff] }
 0x52f   : > { %v3013_v5 = vpop.permute.xlu1 %3012  ;;  %3957 = vmatpush1.bf16.msra.mxu0 %v6904_v62  ;;  %v6906_v0 = vpack.c.bf16 %v6346_v31, %v6336_v10  ;;  %v3972_v10 = vpack.c.bf16 %v5791_v50, %v5775_v17  ;;  %v3039_v31 = vmul.f32 %v3033_v48, %v4511_v52  ;;  %v3018_v17 = vsel %vm491_vm4, %v6420_v61, %v6413_v58  ;;  %v6914_v48 = vld [vmem:[#allocation18_spill] sm:$0xff] }
 0x530   : > { %v3960_v16 = vpack.c.bf16 %v2954_v19, %v2952_v14  ;;  %v6481_v59 = vpop.permute.xlu0 %3094  ;;  %v3958_v13 = vpack.c.bf16 %v2955_v2, %v2953_v18  ;;  %v3034_v50 = vsel %vm491_vm4, %v6413_v58, %v6420_v61  ;;  %v3040_v45 = vmul.f32 %v3018_v17, %v4508_v51  ;;  %v6908_v19 = vld [vmem:[#allocation9_spill] sm:$0xff] }
 0x531   : > { %v3041_v34 = vmul.f32 %v3034_v50, %v4511_v52  ;;  %v3062_v58 = vsel %vm514_vm5, %v6446_v35, %v6450_v54  ;;  %v3078_v60 = vsel %vm514_vm5, %v6450_v54, %v6446_v35  ;;  %v6911_v12 = vpack.c.bf16 %v6406_v8, %v6910_v11 }
 0x532   : > { %3959 = vmatprep.subr.bf16.mxu0 %v3958_v13  ;;  %v3084_v14 = vmul.f32 %v3062_v58, %v6890_v37  ;;  %v3085_v18 = vmul.f32 %v3078_v60, %v6886_v63 }
 0x533   : > { %v6487_v15 = vpop.permute.xlu1 %3056  ;;  %3961 = vmatpush1.bf16.msra.mxu0 %v3960_v16 }
 0x534   : > { %3963 = vmatprep.subr.bf16.mxu0 %v6905_v40  ;;  %v2963_v41 = vpop.permute.xlu0 %2962 }
 0x535   : > { %v2979_v28 = vsel %vm469_vm3, %v6422_v1, %v2963_v41  ;;  %v2991_v38 = vsel %vm469_vm3, %v2963_v41, %v6422_v1  ;;  %v3970_v1 = vpack.c.bf16 %v5835_v55, %v6887_v53  ;;  %v3037_v55 = vmul.f32 %v6203_v57, %v4511_v52 }
 0x536   : > { %v2998_v7 = vmul.f32 %v2991_v38, %v4495_v42  ;;  %v2999_v39 = vmul.f32 %v2979_v28, %v4498_v43 }
 0x537   : > { %v3089_v3 = vpop.permute.xlu1 %3088  ;;  %3965 = vmatpush1.bf16.msra.mxu0 %v6906_v0  ;;  %v3978_v30 = vpack.c.bf16 %v3039_v31, %v3037_v55  ;;  %v6913_v0 = vld [vmem:[#allocation6_spill] sm:$0xff] }
 0x538   : > { %v3968_v24 = vpack.c.bf16 %v2998_v7, %v2996_v33  ;;  %v6503_v20 = vpop.permute.xlu0 %3098  ;;  %v3966_v46 = vpack.c.bf16 %v2999_v39, %v2997_v25  ;;  %v3120_v29 = vsel %vm537_vm6, %v6468_v22, %v3089_v3  ;;  %v3104_v33 = vsel %vm537_vm6, %v3089_v3, %v6468_v22  ;;  %v6912_v25 = vld [vmem:[#allocation7_spill] sm:$0xff] }
 0x539   : > { %v3124_v3 = vmul.f32 %v3104_v33, %v6913_v0 }
 0x53a   : > { %3967 = vmatprep.subr.bf16.mxu0 %v3966_v46 }
 0x53b   : > { %v3093_v42 = vpop.permute.xlu1 %3092  ;;  %3969 = vmatpush1.bf16.msra.mxu0 %v3968_v24 }
 0x53c   : > { %3971 = vmatprep.subr.bf16.mxu0 %v3970_v1  ;;  %v2491_v43 = vpop.permute.xlu0 %2490  ;;  %v3105_v47 = vsel %vm537_vm6, %v3093_v42, %v6481_v59  ;;  %v3121_v35 = vsel %vm537_vm6, %v6481_v59, %v3093_v42  ;;  %v6915_v42 = vld [vmem:[#allocation20_spill] sm:$0xff] }
 0x53d   : > { %v3127_v7 = vmul.f32 %v3121_v35, %v6912_v25  ;;  %v3126_v24 = vmul.f32 %v3105_v47, %v6913_v0  ;;  %v3673_v47 = vld [vmem:[%s6758_s6 + $0x60] sm:$0xff] }
 0x53f   : > { %v6515_v27 = vpop.permute.xlu1 %3096  ;;  %3973 = vmatpush1.bf16.msra.mxu0 %v3972_v10 }
 0x540   : > { %3975 = vmatprep.subr.bf16.mxu0 %v3974_v9  ;;  %v2495_v53 = vpop.permute.xlu0 %2494 }
 0x543   : > { %v6527_v4 = vpop.permute.xlu1 %3100  ;;  %3977 = vmatpush1.bf16.msra.mxu0 %v3976_v36  ;;  %v3106_v36 = vsel %vm537_vm6, %v6515_v27, %v6503_v20 }
 0x544   : > { %3979 = vmatprep.subr.bf16.mxu0 %v3978_v30  ;;  %v3015_v32 = vpop.permute.xlu0 %3014  ;;  %v3122_v30 = vsel %vm537_vm6, %v6503_v20, %v6515_v27  ;;  %v3128_v27 = vmul.f32 %v3106_v36, %v6913_v0 }
 0x545   : > { %v3019_v57 = vsel %vm491_vm4, %v3013_v5, %v3015_v32  ;;  %v3035_v49 = vsel %vm491_vm4, %v3015_v32, %v3013_v5  ;;  %v6909_v5 = vld [vmem:[#allocation8_spill] sm:$0xff]  ;;  %v3129_v58 = vmul.f32 %v3122_v30, %v6912_v25 }
 0x546   : > { %v3042_v26 = vmul.f32 %v3019_v57, %v4508_v51  ;;  %v3043_v44 = vmul.f32 %v3035_v49, %v4511_v52 }
 0x547   : > { %v2489_v61 = vpop.permute.xlu1 %2488  ;;  %3981 = vmatpush1.bf16.msra.mxu0 %v6907_v56 }
 0x548   : > { %v3984_v6 = vpack.c.bf16 %v3042_v26, %v3040_v45  ;;  %v2499_v23 = vpop.permute.xlu0 %2498  ;;  %v3982_v21 = vpack.c.bf16 %v3043_v44, %v3041_v34  ;;  %v2504_v51 = vsel %vm560_vm7, %v2489_v61, %v2491_v43  ;;  %v2520_v52 = vsel %vm560_vm7, %v2491_v43, %v2489_v61 }
 0x549   : > { %v2524_v2 = vmul.f32 %v2504_v51, %v6908_v19  ;;  %v2525_v62 = vmul.f32 %v2520_v52, %v6909_v5  ;;  %v6916_v43 = vpack.c.bf16 %v6914_v48, %v6915_v42  ;;  %v3683_v48 = vld [vmem:[%s6758_s6 + $0xb0] sm:$0xff] }
 0x54a   : > { %3983 = vmatprep.subr.bf16.mxu0 %v3982_v21 }
 0x54b   : > { %v2493_v54 = vpop.permute.xlu1 %2492  ;;  %3985 = vmatpush1.bf16.msra.mxu0 %v3984_v6 }
 0x54c   : > { %v2505_v16 = vsel %vm560_vm7, %v2493_v54, %v2495_v53  ;;  %v2521_v13 = vsel %vm560_vm7, %v2495_v53, %v2493_v54  ;;  %3987 = vmatprep.subr.bf16.mxu0 %v6911_v12  ;;  %v3059_v40 = vpop.permute.xlu0 %3058  ;;  %v3996_v53 = vpack.c.bf16 %v3126_v24, %v3124_v3  ;;  %v3677_v54 = vld [vmem:[%s6758_s6 + $0x80] sm:$0xff]  ;;  %v3682_v3 = vld [vmem:[%s6758_s6 + $0xa8] sm:$0xff] }
 0x54d   : > { %v2526_v41 = vmul.f32 %v2505_v16, %v6908_v19  ;;  %v2527_v28 = vmul.f32 %v2521_v13, %v6909_v5  ;;  %v3063_v59 = vsel %vm514_vm5, %v6487_v15, %v3059_v40  ;;  %v3079_v38 = vsel %vm514_vm5, %v3059_v40, %v6487_v15 }
 0x54e   : > { %v3086_v39 = vmul.f32 %v3063_v59, %v6890_v37  ;;  %v3087_v8 = vmul.f32 %v3079_v38, %v6886_v63  ;;  %v3125_v15 = vmul.f32 %v3120_v29, %v6912_v25  ;;  %v6917_v40 = vmov 0.0   ;;  %v3676_v59 = vld [vmem:[%s6758_s6 + $0x78] sm:$0xff] }
 0x54f   : > { %v3932_v46 = vpack.c.bf16 %v2526_v41, %v2524_v2  ;;  %v2497_v1 = vpop.permute.xlu1 %2496  ;;  %3989 = vmatpush1.bf16.msra.mxu0 %v6916_v43  ;;  %v3930_v10 = vpack.c.bf16 %v2527_v28, %v2525_v62  ;;  %v3650_v41 = vld [vmem:[%s6756_s4 + $0x88] sm:$0xff] }
 0x550   : > { %v3992_v31 = vpack.c.bf16 %v3086_v39, %v3084_v14  ;;  %v2503_v9 = vpop.permute.xlu0 %2502  ;;  %v3990_v22 = vpack.c.bf16 %v3087_v8, %v3085_v18  ;;  %v2506_v37 = vsel %vm560_vm7, %v2497_v1, %v2499_v23  ;;  %v2522_v63 = vsel %vm560_vm7, %v2499_v23, %v2497_v1  ;;  %v3653_v8 = vld [vmem:[%s6756_s4 + $0xa0] sm:$0xff] }
 0x551   : > { %3931 = vmatprep.subr.bf16.mxu1 %v3930_v10  ;;  %v3994_v55 = vpack.c.bf16 %v3127_v7, %v3125_v15  ;;  %v2528_v50 = vmul.f32 %v2506_v37, %v6908_v19  ;;  %v2529_v32 = vmul.f32 %v2522_v63, %v6909_v5  ;;  %v3680_v7 = vld [vmem:[%s6758_s6 + $0x98] sm:$0xff] }
 0x552   : > { %3933 = vmatpush1.bf16.msra.mxu1 %v3932_v46  ;;  %3991 = vmatprep.subr.bf16.mxu0 %v3990_v22  ;;  %v3679_v46 = vld [vmem:[%s6758_s6 + $0x90] sm:$0xff]  ;;  %v3656_v22 = vld [vmem:[%s6756_s4 + $0xb8] sm:$0xff] }
 0x553   : > { %v2501_v17 = vpop.permute.xlu1 %2500  ;;  %3993 = vmatpush1.bf16.msra.mxu0 %v3992_v31 }
 0x554   : > { %v2507_v57 = vsel %vm560_vm7, %v2501_v17, %v2503_v9  ;;  %v2523_v49 = vsel %vm560_vm7, %v2503_v9, %v2501_v17  ;;  %3995 = vmatprep.subr.bf16.mxu0 %v3994_v55  ;;  %v3103_v45 = vpop.permute.xlu0 %3102  ;;  %v3681_v55 = vld [vmem:[%s6758_s6 + $0xa0] sm:$0xff] }
 0x555   : > { %v2530_v34 = vmul.f32 %v2507_v57, %v6908_v19  ;;  %v2531_v26 = vmul.f32 %v2523_v49, %v6909_v5  ;;  %v3107_v44 = vsel %vm537_vm6, %v6527_v4, %v3103_v45  ;;  %v3123_v20 = vsel %vm537_vm6, %v3103_v45, %v6527_v4  ;;  %v3647_v4 = vld [vmem:[%s6756_s4 + $0x70] sm:$0xff] }
 0x556   : > { %v3130_v61 = vmul.f32 %v3107_v44, %v6913_v0  ;;  %v3131_v56 = vmul.f32 %v3123_v20, %v6912_v25 }
 0x557   : > { %v3936_v60 = vpack.c.bf16 %v2530_v34, %v2528_v50  ;;  %v3133_v6 = vpop.permute.xlu1 %3132  ;;  %3997 = vmatpush1.bf16.msra.mxu0 %v3996_v53  ;;  %v3934_v23 = vpack.c.bf16 %v2531_v26, %v2529_v32  ;;  %v3684_v53 = vld [vmem:[%s6758_s6 + $0xb8] sm:$0xff] }
 0x558   : > { %v4000_v21 = vpack.c.bf16 %v3130_v61, %v3128_v27  ;;  %v3135_v51 = vpop.permute.xlu0 %3134  ;;  %v3998_v52 = vpack.c.bf16 %v3131_v56, %v3129_v58 }
 0x559   : > { %3935 = vmatprep.subr.bf16.mxu1 %v3934_v23  ;;  %v3148_v14 = vsel %vm560_vm7, %v3133_v6, %v3135_v51  ;;  %v3164_v18 = vsel %vm560_vm7, %v3135_v51, %v3133_v6 }
 0x55a   : > { %3937 = vmatpush1.bf16.msra.mxu1 %v3936_v60  ;;  %3999 = vmatprep.subr.bf16.mxu0 %v3998_v52  ;;  %v3168_v2 = vmul.f32 %v3148_v14, %v6908_v19  ;;  %v3169_v13 = vmul.f32 %v3164_v18, %v6909_v5 }
 0x55b   : > { %v3137_v29 = vpop.permute.xlu1 %3136  ;;  %4001 = vmatpush1.bf16.msra.mxu0 %v4000_v21 }
 0x55c   : > { %v3139_v35 = vpop.permute.xlu0 %3138 }
 0x55d   : > { %v3149_v62 = vsel %vm560_vm7, %v3137_v29, %v3139_v35  ;;  %v3165_v16 = vsel %vm560_vm7, %v3139_v35, %v3137_v29  ;;  %3661 = vmatmul.mubr.msk.f32.vlgmr.msra.gmra.mrb[8].mxu1 %vm1265_vm9, %v3647_v4 }
 0x55e   : > { %v3170_v11 = vmul.f32 %v3149_v62, %v6908_v19  ;;  %v3171_v12 = vmul.f32 %v3165_v16, %v6909_v5  ;;  %3273 = vmatmul.mubr.f32.vlgmr.msra.gmra.mrb[24].mxu0 %v3673_v47  ;;  %2723 = vmatprep.mubr.f32.mxu1 %v6917_v40 }
 0x55f   : > { %v3141_v28 = vpop.permute.xlu1 %3140  ;;  %3278 = vmatprep.mubr.f32.mxu0 %v3677_v54 }
 0x560   : > { %v4004_v38 = vpack.c.bf16 %v3170_v11, %v3168_v2  ;;  %v3143_v33 = vpop.permute.xlu0 %3142  ;;  %v4002_v25 = vpack.c.bf16 %v3171_v12, %v3169_v13 }
 0x561   : > { %3662 = vmatmul.mubr.msk.f32.gmra.mrb[10].mxu1 %vm1265_vm9, %v3650_v41  ;;  %v3150_v39 = vsel %vm560_vm7, %v3141_v28, %v3143_v33  ;;  %v3166_v0 = vsel %vm560_vm7, %v3143_v33, %v3141_v28 }
 0x562   : > { %3279 = vmatmul.mubr.f32.gmra.mrb[26].mxu0 %v3676_v59  ;;  %4003 = vmatprep.subr.bf16.mxu0 %v4002_v25  ;;  %v3172_v42 = vmul.f32 %v3150_v39, %v6908_v19  ;;  %v3173_v15 = vmul.f32 %v3166_v0, %v6909_v5 }
 0x563   : > { %v3145_v24 = vpop.permute.xlu1 %3144  ;;  %4005 = vmatpush1.bf16.msra.mxu0 %v4004_v38  ;;  %2729 = vmatprep.mubr.f32.mxu1 %v6917_v40 }
 0x564   : > { %v3147_v1 = vpop.permute.xlu0 %3146  ;;  %3284 = vmatprep.mubr.f32.mxu0 %v3680_v7 }
 0x565   : > { %v3151_v43 = vsel %vm560_vm7, %v3145_v24, %v3147_v1  ;;  %v3167_v10 = vsel %vm560_vm7, %v3147_v1, %v3145_v24  ;;  %3663 = vmatmul.mubr.msk.f32.gmra.mrb[12].mxu1 %vm1265_vm9, %v3653_v8 }
 0x566   : > { %v3174_v31 = vmul.f32 %v3151_v43, %v6908_v19  ;;  %v3175_v9 = vmul.f32 %v3167_v10, %v6909_v5  ;;  %3285 = vmatmul.mubr.f32.gmra.mrb[28].mxu0 %v3679_v46  ;;  %2735 = vmatprep.mubr.f32.mxu1 %v6917_v40  ;;  %v3675_v19 = vld [vmem:[%s6758_s6 + $0x70] sm:$0xff]  ;;  %v3678_v5 = vld [vmem:[%s6758_s6 + $0x88] sm:$0xff] }
 0x567   : > { %3290 = vmatprep.mubr.f32.mxu0 %v3683_v48 }
 0x568   : > { %v4008_v37 = vpack.c.bf16 %v3174_v31, %v3172_v42  ;;  %v4006_v63 = vpack.c.bf16 %v3175_v9, %v3173_v15 }
 0x569   : > { %3664 = vmatmul.mubr.msk.f32.gmra.mrb[14].mxu1 %vm1265_vm9, %v3656_v22 }
 0x56a   : > { %3291 = vmatmul.mubr.f32.gmra.mrb[30].mxu0 %v3682_v3  ;;  %4007 = vmatprep.subr.bf16.mxu0 %v4006_v63 }
 0x56b   : > { %4009 = vmatpush1.bf16.msra.mxu0 %v4008_v37  ;;  %3361 = vmatprep.mubr.f32.mxu0 %v6917_v40 }
 0x56c   : > { %3517 = vmatprep.mubr.f32.mxu1 %v6917_v40 }
 0x56e   : > { %3689 = vmatmul.mubr.msk.f32.vlgmr.msra.gmra.mrb[24].mxu0 %vm1265_vm9, %v3675_v19 }
 0x56f   : > { %3367 = vmatprep.mubr.f32.mxu0 %v6917_v40 }
 0x572   : > { %3690 = vmatmul.mubr.msk.f32.gmra.mrb[26].mxu0 %vm1265_vm9, %v3678_v5 }
 0x573   : > { %3373 = vmatprep.mubr.f32.mxu0 %v6917_v40 }
 0x574   : > { %v2535_v36 = vpop.permute.xlu1 %2534 }
 0x575   : > { %v2540_v49 = vpop.permute.xlu0 %2539 }
 0x576   : > { %3691 = vmatmul.mubr.msk.f32.gmra.mrb[28].mxu0 %vm1265_vm9, %v3681_v55 }
 0x577   : > { %3379 = vmatprep.mubr.f32.mxu0 %v6917_v40 }
 0x578   : > { %v2545_v58 = vpop.permute.xlu1 %2544 }
 0x579   : > { %v2550_v51 = vpop.permute.xlu0 %2549 }
 0x57a   : > { %3692 = vmatmul.mubr.msk.f32.gmra.mrb[30].mxu0 %vm1265_vm9, %v3684_v53 }
 0x57c   : > { %v3179_v16 = vpop.permute.xlu1 %3178 }
 0x57d   : > { %v3184_v25 = vpop.permute.xlu0 %3183 }
 0x580   : > { %v3189_v10 = vpop.permute.xlu1 %3188 }
 0x581   : > { %v3194_v53 = vpop.permute.xlu0 %3193 }
 0x630   : > { %v2719_v30 = vpop.f32.mrb[8].mxu1 }
 0x631   : > { %v6677_v17 = vadd.f32 %v2719_v30, %v2535_v36  ;;  %v2721_v50 = vpop.f32.mrb[9].mxu1 }
 0x632   : > { %v6679_v32 = vadd.f32 %v2721_v50, %v2535_v36 }
 0x633   : > { %v3665_v57 = vmul.f32 -1.442695, %v6677_v17 }
 0x634   : > { %v3666_v45 = vmul.f32 -1.442695, %v6679_v32  ;;  %v2725_v34 = vpop.f32.mrb[10].mxu1 }
 0x635   : > { %4238 = vpow2.f32 %v3665_v57  ;;  %v6683_v26 = vadd.f32 %v2725_v34, %v2540_v49  ;;  %v2727_v44 = vpop.f32.mrb[11].mxu1 }
 0x636   : > { %4240 = vpow2.f32 %v3666_v45  ;;  %v6685_v20 = vadd.f32 %v2727_v44, %v2540_v49 }
 0x637   : > { %v3667_v27 = vmul.f32 -1.442695, %v6683_v26 }
 0x638   : > { %v3668_v61 = vmul.f32 -1.442695, %v6685_v20  ;;  %v2731_v56 = vpop.f32.mrb[12].mxu1 }
 0x639   : > { %4242 = vpow2.f32 %v3667_v27  ;;  %v6689_v60 = vadd.f32 %v2731_v56, %v2545_v58  ;;  %v2733_v6 = vpop.f32.mrb[13].mxu1 }
 0x63a   : > { %4244 = vpow2.f32 %v3668_v61  ;;  %v6691_v23 = vadd.f32 %v2733_v6, %v2545_v58 }
 0x63b   : > { %v3669_v21 = vmul.f32 -1.442695, %v6689_v60 }
 0x63c   : > { %v3670_v52 = vmul.f32 -1.442695, %v6691_v23  ;;  %v2737_v14 = vpop.f32.mrb[14].mxu1 }
 0x63d   : > { %4246 = vpow2.f32 %v3669_v21  ;;  %v6695_v4 = vadd.f32 %v2737_v14, %v2550_v51  ;;  %v2739_v18 = vpop.f32.mrb[15].mxu1 }
 0x63e   : > { %4248 = vpow2.f32 %v3670_v52  ;;  %v6697_v29 = vadd.f32 %v2739_v18, %v2550_v51 }
 0x63f   : > { %v4239_v47 = vpop.eup %4238  ;;  %v3671_v35 = vmul.f32 -1.442695, %v6695_v4 }
 0x640   : > { %v4241_v54 = vpop.eup %4240  ;;  %v2766_v2 = vadd.f32 1.0, %v4239_v47  ;;  %v3672_v62 = vmul.f32 -1.442695, %v6697_v29 }
 0x641   : > { %v2767_v13 = vadd.f32 1.0, %v4241_v54  ;;  %4250 = vpow2.f32 %v3671_v35  ;;  %v3363_v11 = vpop.f32.mrb[24].mxu0 }
 0x642   : > { %v6701_v12 = vadd.f32 %v3363_v11, %v3179_v16  ;;  %v3365_v40 = vpop.f32.mrb[25].mxu0  ;;  %4252 = vrcp.f32 %v2766_v2 }
 0x643   : > { %v4243_v41 = vpop.eup %4242  ;;  %v6703_v28 = vadd.f32 %v3365_v40, %v3179_v16  ;;  %4254 = vpow2.f32 %v3672_v62 }
 0x644   : > { %v4245_v59 = vpop.eup %4244  ;;  %v2768_v38 = vadd.f32 1.0, %v4243_v41  ;;  %v3693_v33 = vmul.f32 -1.442695, %v6701_v12  ;;  %4256 = vrcp.f32 %v2767_v13 }
 0x645   : > { %v2769_v7 = vadd.f32 1.0, %v4245_v59  ;;  %v3694_v39 = vmul.f32 -1.442695, %v6703_v28  ;;  %v3369_v8 = vpop.f32.mrb[26].mxu0 }
 0x646   : > { %4258 = vrcp.f32 %v2768_v38  ;;  %v6707_v0 = vadd.f32 %v3369_v8, %v3184_v25  ;;  %v3371_v24 = vpop.f32.mrb[27].mxu0 }
 0x647   : > { %v4247_v46 = vpop.eup %4246  ;;  %4260 = vrcp.f32 %v2769_v7  ;;  %v6709_v1 = vadd.f32 %v3371_v24, %v3184_v25 }
 0x648   : > { %v4249_v48 = vpop.eup %4248  ;;  %v2770_v42 = vadd.f32 1.0, %v4247_v46  ;;  %4262 = vpow2.f32 %v3693_v33  ;;  %v3695_v43 = vmul.f32 -1.442695, %v6707_v0 }
 0x649   : > { %v2771_v15 = vadd.f32 1.0, %v4249_v48  ;;  %4264 = vpow2.f32 %v3694_v39  ;;  %v3696_v31 = vmul.f32 -1.442695, %v6709_v1  ;;  %v3375_v9 = vpop.f32.mrb[28].mxu0 }
 0x64a   : > { %4266 = vrcp.f32 %v2770_v42  ;;  %v6713_v22 = vadd.f32 %v3375_v9, %v3189_v10  ;;  %v3377_v3 = vpop.f32.mrb[29].mxu0 }
 0x64b   : > { %v4251_v37 = vpop.eup %4250  ;;  %4268 = vrcp.f32 %v2771_v15  ;;  %v6715_v63 = vadd.f32 %v3377_v3, %v3189_v10 }
 0x64c   : > { %v2772_v19 = vadd.f32 1.0, %v4251_v37  ;;  %4270 = vpow2.f32 %v3695_v43  ;;  %v3697_v5 = vmul.f32 -1.442695, %v6713_v22  ;;  %v4253_v55 = vpop.eup %4252 }
 0x64d   : > { %4272 = vpow2.f32 %v3696_v31  ;;  %v3698_v36 = vmul.f32 -1.442695, %v6715_v63  ;;  %v3381_v30 = vpop.f32.mrb[30].mxu0  ;;  %v4255_v50 = vpop.eup %4254  ;;  %v2790_v56 = vmul.f32 %v4253_v55, %v6677_v17 }
 0x64e   : > { %4274 = vrcp.f32 %v2772_v19  ;;  %v6719_v57 = vadd.f32 %v3381_v30, %v3194_v53  ;;  %v3383_v49 = vpop.f32.mrb[31].mxu0  ;;  %v4257_v45 = vpop.eup %4256  ;;  %v2773_v34 = vadd.f32 1.0, %v4255_v50 }
 0x64f   : > { %4276 = vpow2.f32 %v3697_v5  ;;  %v6721_v44 = vadd.f32 %v3383_v49, %v3194_v53  ;;  %v2791_v52 = vmul.f32 %v4257_v45, %v6679_v32  ;;  %v3447_v49 = vpop.permute.xlu1 %3446 }
 0x650   : > { %v4259_v27 = vpop.eup %4258  ;;  %4278 = vpow2.f32 %v3698_v36  ;;  %v3699_v58 = vmul.f32 -1.442695, %v6719_v57 }
 0x651   : > { %v4261_v61 = vpop.eup %4260  ;;  %v2792_v6 = vmul.f32 %v4259_v27, %v6683_v26  ;;  %4280 = vrcp.f32 %v2773_v34  ;;  %v3700_v21 = vmul.f32 -1.442695, %v6721_v44 }
 0x652   : > { %v4263_v51 = vpop.eup %4262  ;;  %v2793_v14 = vmul.f32 %v4261_v61, %v6685_v20  ;;  %4282 = vpow2.f32 %v3699_v58 }
 0x653   : > { %v4265_v18 = vpop.eup %4264  ;;  %v4012_v47 = vpack.c.bf16 %v2792_v6, %v2790_v56  ;;  %v3410_v35 = vadd.f32 1.0, %v4263_v51  ;;  %4284 = vpow2.f32 %v3700_v21 }
 0x654   : > { %v4267_v54 = vpop.eup %4266  ;;  %v3411_v2 = vadd.f32 1.0, %v4265_v18  ;;  %v4010_v62 = vpack.c.bf16 %v2793_v14, %v2791_v52 }
 0x655   : > { %v4269_v16 = vpop.eup %4268  ;;  %4286 = vrcp.f32 %v3410_v35  ;;  %v2794_v20 = vmul.f32 %v4267_v54, %v6689_v60 }
 0x656   : > { %v4271_v17 = vpop.eup %4270  ;;  %4011 = vmatprep.subr.bf16.mxu1 %v4010_v62  ;;  %4288 = vrcp.f32 %v3411_v2  ;;  %v2795_v8 = vmul.f32 %v4269_v16, %v6691_v23 }
 0x657   : > { %v4273_v26 = vpop.eup %4272  ;;  %v3412_v13 = vadd.f32 1.0, %v4271_v17  ;;  %4013 = vmatpush1.bf16.msra.mxu1 %v4012_v47 }
 0x658   : > { %v4275_v11 = vpop.eup %4274  ;;  %v3413_v32 = vadd.f32 1.0, %v4273_v26 }
 0x659   : > { %v4277_v40 = vpop.eup %4276  ;;  %v2796_v41 = vmul.f32 %v4275_v11, %v6695_v4  ;;  %4290 = vrcp.f32 %v3412_v13 }
 0x65a   : > { %v4279_v59 = vpop.eup %4278  ;;  %4292 = vrcp.f32 %v3413_v32  ;;  %v3414_v38 = vadd.f32 1.0, %v4277_v40 }
 0x65b   : > { %v4281_v33 = vpop.eup %4280  ;;  %v4016_v25 = vpack.c.bf16 %v2796_v41, %v2794_v20  ;;  %v3415_v7 = vadd.f32 1.0, %v4279_v59 }
 0x65c   : > { %v4283_v39 = vpop.eup %4282  ;;  %v2797_v24 = vmul.f32 %v4281_v33, %v6697_v29  ;;  %4294 = vrcp.f32 %v3414_v38 }
 0x65d   : > { %v4285_v46 = vpop.eup %4284  ;;  %v3416_v48 = vadd.f32 1.0, %v4283_v39  ;;  %4296 = vrcp.f32 %v3415_v7 }
 0x65e   : > { %v3417_v42 = vadd.f32 1.0, %v4285_v46  ;;  %v4014_v60 = vpack.c.bf16 %v2797_v24, %v2795_v8 }
 0x65f   : > { %4298 = vrcp.f32 %v3416_v48  ;;  %v4287_v4 = vpop.eup %4286 }
 0x660   : > { %4300 = vrcp.f32 %v3417_v42  ;;  %4015 = vmatprep.subr.bf16.mxu1 %v4014_v60  ;;  %v4289_v43 = vpop.eup %4288  ;;  %v3434_v31 = vmul.f32 %v4287_v4, %v6701_v12 }
 0x661   : > { %4017 = vmatpush1.bf16.msra.mxu1 %v4016_v25  ;;  %v3435_v29 = vmul.f32 %v4289_v43, %v6703_v28 }
 0x663   : > { %v4291_v10 = vpop.eup %4290 }
 0x664   : > { %v4293_v15 = vpop.eup %4292  ;;  %v3436_v23 = vmul.f32 %v4291_v10, %v6707_v0 }
 0x665   : > { %v3437_v9 = vmul.f32 %v4293_v15, %v6709_v1  ;;  %v3442_v1 = vld [vmem:[%s6760_s8] sm:$0x3f] }
 0x666   : > { %v4020_v3 = vpack.c.bf16 %v3436_v23, %v3434_v31  ;;  %v4295_v37 = vpop.eup %4294 }
 0x667   : > { %v4018_v19 = vpack.c.bf16 %v3437_v9, %v3435_v29  ;;  %v4297_v5 = vpop.eup %4296  ;;  %v3438_v36 = vmul.f32 %v4295_v37, %v6713_v22 }
 0x668   : > { %v3439_v12 = vmul.f32 %v4297_v5, %v6715_v63 }
 0x669   : > { %v4299_v55 = vpop.eup %4298  ;;  %4019 = vmatprep.subr.bf16.mxu1 %v4018_v19 }
 0x66a   : > { %v4301_v53 = vpop.eup %4300  ;;  %v3440_v30 = vmul.f32 %v4299_v55, %v6719_v57  ;;  %4021 = vmatpush1.bf16.msra.mxu1 %v4020_v3 }
 0x66b   : > { %v3441_v0 = vmul.f32 %v4301_v53, %v6721_v44 }
 0x66c   : > { %v4024_v28 = vpack.c.bf16 %v3440_v30, %v3438_v36 }
 0x66d   : > { %v4022_v50 = vpack.c.bf16 %v3441_v0, %v3439_v12 }
 0x66f   : > { %4023 = vmatprep.subr.bf16.mxu1 %v4022_v50 }
 0x670   : > { %4025 = vmatpush1.bf16.msra.mxu1 %v4024_v28 }
 0x673   : > { %3701 = vmatmul.mubr.msk.f32.vlgmr.msra.gmra.mrb[16].mxu1 %vm3449_vm10, %v3442_v1 }
 0x746   : > { %v3519_v22 = vpop.f32.mrb[16].mxu1 }
 0x747   : > { %v3520_v63 = vadd.f32 %v3519_v22, %v3447_v49  ;;  %v3521_v57 = vpop.f32.mrb[17].mxu1 }
 0x748   : > { %v3522_v45 = vadd.f32 %v3521_v57, %v3447_v49 }
 0x749   : > { %3524 = vst [vmem:[%s359_s28] sm:$0x3f] %v3520_v63 }
 0x74a   : > { %3525 = vst [vmem:[%s359_s28 + $0x8] sm:$0x3f] %v3522_v45 }
 0x74b PF: > { %s20_s13 = sadd.s32 1, %s4308_s13  }
 0x74c   : > { %p17_p4 = scmp.ge.s32.totalorder %s20_s13, 4  }
 0x74e   :  { %19 = sbr.rel (!%p17_p4) target bundleno = 1 (0x1), region = 101 }

</bundles_post_ra>
